<compile_context>
chip_gen: v5e
topology: v5e:2x2
jax: 0.10.0
libtpu: 0.0.40
codegen_flags: <defaults>
</compile_context>

<pallas_src>
import math

import jax
import jax.numpy as jnp
from jax.experimental import pallas as pl
from jax.experimental.pallas import tpu as pltpu

# ----------------------------- config (small synthetic shapes) -----------------------------
B = 2            # batch
L_TEXT = 8       # title tokens (position 0 is CLS)
L_FRAME = 4      # video frames
FRAME_FEAT = 64  # raw frame feature dim (input to video_fc)
H = 128          # hidden size (stand-in for 768)
N_HEADS = 2
HEAD_DIM = H // N_HEADS
HP = 128                     # per-head padded width (lane-aligned)
QKV_W = N_HEADS * 3 * HP     # 768: per-head [Q|K|V] blocks, each padded to 128 lanes
INTER = 256      # FFN intermediate
N_LAYERS = 2
VOCAB = 100
N_CLASSES = 10   # len(CATEGORY_ID_LIST)
C_PAD = 128      # classifier output padded to a full lane width (== H so it packs into hvec)
assert C_PAD == H
S = L_TEXT + L_FRAME         # per-batch sequence length (= 12)
S_TOT = B * S                # folded row count (= 24)
LN_EPS = 1e-12
ATT_SCALE = 1.0 / math.sqrt(HEAD_DIM)

# ----- hvec pack layout: all H-wide small params stacked into one (NV, H) f32 tensor -------
HV_TLN_G, HV_TLN_B, HV_VLN_G, HV_VLN_B, HV_BC = 0, 1, 2, 3, 4
HV_L0 = 5
HV_PER_LAYER = 6             # per layer: bo, ln1_g, ln1_b, b2, ln2_g, ln2_b
NV = HV_L0 + HV_PER_LAYER * N_LAYERS


# ----------------------------------- in-kernel helpers -------------------------------------
def _layernorm(x, g, b):
    mu = jnp.mean(x, axis=-1, keepdims=True)
    var = jnp.mean(jnp.square(x - mu), axis=-1, keepdims=True)
    return (x - mu) * jax.lax.rsqrt(var + LN_EPS) * g + b


def _gelu(x):
    # tanh-approx GELU (EUP-friendly).
    # TODO(synk): HF/PyTorch BERT uses the exact erf GELU; tanh approx differs at ~1e-3.
    return 0.5 * x * (1.0 + jnp.tanh(0.7978845608028654 * (x + 0.044715 * x * x * x)))


# ----------------------------------- fused forward kernel ----------------------------------
def fused_forward_kernel(
    # activations / masks (batch folded into rows)
    text_ref,       # (B*L_TEXT, H)        f32   text embeddings (gather+pos+type done in JAX)
    frame_ref,      # (B*L_FRAME, FF)      bf16  raw frame features
    vbias_ref,      # (B*L_FRAME, H)       f32   video_fc bias + video pos + video type, tiled
    att_bias_ref,   # (S_TOT, S_TOT)       f32   block-diagonal additive key mask
    pool_mask_ref,  # (B, S_TOT)           f32   per-batch pooling mask
    # packed small params
    hvec_ref,       # (NV, H)              f32
    bqkv_ref,       # (N_LAYERS, QKV_W)    f32
    b1_ref,         # (N_LAYERS, INTER)    f32
    # big weight stacks
    vfc_w_ref,      # (FF, H)              bf16
    wqkv_ref,       # (N_LAYERS, H, QKV_W) bf16  head-padded layout
    wo_ref,         # (N_LAYERS, N_HEADS*HP, H) bf16  head-padded rows
    w1_ref,         # (N_LAYERS, H, INTER) bf16
    w2_ref,         # (N_LAYERS, INTER, H) bf16
    wc_ref,         # (H, C_PAD)           f32
    # output
    out_ref,        # (B, C_PAD)           f32
):
    f32 = jnp.float32
    bf16 = jnp.bfloat16

    hv = hvec_ref[...]                                                   # (NV, H) f32

    # ---- embeddings: text LN, video_fc + video LN, assembled as [text rows | video rows] --
    text_ln = _layernorm(text_ref[...], hv[HV_TLN_G:HV_TLN_G + 1, :],
                         hv[HV_TLN_B:HV_TLN_B + 1, :])                   # (B*Lt, H)
    vid = jnp.dot(frame_ref[...], vfc_w_ref[...],
                  preferred_element_type=f32) + vbias_ref[...]           # (B*Lf, H)
    vid_ln = _layernorm(vid, hv[HV_VLN_G:HV_VLN_G + 1, :],
                        hv[HV_VLN_B:HV_VLN_B + 1, :])
    x = jnp.concatenate([text_ln, vid_ln], axis=0)                       # (S_TOT, H) f32

    att_bias = att_bias_ref[...]                                         # (S_TOT, S_TOT) f32

    # ---- transformer encoder, all layers resident in VMEM ---------------------------------
    for l in range(N_LAYERS):
        base = HV_L0 + HV_PER_LAYER * l
        x_bf = x.astype(bf16)
        # merged, head-padded QKV projection: (S_TOT, H) @ (H, QKV_W)
        qkv = jnp.dot(x_bf, wqkv_ref[l],
                      preferred_element_type=f32) + bqkv_ref[l]          # (S_TOT, QKV_W)
        qkv_bf = qkv.astype(bf16)                                        # single cast per layer

        ctx_heads = []
        for h in range(N_HEADS):
            o = h * 3 * HP                                               # 128-lane aligned slices
            qh = qkv_bf[:, o:o + HP]
            kh = qkv_bf[:, o + HP:o + 2 * HP]
            vh = qkv_bf[:, o + 2 * HP:o + 3 * HP]
            # scores = qh @ kh^T (padded lanes are zero -> exact), f32 accumulate
            s = jax.lax.dot_general(qh, kh, (((1,), (1,)), ((), ())),
                                    preferred_element_type=f32)
            s = s * ATT_SCALE + att_bias
            s = s - jnp.max(s, axis=-1, keepdims=True)
            p = jnp.exp(s)
            p = p * pl.reciprocal(jnp.sum(p, axis=-1, keepdims=True), approx=True)
            ctx_heads.append(jnp.dot(p.astype(bf16), vh,
                                     preferred_element_type=f32))        # (S_TOT, HP)
        # single merged output projection: (S_TOT, N_HEADS*HP) @ (N_HEADS*HP, H)
        ctx = jnp.concatenate(ctx_heads, axis=-1)
        attn = jnp.dot(ctx.astype(bf16), wo_ref[l],
                       preferred_element_type=f32) + hv[base:base + 1, :]
        x = _layernorm(attn + x, hv[base + 1:base + 2, :], hv[base + 2:base + 3, :])

        # FFN
        hmid = _gelu(jnp.dot(x.astype(bf16), w1_ref[l],
                             preferred_element_type=f32) + b1_ref[l])    # (S_TOT, INTER)
        ffn = jnp.dot(hmid.astype(bf16), w2_ref[l],
                      preferred_element_type=f32) + hv[base + 3:base + 4, :]
        x = _layernorm(ffn + x, hv[base + 4:base + 5, :], hv[base + 5:base + 6, :])

    # ---- masked mean pooling + classifier (f32) --------------------------------------------
    pmask = pool_mask_ref[...]                                           # (B, S_TOT)
    pooled = jnp.dot(pmask, x, preferred_element_type=f32)               # (B, H)
    denom = jnp.maximum(jnp.sum(pmask, axis=-1, keepdims=True), 1e-9)
    pooled = pooled / denom
    # Dropout(0.3): identity in eval mode.
    # TODO(synk): training-mode stochastic dropout not implemented; forward uses eval semantics.
    logits = jnp.dot(pooled, wc_ref[...], preferred_element_type=f32) + hv[HV_BC:HV_BC + 1, :]
    out_ref[...] = logits                                                # (B, C_PAD)


def _full_spec(shape):
    zeros = (0,) * len(shape)
    return pl.BlockSpec(shape, lambda i, _z=zeros: _z)


# --------------------------------- parameters (synthetic) ----------------------------------
def init_params(key):
    def nrm(k, shape, scale=0.02):
        return (scale * jax.random.normal(k, shape)).astype(jnp.float32)

    keys = iter(jax.random.split(key, 32))
    f32 = jnp.float32
    return {
        "word_emb": nrm(next(keys), (VOCAB, H)),
        "text_pos_emb": nrm(next(keys), (L_TEXT, H)),
        "text_type_emb": nrm(next(keys), (H,)),
        "text_ln_g": jnp.ones((H,), f32),
        "text_ln_b": jnp.zeros((H,), f32),
        "video_fc_w": nrm(next(keys), (FRAME_FEAT, H)),
        "video_fc_b": jnp.zeros((H,), f32),
        "video_pos_emb": nrm(next(keys), (L_FRAME, H)),
        "video_type_emb": nrm(next(keys), (H,)),
        "video_ln_g": jnp.ones((H,), f32),
        "video_ln_b": jnp.zeros((H,), f32),
        # stacked encoder layers; Q/K/V merged into one (H, 3H) weight per layer
        "wqkv": nrm(next(keys), (N_LAYERS, H, 3 * H)),
        "bqkv": jnp.zeros((N_LAYERS, 3 * H), f32),
        "wo": nrm(next(keys), (N_LAYERS, H, H)),
        "bo": jnp.zeros((N_LAYERS, H), f32),
        "ln1_g": jnp.ones((N_LAYERS, H), f32),
        "ln1_b": jnp.zeros((N_LAYERS, H), f32),
        "w1": nrm(next(keys), (N_LAYERS, H, INTER)),
        "b1": jnp.zeros((N_LAYERS, INTER), f32),
        "w2": nrm(next(keys), (N_LAYERS, INTER, H)),
        "b2": jnp.zeros((N_LAYERS, H), f32),
        "ln2_g": jnp.ones((N_LAYERS, H), f32),
        "ln2_b": jnp.zeros((N_LAYERS, H), f32),
        "cls_w": nrm(next(keys), (H, N_CLASSES)),
        "cls_b": jnp.zeros((N_CLASSES,), f32),
    }


def pack_params(p, batch):
    """One-time repacking of raw params into kernel-ready tensors (hoisted out of forward)."""
    f32 = jnp.float32
    bf16 = jnp.bfloat16

    # head-padded QKV weights / bias: per head, [Q|K|V] blocks each 64 -> 128 lane-padded
    wqkv_p = jnp.zeros((N_LAYERS, H, QKV_W), f32)
    bqkv_p = jnp.zeros((N_LAYERS, QKV_W), f32)
    for h in range(N_HEADS):
        for j, off in enumerate((0, H, 2 * H)):          # raw layout: [Q | K | V], each H wide
            src_lo = off + h * HEAD_DIM
            dst_lo = h * 3 * HP + j * HP
            wqkv_p = wqkv_p.at[:, :, dst_lo:dst_lo + HEAD_DIM].set(
                p["wqkv"][:, :, src_lo:src_lo + HEAD_DIM])
            bqkv_p = bqkv_p.at[:, dst_lo:dst_lo + HEAD_DIM].set(
                p["bqkv"][:, src_lo:src_lo + HEAD_DIM])

    # head-padded output projection rows (zero rows for the padded 64 lanes of each head's ctx)
    wo_p = jnp.zeros((N_LAYERS, N_HEADS * HP, H), f32)
    for h in range(N_HEADS):
        wo_p = wo_p.at[:, h * HP:h * HP + HEAD_DIM, :].set(
            p["wo"][:, h * HEAD_DIM:(h + 1) * HEAD_DIM, :])

    # packed H-wide small params
    bc_row = jnp.zeros((H,), f32).at[:N_CLASSES].set(p["cls_b"])
    rows = [p["text_ln_g"], p["text_ln_b"], p["video_ln_g"], p["video_ln_b"], bc_row]
    for l in range(N_LAYERS):
        rows += [p["bo"][l], p["ln1_g"][l], p["ln1_b"][l],
                 p["b2"][l], p["ln2_g"][l], p["ln2_b"][l]]
    hvec = jnp.stack(rows, axis=0)                       # (NV, H)

    # video positional + type + fc-bias, tiled to the folded video rows
    vbias = p["video_fc_b"][None, :] + p["video_pos_emb"] + p["video_type_emb"][None, :]
    vbias_tiled = jnp.tile(vbias, (batch, 1))            # (B*L_FRAME, H)

    # lane-padded classifier weight
    wc_pad = jnp.zeros((H, C_PAD), f32).at[:, :N_CLASSES].set(p["cls_w"])

    return {
        "word_emb": p["word_emb"],
        "text_pos_emb": p["text_pos_emb"],
        "text_type_emb": p["text_type_emb"],
        "vbias_tiled": vbias_tiled,
        "hvec": hvec,
        "bqkv_p": bqkv_p,
        "b1": p["b1"],
        "vfc_w": p["video_fc_w"].astype(bf16),
        "wqkv_p": wqkv_p.astype(bf16),
        "wo_p": wo_p.astype(bf16),
        "w1": p["w1"].astype(bf16),
        "w2": p["w2"].astype(bf16),
        "wc_pad": wc_pad,
    }


# ------------------------------------- forward pass ----------------------------------------
def multimodal_forward(kp, title_input, title_mask, frame_input, frame_mask, label):
    f32 = jnp.float32
    bf16 = jnp.bfloat16
    Bq, Lt = title_input.shape
    _, Lf, _ = frame_input.shape
    s_tot = Bq * (Lt + Lf)

    # embedding gather + positional/type adds (plain JAX: gather has no clean Pallas form here)
    text_pre = (jnp.take(kp["word_emb"], title_input, axis=0)
                + kp["text_pos_emb"][None, :Lt, :]
                + kp["text_type_emb"][None, None, :]).reshape(Bq * Lt, H)     # (B*Lt, H)
    frame_flat = frame_input.reshape(Bq * Lf, FRAME_FEAT).astype(bf16)        # pre-cast bf16

    # Batch folded into rows: [all text rows (batch-major) | all video rows (batch-major)].
    # The encoder + pooling are permutation-equivariant over rows (positions already baked into
    # the embeddings), so per-batch outputs match the reference [CLS | video | text-rest] order.
    row_mask = jnp.concatenate([title_mask.reshape(-1),
                                frame_mask.reshape(-1)]).astype(f32)          # (S_TOT,)
    row_batch = jnp.concatenate([jnp.repeat(jnp.arange(Bq), Lt),
                                 jnp.repeat(jnp.arange(Bq), Lf)])             # (S_TOT,)
    same_batch = (row_batch[:, None] == row_batch[None, :]).astype(f32)
    allowed = same_batch * row_mask[None, :]
    att_bias = (allowed - 1.0) * 1e4                                          # (S_TOT, S_TOT)
    pool_mask = ((row_batch[None, :] == jnp.arange(Bq)[:, None]).astype(f32)
                 * row_mask[None, :])                                         # (B, S_TOT)

    logits_pad = pl.pallas_call(
        fused_forward_kernel,
        out_shape=jax.ShapeDtypeStruct((Bq, C_PAD), f32),
        grid=(1,),
        in_specs=[
            _full_spec((Bq * Lt, H)),
            _full_spec((Bq * Lf, FRAME_FEAT)),
            _full_spec((Bq * Lf, H)),
            _full_spec((s_tot, s_tot)),
            _full_spec((Bq, s_tot)),
            _full_spec((NV, H)),
            _full_spec((N_LAYERS, QKV_W)),
            _full_spec((N_LAYERS, INTER)),
            _full_spec((FRAME_FEAT, H)),
            _full_spec((N_LAYERS, H, QKV_W)),
            _full_spec((N_LAYERS, N_HEADS * HP, H)),
            _full_spec((N_LAYERS, H, INTER)),
            _full_spec((N_LAYERS, INTER, H)),
            _full_spec((H, C_PAD)),
        ],
        out_specs=_full_spec((Bq, C_PAD)),
        compiler_params=pltpu.CompilerParams(dimension_semantics=("arbitrary",)),
    )(text_pre, frame_flat, kp["vbias_tiled"], att_bias, pool_mask,
      kp["hvec"], kp["bqkv_p"], kp["b1"], kp["vfc_w"],
      kp["wqkv_p"], kp["wo_p"], kp["w1"], kp["w2"], kp["wc_pad"])

    prediction = logits_pad[:, :N_CLASSES]                                    # (B, C)

    # --- cal_loss (glue on tiny (B, C) logits, done in plain JAX) ---
    lab = label.squeeze(1)
    logp = jax.nn.log_softmax(prediction, axis=-1)
    loss = -jnp.mean(jnp.take_along_axis(logp, lab[:, None], axis=1))
    pred_label_id = jnp.argmax(prediction, axis=1)
    accuracy = jnp.sum((lab == pred_label_id).astype(f32)) / lab.shape[0]
    return loss, accuracy, pred_label_id, lab


# ---------------------------------------- main ---------------------------------------------
if __name__ == "__main__":
    key = jax.random.PRNGKey(0)
    k_params, k_ids, k_frames, k_label = jax.random.split(key, 4)

    raw_params = init_params(k_params)
    kparams = jax.tree_util.tree_map(jax.block_until_ready, pack_params(raw_params, B))

    title_input = jax.random.randint(k_ids, (B, L_TEXT), 0, VOCAB, dtype=jnp.int32)
    title_mask = jnp.array([[1, 1, 1, 1, 1, 1, 1, 1],
                            [1, 1, 1, 1, 1, 0, 0, 0]], dtype=jnp.float32)
    frame_input = jax.random.normal(k_frames, (B, L_FRAME, FRAME_FEAT), dtype=jnp.float32)
    frame_mask = jnp.array([[1, 1, 1, 1],
                            [1, 1, 0, 0]], dtype=jnp.float32)
    label = jax.random.randint(k_label, (B, 1), 0, N_CLASSES, dtype=jnp.int32)

    fwd = jax.jit(multimodal_forward)
    loss, acc, pred_id, lab = fwd(kparams, title_input, title_mask, frame_input, frame_mask, label)
    jax.block_until_ready((loss, acc, pred_id, lab))
    print("KERNEL_OK")
</pallas_src>

<mosaic_0001>
module attributes {stable_mosaic.version = 11 : i64} {
  func.func @fused_forward_kernel(%arg0: i32, %arg1: memref<16x128xf32, #tpu.memory_space<vmem>>, %arg2: memref<8x64xbf16, #tpu.memory_space<vmem>>, %arg3: memref<8x128xf32, #tpu.memory_space<vmem>>, %arg4: memref<24x24xf32, #tpu.memory_space<vmem>>, %arg5: memref<2x24xf32, #tpu.memory_space<vmem>>, %arg6: memref<17x128xf32, #tpu.memory_space<vmem>>, %arg7: memref<2x768xf32, #tpu.memory_space<vmem>>, %arg8: memref<2x256xf32, #tpu.memory_space<vmem>>, %arg9: memref<64x128xbf16, #tpu.memory_space<vmem>>, %arg10: memref<2x128x768xbf16, #tpu.memory_space<vmem>>, %arg11: memref<2x256x128xbf16, #tpu.memory_space<vmem>>, %arg12: memref<2x128x256xbf16, #tpu.memory_space<vmem>>, %arg13: memref<2x256x128xbf16, #tpu.memory_space<vmem>>, %arg14: memref<128x128xf32, #tpu.memory_space<vmem>>, %arg15: memref<2x128xf32, #tpu.memory_space<vmem>>) attributes {dimension_semantics = [#tpu.dimension_semantics<arbitrary>], iteration_bounds = array<i64: 1>, scalar_prefetch = 0 : i64, scratch_operands = 0 : i64, tpu.core_type = #tpu.core_type<tc>, window_params = [{pipeline_mode = #tpu.pipeline_mode<synchronous>, transform_indices = @transform_0, window_bounds = array<i64: 16, 128>}, {pipeline_mode = #tpu.pipeline_mode<synchronous>, transform_indices = @transform_1, window_bounds = array<i64: 8, 64>}, {pipeline_mode = #tpu.pipeline_mode<synchronous>, transform_indices = @transform_2, window_bounds = array<i64: 8, 128>}, {pipeline_mode = #tpu.pipeline_mode<synchronous>, transform_indices = @transform_3, window_bounds = array<i64: 24, 24>}, {pipeline_mode = #tpu.pipeline_mode<synchronous>, transform_indices = @transform_4, window_bounds = array<i64: 2, 24>}, {pipeline_mode = #tpu.pipeline_mode<synchronous>, transform_indices = @transform_5, window_bounds = array<i64: 17, 128>}, {pipeline_mode = #tpu.pipeline_mode<synchronous>, transform_indices = @transform_6, window_bounds = array<i64: 2, 768>}, {pipeline_mode = #tpu.pipeline_mode<synchronous>, transform_indices = @transform_7, window_bounds = array<i64: 2, 256>}, {pipeline_mode = #tpu.pipeline_mode<synchronous>, transform_indices = @transform_8, window_bounds = array<i64: 64, 128>}, {pipeline_mode = #tpu.pipeline_mode<synchronous>, transform_indices = @transform_9, window_bounds = array<i64: 2, 128, 768>}, {pipeline_mode = #tpu.pipeline_mode<synchronous>, transform_indices = @transform_10, window_bounds = array<i64: 2, 256, 128>}, {pipeline_mode = #tpu.pipeline_mode<synchronous>, transform_indices = @transform_11, window_bounds = array<i64: 2, 128, 256>}, {pipeline_mode = #tpu.pipeline_mode<synchronous>, transform_indices = @transform_12, window_bounds = array<i64: 2, 256, 128>}, {pipeline_mode = #tpu.pipeline_mode<synchronous>, transform_indices = @transform_13, window_bounds = array<i64: 128, 128>}, {pipeline_mode = #tpu.pipeline_mode<synchronous>, transform_indices = @transform_14, window_bounds = array<i64: 2, 128>}]} {
    %c0 = arith.constant 0 : index
    %c0_0 = arith.constant 0 : index
    %0 = vector.load %arg6[%c0, %c0_0] : memref<17x128xf32, #tpu.memory_space<vmem>>, vector<17x128xf32>
    %c0_1 = arith.constant 0 : index
    %c0_2 = arith.constant 0 : index
    %1 = vector.load %arg1[%c0_1, %c0_2] : memref<16x128xf32, #tpu.memory_space<vmem>>, vector<16x128xf32>
    %2 = vector.extract_strided_slice %0 {offsets = [0, 0], sizes = [1, 128], strides = [1, 1]} : vector<17x128xf32> to vector<1x128xf32>
    %3 = vector.extract_strided_slice %0 {offsets = [1, 0], sizes = [1, 128], strides = [1, 1]} : vector<17x128xf32> to vector<1x128xf32>
    %cst = arith.constant dense<0.000000e+00> : vector<16xf32>
    %4 = vector.multi_reduction <add>, %1, %cst [1] : vector<16x128xf32> to vector<16xf32>
    %5 = vector.shape_cast %4 : vector<16xf32> to vector<16x1xf32>
    %cst_3 = arith.constant 1.280000e+02 : f32
    %6 = vector.broadcast %cst_3 : f32 to vector<16x1xf32>
    %7 = arith.divf %5, %6 : vector<16x1xf32>
    %8 = vector.broadcast %7 : vector<16x1xf32> to vector<16x128xf32>
    %9 = arith.subf %1, %8 : vector<16x128xf32>
    %10 = arith.mulf %9, %9 : vector<16x128xf32>
    %cst_4 = arith.constant dense<0.000000e+00> : vector<16xf32>
    %11 = vector.multi_reduction <add>, %10, %cst_4 [1] : vector<16x128xf32> to vector<16xf32>
    %12 = vector.shape_cast %11 : vector<16xf32> to vector<16x1xf32>
    %cst_5 = arith.constant 1.280000e+02 : f32
    %13 = vector.broadcast %cst_5 : f32 to vector<16x1xf32>
    %14 = arith.divf %12, %13 : vector<16x1xf32>
    %15 = vector.broadcast %7 : vector<16x1xf32> to vector<16x128xf32>
    %16 = arith.subf %1, %15 : vector<16x128xf32>
    %cst_6 = arith.constant 9.99999996E-13 : f32
    %17 = vector.broadcast %cst_6 : f32 to vector<16x1xf32>
    %18 = arith.addf %14, %17 : vector<16x1xf32>
    %19 = math.rsqrt %18 : vector<16x1xf32>
    %20 = vector.broadcast %19 : vector<16x1xf32> to vector<16x128xf32>
    %21 = arith.mulf %16, %20 : vector<16x128xf32>
    %22 = vector.broadcast %2 : vector<1x128xf32> to vector<16x128xf32>
    %23 = arith.mulf %21, %22 : vector<16x128xf32>
    %24 = vector.broadcast %3 : vector<1x128xf32> to vector<16x128xf32>
    %25 = arith.addf %23, %24 : vector<16x128xf32>
    %c0_7 = arith.constant 0 : index
    %c0_8 = arith.constant 0 : index
    %26 = vector.load %arg2[%c0_7, %c0_8] : memref<8x64xbf16, #tpu.memory_space<vmem>>, vector<8x64xbf16>
    %c0_9 = arith.constant 0 : index
    %c0_10 = arith.constant 0 : index
    %27 = vector.load %arg9[%c0_9, %c0_10] : memref<64x128xbf16, #tpu.memory_space<vmem>>, vector<64x128xbf16>
    %cst_11 = arith.constant dense<0.000000e+00> : vector<8x128xf32>
    %28 = tpu.matmul %26, %27, %cst_11 {dimension_numbers = #tpu.dot_dimension_numbers<[1], [0], [0], [1], [0, 0, 1, 1], [], []>} : vector<8x64xbf16>, vector<64x128xbf16>, vector<8x128xf32> -> vector<8x128xf32>
    %c0_12 = arith.constant 0 : index
    %c0_13 = arith.constant 0 : index
    %29 = vector.load %arg3[%c0_12, %c0_13] : memref<8x128xf32, #tpu.memory_space<vmem>>, vector<8x128xf32>
    %30 = arith.addf %28, %29 : vector<8x128xf32>
    %31 = vector.extract_strided_slice %0 {offsets = [2, 0], sizes = [1, 128], strides = [1, 1]} : vector<17x128xf32> to vector<1x128xf32>
    %32 = vector.extract_strided_slice %0 {offsets = [3, 0], sizes = [1, 128], strides = [1, 1]} : vector<17x128xf32> to vector<1x128xf32>
    %cst_14 = arith.constant dense<0.000000e+00> : vector<8xf32>
    %33 = vector.multi_reduction <add>, %30, %cst_14 [1] : vector<8x128xf32> to vector<8xf32>
    %34 = vector.shape_cast %33 : vector<8xf32> to vector<8x1xf32>
    %cst_15 = arith.constant 1.280000e+02 : f32
    %35 = vector.broadcast %cst_15 : f32 to vector<8x1xf32>
    %36 = arith.divf %34, %35 : vector<8x1xf32>
    %37 = vector.broadcast %36 : vector<8x1xf32> to vector<8x128xf32>
    %38 = arith.subf %30, %37 : vector<8x128xf32>
    %39 = arith.mulf %38, %38 : vector<8x128xf32>
    %cst_16 = arith.constant dense<0.000000e+00> : vector<8xf32>
    %40 = vector.multi_reduction <add>, %39, %cst_16 [1] : vector<8x128xf32> to vector<8xf32>
    %41 = vector.shape_cast %40 : vector<8xf32> to vector<8x1xf32>
    %cst_17 = arith.constant 1.280000e+02 : f32
    %42 = vector.broadcast %cst_17 : f32 to vector<8x1xf32>
    %43 = arith.divf %41, %42 : vector<8x1xf32>
    %44 = vector.broadcast %36 : vector<8x1xf32> to vector<8x128xf32>
    %45 = arith.subf %30, %44 : vector<8x128xf32>
    %cst_18 = arith.constant 9.99999996E-13 : f32
    %46 = vector.broadcast %cst_18 : f32 to vector<8x1xf32>
    %47 = arith.addf %43, %46 : vector<8x1xf32>
    %48 = math.rsqrt %47 : vector<8x1xf32>
    %49 = vector.broadcast %48 : vector<8x1xf32> to vector<8x128xf32>
    %50 = arith.mulf %45, %49 : vector<8x128xf32>
    %51 = vector.broadcast %31 : vector<1x128xf32> to vector<8x128xf32>
    %52 = arith.mulf %50, %51 : vector<8x128xf32>
    %53 = vector.broadcast %32 : vector<1x128xf32> to vector<8x128xf32>
    %54 = arith.addf %52, %53 : vector<8x128xf32>
    %55 = tpu.concatenate %25, %54 in 0 : vector<16x128xf32>, vector<8x128xf32> -> vector<24x128xf32>
    %c0_19 = arith.constant 0 : index
    %c0_20 = arith.constant 0 : index
    %56 = vector.load %arg4[%c0_19, %c0_20] : memref<24x24xf32, #tpu.memory_space<vmem>>, vector<24x24xf32>
    %57 = arith.truncf %55 : vector<24x128xf32> to vector<24x128xbf16>
    %c0_21 = arith.constant 0 : index
    %c0_22 = arith.constant 0 : index
    %c0_23 = arith.constant 0 : index
    %58 = vector.load %arg10[%c0_21, %c0_22, %c0_23] : memref<2x128x768xbf16, #tpu.memory_space<vmem>>, vector<1x128x768xbf16>
    %59 = vector.shape_cast %58 : vector<1x128x768xbf16> to vector<128x768xbf16>
    %cst_24 = arith.constant dense<0.000000e+00> : vector<24x768xf32>
    %60 = tpu.matmul %57, %59, %cst_24 {dimension_numbers = #tpu.dot_dimension_numbers<[1], [0], [0], [1], [0, 0, 1, 1], [], []>} : vector<24x128xbf16>, vector<128x768xbf16>, vector<24x768xf32> -> vector<24x768xf32>
    %c0_25 = arith.constant 0 : index
    %c0_26 = arith.constant 0 : index
    %61 = vector.load %arg7[%c0_25, %c0_26] : memref<2x768xf32, #tpu.memory_space<vmem>>, vector<1x768xf32>
    %62 = vector.shape_cast %61 : vector<1x768xf32> to vector<768xf32>
    %63 = vector.shape_cast %62 : vector<768xf32> to vector<1x768xf32>
    %64 = vector.broadcast %63 : vector<1x768xf32> to vector<24x768xf32>
    %65 = arith.addf %60, %64 : vector<24x768xf32>
    %66 = arith.truncf %65 : vector<24x768xf32> to vector<24x768xbf16>
    %67 = vector.extract_strided_slice %66 {offsets = [0, 0], sizes = [24, 128], strides = [1, 1]} : vector<24x768xbf16> to vector<24x128xbf16>
    %68 = vector.extract_strided_slice %66 {offsets = [0, 128], sizes = [24, 128], strides = [1, 1]} : vector<24x768xbf16> to vector<24x128xbf16>
    %69 = vector.extract_strided_slice %66 {offsets = [0, 256], sizes = [24, 128], strides = [1, 1]} : vector<24x768xbf16> to vector<24x128xbf16>
    %cst_27 = arith.constant dense<0.000000e+00> : vector<24x24xf32>
    %70 = tpu.matmul %67, %68, %cst_27 {dimension_numbers = #tpu.dot_dimension_numbers<[1], [1], [0], [0], [0, 0, 1, 0], [], []>} : vector<24x128xbf16>, vector<24x128xbf16>, vector<24x24xf32> -> vector<24x24xf32>
    %cst_28 = arith.constant 1.250000e-01 : f32
    %71 = vector.broadcast %cst_28 : f32 to vector<24x24xf32>
    %72 = arith.mulf %70, %71 : vector<24x24xf32>
    %73 = arith.addf %72, %56 : vector<24x24xf32>
    %cst_29 = arith.constant dense<0xFF800000> : vector<24xf32>
    %74 = vector.multi_reduction <maximumf>, %73, %cst_29 [1] : vector<24x24xf32> to vector<24xf32>
    %75 = vector.shape_cast %74 : vector<24xf32> to vector<24x1xf32>
    %76 = vector.broadcast %75 : vector<24x1xf32> to vector<24x24xf32>
    %77 = arith.subf %73, %76 : vector<24x24xf32>
    %78 = math.exp %77 : vector<24x24xf32>
    %cst_30 = arith.constant dense<0.000000e+00> : vector<24xf32>
    %79 = vector.multi_reduction <add>, %78, %cst_30 [1] : vector<24x24xf32> to vector<24xf32>
    %80 = vector.shape_cast %79 : vector<24xf32> to vector<24x1xf32>
    %81 = tpu.reciprocal %80 {approx = true} : vector<24x1xf32> -> vector<24x1xf32>
    %82 = vector.broadcast %81 : vector<24x1xf32> to vector<24x24xf32>
    %83 = arith.mulf %78, %82 : vector<24x24xf32>
    %84 = arith.truncf %83 : vector<24x24xf32> to vector<24x24xbf16>
    %cst_31 = arith.constant dense<0.000000e+00> : vector<24x128xf32>
    %85 = tpu.matmul %84, %69, %cst_31 {dimension_numbers = #tpu.dot_dimension_numbers<[1], [0], [0], [1], [0, 0, 1, 1], [], []>} : vector<24x24xbf16>, vector<24x128xbf16>, vector<24x128xf32> -> vector<24x128xf32>
    %86 = vector.extract_strided_slice %66 {offsets = [0, 384], sizes = [24, 128], strides = [1, 1]} : vector<24x768xbf16> to vector<24x128xbf16>
    %87 = vector.extract_strided_slice %66 {offsets = [0, 512], sizes = [24, 128], strides = [1, 1]} : vector<24x768xbf16> to vector<24x128xbf16>
    %88 = vector.extract_strided_slice %66 {offsets = [0, 640], sizes = [24, 128], strides = [1, 1]} : vector<24x768xbf16> to vector<24x128xbf16>
    %cst_32 = arith.constant dense<0.000000e+00> : vector<24x24xf32>
    %89 = tpu.matmul %86, %87, %cst_32 {dimension_numbers = #tpu.dot_dimension_numbers<[1], [1], [0], [0], [0, 0, 1, 0], [], []>} : vector<24x128xbf16>, vector<24x128xbf16>, vector<24x24xf32> -> vector<24x24xf32>
    %cst_33 = arith.constant 1.250000e-01 : f32
    %90 = vector.broadcast %cst_33 : f32 to vector<24x24xf32>
    %91 = arith.mulf %89, %90 : vector<24x24xf32>
    %92 = arith.addf %91, %56 : vector<24x24xf32>
    %cst_34 = arith.constant dense<0xFF800000> : vector<24xf32>
    %93 = vector.multi_reduction <maximumf>, %92, %cst_34 [1] : vector<24x24xf32> to vector<24xf32>
    %94 = vector.shape_cast %93 : vector<24xf32> to vector<24x1xf32>
    %95 = vector.broadcast %94 : vector<24x1xf32> to vector<24x24xf32>
    %96 = arith.subf %92, %95 : vector<24x24xf32>
    %97 = math.exp %96 : vector<24x24xf32>
    %cst_35 = arith.constant dense<0.000000e+00> : vector<24xf32>
    %98 = vector.multi_reduction <add>, %97, %cst_35 [1] : vector<24x24xf32> to vector<24xf32>
    %99 = vector.shape_cast %98 : vector<24xf32> to vector<24x1xf32>
    %100 = tpu.reciprocal %99 {approx = true} : vector<24x1xf32> -> vector<24x1xf32>
    %101 = vector.broadcast %100 : vector<24x1xf32> to vector<24x24xf32>
    %102 = arith.mulf %97, %101 : vector<24x24xf32>
    %103 = arith.truncf %102 : vector<24x24xf32> to vector<24x24xbf16>
    %cst_36 = arith.constant dense<0.000000e+00> : vector<24x128xf32>
    %104 = tpu.matmul %103, %88, %cst_36 {dimension_numbers = #tpu.dot_dimension_numbers<[1], [0], [0], [1], [0, 0, 1, 1], [], []>} : vector<24x24xbf16>, vector<24x128xbf16>, vector<24x128xf32> -> vector<24x128xf32>
    %105 = tpu.concatenate %85, %104 in 1 : vector<24x128xf32>, vector<24x128xf32> -> vector<24x256xf32>
    %106 = arith.truncf %105 : vector<24x256xf32> to vector<24x256xbf16>
    %c0_37 = arith.constant 0 : index
    %c0_38 = arith.constant 0 : index
    %c0_39 = arith.constant 0 : index
    %107 = vector.load %arg11[%c0_37, %c0_38, %c0_39] : memref<2x256x128xbf16, #tpu.memory_space<vmem>>, vector<1x256x128xbf16>
    %108 = vector.shape_cast %107 : vector<1x256x128xbf16> to vector<256x128xbf16>
    %cst_40 = arith.constant dense<0.000000e+00> : vector<24x128xf32>
    %109 = tpu.matmul %106, %108, %cst_40 {dimension_numbers = #tpu.dot_dimension_numbers<[1], [0], [0], [1], [0, 0, 1, 1], [], []>} : vector<24x256xbf16>, vector<256x128xbf16>, vector<24x128xf32> -> vector<24x128xf32>
    %110 = vector.extract_strided_slice %0 {offsets = [5, 0], sizes = [1, 128], strides = [1, 1]} : vector<17x128xf32> to vector<1x128xf32>
    %111 = vector.broadcast %110 : vector<1x128xf32> to vector<24x128xf32>
    %112 = arith.addf %109, %111 : vector<24x128xf32>
    %113 = arith.addf %112, %55 : vector<24x128xf32>
    %114 = vector.extract_strided_slice %0 {offsets = [6, 0], sizes = [1, 128], strides = [1, 1]} : vector<17x128xf32> to vector<1x128xf32>
    %115 = vector.extract_strided_slice %0 {offsets = [7, 0], sizes = [1, 128], strides = [1, 1]} : vector<17x128xf32> to vector<1x128xf32>
    %cst_41 = arith.constant dense<0.000000e+00> : vector<24xf32>
    %116 = vector.multi_reduction <add>, %113, %cst_41 [1] : vector<24x128xf32> to vector<24xf32>
    %117 = vector.shape_cast %116 : vector<24xf32> to vector<24x1xf32>
    %cst_42 = arith.constant 1.280000e+02 : f32
    %118 = vector.broadcast %cst_42 : f32 to vector<24x1xf32>
    %119 = arith.divf %117, %118 : vector<24x1xf32>
    %120 = vector.broadcast %119 : vector<24x1xf32> to vector<24x128xf32>
    %121 = arith.subf %113, %120 : vector<24x128xf32>
    %122 = arith.mulf %121, %121 : vector<24x128xf32>
    %cst_43 = arith.constant dense<0.000000e+00> : vector<24xf32>
    %123 = vector.multi_reduction <add>, %122, %cst_43 [1] : vector<24x128xf32> to vector<24xf32>
    %124 = vector.shape_cast %123 : vector<24xf32> to vector<24x1xf32>
    %cst_44 = arith.constant 1.280000e+02 : f32
    %125 = vector.broadcast %cst_44 : f32 to vector<24x1xf32>
    %126 = arith.divf %124, %125 : vector<24x1xf32>
    %127 = vector.broadcast %119 : vector<24x1xf32> to vector<24x128xf32>
    %128 = arith.subf %113, %127 : vector<24x128xf32>
    %cst_45 = arith.constant 9.99999996E-13 : f32
    %129 = vector.broadcast %cst_45 : f32 to vector<24x1xf32>
    %130 = arith.addf %126, %129 : vector<24x1xf32>
    %131 = math.rsqrt %130 : vector<24x1xf32>
    %132 = vector.broadcast %131 : vector<24x1xf32> to vector<24x128xf32>
    %133 = arith.mulf %128, %132 : vector<24x128xf32>
    %134 = vector.broadcast %114 : vector<1x128xf32> to vector<24x128xf32>
    %135 = arith.mulf %133, %134 : vector<24x128xf32>
    %136 = vector.broadcast %115 : vector<1x128xf32> to vector<24x128xf32>
    %137 = arith.addf %135, %136 : vector<24x128xf32>
    %138 = arith.truncf %137 : vector<24x128xf32> to vector<24x128xbf16>
    %c0_46 = arith.constant 0 : index
    %c0_47 = arith.constant 0 : index
    %c0_48 = arith.constant 0 : index
    %139 = vector.load %arg12[%c0_46, %c0_47, %c0_48] : memref<2x128x256xbf16, #tpu.memory_space<vmem>>, vector<1x128x256xbf16>
    %140 = vector.shape_cast %139 : vector<1x128x256xbf16> to vector<128x256xbf16>
    %cst_49 = arith.constant dense<0.000000e+00> : vector<24x256xf32>
    %141 = tpu.matmul %138, %140, %cst_49 {dimension_numbers = #tpu.dot_dimension_numbers<[1], [0], [0], [1], [0, 0, 1, 1], [], []>} : vector<24x128xbf16>, vector<128x256xbf16>, vector<24x256xf32> -> vector<24x256xf32>
    %c0_50 = arith.constant 0 : index
    %c0_51 = arith.constant 0 : index
    %142 = vector.load %arg8[%c0_50, %c0_51] : memref<2x256xf32, #tpu.memory_space<vmem>>, vector<1x256xf32>
    %143 = vector.shape_cast %142 : vector<1x256xf32> to vector<256xf32>
    %144 = vector.shape_cast %143 : vector<256xf32> to vector<1x256xf32>
    %145 = vector.broadcast %144 : vector<1x256xf32> to vector<24x256xf32>
    %146 = arith.addf %141, %145 : vector<24x256xf32>
    %cst_52 = arith.constant 5.000000e-01 : f32
    %147 = vector.broadcast %cst_52 : f32 to vector<24x256xf32>
    %148 = arith.mulf %147, %146 : vector<24x256xf32>
    %cst_53 = arith.constant 4.471500e-02 : f32
    %149 = vector.broadcast %cst_53 : f32 to vector<24x256xf32>
    %150 = arith.mulf %149, %146 : vector<24x256xf32>
    %151 = arith.mulf %150, %146 : vector<24x256xf32>
    %152 = arith.mulf %151, %146 : vector<24x256xf32>
    %153 = arith.addf %146, %152 : vector<24x256xf32>
    %cst_54 = arith.constant 0.797884583 : f32
    %154 = vector.broadcast %cst_54 : f32 to vector<24x256xf32>
    %155 = arith.mulf %154, %153 : vector<24x256xf32>
    %156 = math.tanh %155 : vector<24x256xf32>
    %cst_55 = arith.constant 1.000000e+00 : f32
    %157 = vector.broadcast %cst_55 : f32 to vector<24x256xf32>
    %158 = arith.addf %157, %156 : vector<24x256xf32>
    %159 = arith.mulf %148, %158 : vector<24x256xf32>
    %160 = arith.truncf %159 : vector<24x256xf32> to vector<24x256xbf16>
    %c0_56 = arith.constant 0 : index
    %c0_57 = arith.constant 0 : index
    %c0_58 = arith.constant 0 : index
    %161 = vector.load %arg13[%c0_56, %c0_57, %c0_58] : memref<2x256x128xbf16, #tpu.memory_space<vmem>>, vector<1x256x128xbf16>
    %162 = vector.shape_cast %161 : vector<1x256x128xbf16> to vector<256x128xbf16>
    %cst_59 = arith.constant dense<0.000000e+00> : vector<24x128xf32>
    %163 = tpu.matmul %160, %162, %cst_59 {dimension_numbers = #tpu.dot_dimension_numbers<[1], [0], [0], [1], [0, 0, 1, 1], [], []>} : vector<24x256xbf16>, vector<256x128xbf16>, vector<24x128xf32> -> vector<24x128xf32>
    %164 = vector.extract_strided_slice %0 {offsets = [8, 0], sizes = [1, 128], strides = [1, 1]} : vector<17x128xf32> to vector<1x128xf32>
    %165 = vector.broadcast %164 : vector<1x128xf32> to vector<24x128xf32>
    %166 = arith.addf %163, %165 : vector<24x128xf32>
    %167 = arith.addf %166, %137 : vector<24x128xf32>
    %168 = vector.extract_strided_slice %0 {offsets = [9, 0], sizes = [1, 128], strides = [1, 1]} : vector<17x128xf32> to vector<1x128xf32>
    %169 = vector.extract_strided_slice %0 {offsets = [10, 0], sizes = [1, 128], strides = [1, 1]} : vector<17x128xf32> to vector<1x128xf32>
    %cst_60 = arith.constant dense<0.000000e+00> : vector<24xf32>
    %170 = vector.multi_reduction <add>, %167, %cst_60 [1] : vector<24x128xf32> to vector<24xf32>
    %171 = vector.shape_cast %170 : vector<24xf32> to vector<24x1xf32>
    %cst_61 = arith.constant 1.280000e+02 : f32
    %172 = vector.broadcast %cst_61 : f32 to vector<24x1xf32>
    %173 = arith.divf %171, %172 : vector<24x1xf32>
    %174 = vector.broadcast %173 : vector<24x1xf32> to vector<24x128xf32>
    %175 = arith.subf %167, %174 : vector<24x128xf32>
    %176 = arith.mulf %175, %175 : vector<24x128xf32>
    %cst_62 = arith.constant dense<0.000000e+00> : vector<24xf32>
    %177 = vector.multi_reduction <add>, %176, %cst_62 [1] : vector<24x128xf32> to vector<24xf32>
    %178 = vector.shape_cast %177 : vector<24xf32> to vector<24x1xf32>
    %cst_63 = arith.constant 1.280000e+02 : f32
    %179 = vector.broadcast %cst_63 : f32 to vector<24x1xf32>
    %180 = arith.divf %178, %179 : vector<24x1xf32>
    %181 = vector.broadcast %173 : vector<24x1xf32> to vector<24x128xf32>
    %182 = arith.subf %167, %181 : vector<24x128xf32>
    %cst_64 = arith.constant 9.99999996E-13 : f32
    %183 = vector.broadcast %cst_64 : f32 to vector<24x1xf32>
    %184 = arith.addf %180, %183 : vector<24x1xf32>
    %185 = math.rsqrt %184 : vector<24x1xf32>
    %186 = vector.broadcast %185 : vector<24x1xf32> to vector<24x128xf32>
    %187 = arith.mulf %182, %186 : vector<24x128xf32>
    %188 = vector.broadcast %168 : vector<1x128xf32> to vector<24x128xf32>
    %189 = arith.mulf %187, %188 : vector<24x128xf32>
    %190 = vector.broadcast %169 : vector<1x128xf32> to vector<24x128xf32>
    %191 = arith.addf %189, %190 : vector<24x128xf32>
    %192 = arith.truncf %191 : vector<24x128xf32> to vector<24x128xbf16>
    %c1 = arith.constant 1 : index
    %c0_65 = arith.constant 0 : index
    %c0_66 = arith.constant 0 : index
    %193 = vector.load %arg10[%c1, %c0_65, %c0_66] : memref<2x128x768xbf16, #tpu.memory_space<vmem>>, vector<1x128x768xbf16>
    %194 = vector.shape_cast %193 : vector<1x128x768xbf16> to vector<128x768xbf16>
    %cst_67 = arith.constant dense<0.000000e+00> : vector<24x768xf32>
    %195 = tpu.matmul %192, %194, %cst_67 {dimension_numbers = #tpu.dot_dimension_numbers<[1], [0], [0], [1], [0, 0, 1, 1], [], []>} : vector<24x128xbf16>, vector<128x768xbf16>, vector<24x768xf32> -> vector<24x768xf32>
    %c1_68 = arith.constant 1 : index
    %c0_69 = arith.constant 0 : index
    %196 = vector.load %arg7[%c1_68, %c0_69] : memref<2x768xf32, #tpu.memory_space<vmem>>, vector<1x768xf32>
    %197 = vector.shape_cast %196 : vector<1x768xf32> to vector<768xf32>
    %198 = vector.shape_cast %197 : vector<768xf32> to vector<1x768xf32>
    %199 = vector.broadcast %198 : vector<1x768xf32> to vector<24x768xf32>
    %200 = arith.addf %195, %199 : vector<24x768xf32>
    %201 = arith.truncf %200 : vector<24x768xf32> to vector<24x768xbf16>
    %202 = vector.extract_strided_slice %201 {offsets = [0, 0], sizes = [24, 128], strides = [1, 1]} : vector<24x768xbf16> to vector<24x128xbf16>
    %203 = vector.extract_strided_slice %201 {offsets = [0, 128], sizes = [24, 128], strides = [1, 1]} : vector<24x768xbf16> to vector<24x128xbf16>
    %204 = vector.extract_strided_slice %201 {offsets = [0, 256], sizes = [24, 128], strides = [1, 1]} : vector<24x768xbf16> to vector<24x128xbf16>
    %cst_70 = arith.constant dense<0.000000e+00> : vector<24x24xf32>
    %205 = tpu.matmul %202, %203, %cst_70 {dimension_numbers = #tpu.dot_dimension_numbers<[1], [1], [0], [0], [0, 0, 1, 0], [], []>} : vector<24x128xbf16>, vector<24x128xbf16>, vector<24x24xf32> -> vector<24x24xf32>
    %cst_71 = arith.constant 1.250000e-01 : f32
    %206 = vector.broadcast %cst_71 : f32 to vector<24x24xf32>
    %207 = arith.mulf %205, %206 : vector<24x24xf32>
    %208 = arith.addf %207, %56 : vector<24x24xf32>
    %cst_72 = arith.constant dense<0xFF800000> : vector<24xf32>
    %209 = vector.multi_reduction <maximumf>, %208, %cst_72 [1] : vector<24x24xf32> to vector<24xf32>
    %210 = vector.shape_cast %209 : vector<24xf32> to vector<24x1xf32>
    %211 = vector.broadcast %210 : vector<24x1xf32> to vector<24x24xf32>
    %212 = arith.subf %208, %211 : vector<24x24xf32>
    %213 = math.exp %212 : vector<24x24xf32>
    %cst_73 = arith.constant dense<0.000000e+00> : vector<24xf32>
    %214 = vector.multi_reduction <add>, %213, %cst_73 [1] : vector<24x24xf32> to vector<24xf32>
    %215 = vector.shape_cast %214 : vector<24xf32> to vector<24x1xf32>
    %216 = tpu.reciprocal %215 {approx = true} : vector<24x1xf32> -> vector<24x1xf32>
    %217 = vector.broadcast %216 : vector<24x1xf32> to vector<24x24xf32>
    %218 = arith.mulf %213, %217 : vector<24x24xf32>
    %219 = arith.truncf %218 : vector<24x24xf32> to vector<24x24xbf16>
    %cst_74 = arith.constant dense<0.000000e+00> : vector<24x128xf32>
    %220 = tpu.matmul %219, %204, %cst_74 {dimension_numbers = #tpu.dot_dimension_numbers<[1], [0], [0], [1], [0, 0, 1, 1], [], []>} : vector<24x24xbf16>, vector<24x128xbf16>, vector<24x128xf32> -> vector<24x128xf32>
    %221 = vector.extract_strided_slice %201 {offsets = [0, 384], sizes = [24, 128], strides = [1, 1]} : vector<24x768xbf16> to vector<24x128xbf16>
    %222 = vector.extract_strided_slice %201 {offsets = [0, 512], sizes = [24, 128], strides = [1, 1]} : vector<24x768xbf16> to vector<24x128xbf16>
    %223 = vector.extract_strided_slice %201 {offsets = [0, 640], sizes = [24, 128], strides = [1, 1]} : vector<24x768xbf16> to vector<24x128xbf16>
    %cst_75 = arith.constant dense<0.000000e+00> : vector<24x24xf32>
    %224 = tpu.matmul %221, %222, %cst_75 {dimension_numbers = #tpu.dot_dimension_numbers<[1], [1], [0], [0], [0, 0, 1, 0], [], []>} : vector<24x128xbf16>, vector<24x128xbf16>, vector<24x24xf32> -> vector<24x24xf32>
    %cst_76 = arith.constant 1.250000e-01 : f32
    %225 = vector.broadcast %cst_76 : f32 to vector<24x24xf32>
    %226 = arith.mulf %224, %225 : vector<24x24xf32>
    %227 = arith.addf %226, %56 : vector<24x24xf32>
    %cst_77 = arith.constant dense<0xFF800000> : vector<24xf32>
    %228 = vector.multi_reduction <maximumf>, %227, %cst_77 [1] : vector<24x24xf32> to vector<24xf32>
    %229 = vector.shape_cast %228 : vector<24xf32> to vector<24x1xf32>
    %230 = vector.broadcast %229 : vector<24x1xf32> to vector<24x24xf32>
    %231 = arith.subf %227, %230 : vector<24x24xf32>
    %232 = math.exp %231 : vector<24x24xf32>
    %cst_78 = arith.constant dense<0.000000e+00> : vector<24xf32>
    %233 = vector.multi_reduction <add>, %232, %cst_78 [1] : vector<24x24xf32> to vector<24xf32>
    %234 = vector.shape_cast %233 : vector<24xf32> to vector<24x1xf32>
    %235 = tpu.reciprocal %234 {approx = true} : vector<24x1xf32> -> vector<24x1xf32>
    %236 = vector.broadcast %235 : vector<24x1xf32> to vector<24x24xf32>
    %237 = arith.mulf %232, %236 : vector<24x24xf32>
    %238 = arith.truncf %237 : vector<24x24xf32> to vector<24x24xbf16>
    %cst_79 = arith.constant dense<0.000000e+00> : vector<24x128xf32>
    %239 = tpu.matmul %238, %223, %cst_79 {dimension_numbers = #tpu.dot_dimension_numbers<[1], [0], [0], [1], [0, 0, 1, 1], [], []>} : vector<24x24xbf16>, vector<24x128xbf16>, vector<24x128xf32> -> vector<24x128xf32>
    %240 = tpu.concatenate %220, %239 in 1 : vector<24x128xf32>, vector<24x128xf32> -> vector<24x256xf32>
    %241 = arith.truncf %240 : vector<24x256xf32> to vector<24x256xbf16>
    %c1_80 = arith.constant 1 : index
    %c0_81 = arith.constant 0 : index
    %c0_82 = arith.constant 0 : index
    %242 = vector.load %arg11[%c1_80, %c0_81, %c0_82] : memref<2x256x128xbf16, #tpu.memory_space<vmem>>, vector<1x256x128xbf16>
    %243 = vector.shape_cast %242 : vector<1x256x128xbf16> to vector<256x128xbf16>
    %cst_83 = arith.constant dense<0.000000e+00> : vector<24x128xf32>
    %244 = tpu.matmul %241, %243, %cst_83 {dimension_numbers = #tpu.dot_dimension_numbers<[1], [0], [0], [1], [0, 0, 1, 1], [], []>} : vector<24x256xbf16>, vector<256x128xbf16>, vector<24x128xf32> -> vector<24x128xf32>
    %245 = vector.extract_strided_slice %0 {offsets = [11, 0], sizes = [1, 128], strides = [1, 1]} : vector<17x128xf32> to vector<1x128xf32>
    %246 = vector.broadcast %245 : vector<1x128xf32> to vector<24x128xf32>
    %247 = arith.addf %244, %246 : vector<24x128xf32>
    %248 = arith.addf %247, %191 : vector<24x128xf32>
    %249 = vector.extract_strided_slice %0 {offsets = [12, 0], sizes = [1, 128], strides = [1, 1]} : vector<17x128xf32> to vector<1x128xf32>
    %250 = vector.extract_strided_slice %0 {offsets = [13, 0], sizes = [1, 128], strides = [1, 1]} : vector<17x128xf32> to vector<1x128xf32>
    %cst_84 = arith.constant dense<0.000000e+00> : vector<24xf32>
    %251 = vector.multi_reduction <add>, %248, %cst_84 [1] : vector<24x128xf32> to vector<24xf32>
    %252 = vector.shape_cast %251 : vector<24xf32> to vector<24x1xf32>
    %cst_85 = arith.constant 1.280000e+02 : f32
    %253 = vector.broadcast %cst_85 : f32 to vector<24x1xf32>
    %254 = arith.divf %252, %253 : vector<24x1xf32>
    %255 = vector.broadcast %254 : vector<24x1xf32> to vector<24x128xf32>
    %256 = arith.subf %248, %255 : vector<24x128xf32>
    %257 = arith.mulf %256, %256 : vector<24x128xf32>
    %cst_86 = arith.constant dense<0.000000e+00> : vector<24xf32>
    %258 = vector.multi_reduction <add>, %257, %cst_86 [1] : vector<24x128xf32> to vector<24xf32>
    %259 = vector.shape_cast %258 : vector<24xf32> to vector<24x1xf32>
    %cst_87 = arith.constant 1.280000e+02 : f32
    %260 = vector.broadcast %cst_87 : f32 to vector<24x1xf32>
    %261 = arith.divf %259, %260 : vector<24x1xf32>
    %262 = vector.broadcast %254 : vector<24x1xf32> to vector<24x128xf32>
    %263 = arith.subf %248, %262 : vector<24x128xf32>
    %cst_88 = arith.constant 9.99999996E-13 : f32
    %264 = vector.broadcast %cst_88 : f32 to vector<24x1xf32>
    %265 = arith.addf %261, %264 : vector<24x1xf32>
    %266 = math.rsqrt %265 : vector<24x1xf32>
    %267 = vector.broadcast %266 : vector<24x1xf32> to vector<24x128xf32>
    %268 = arith.mulf %263, %267 : vector<24x128xf32>
    %269 = vector.broadcast %249 : vector<1x128xf32> to vector<24x128xf32>
    %270 = arith.mulf %268, %269 : vector<24x128xf32>
    %271 = vector.broadcast %250 : vector<1x128xf32> to vector<24x128xf32>
    %272 = arith.addf %270, %271 : vector<24x128xf32>
    %273 = arith.truncf %272 : vector<24x128xf32> to vector<24x128xbf16>
    %c1_89 = arith.constant 1 : index
    %c0_90 = arith.constant 0 : index
    %c0_91 = arith.constant 0 : index
    %274 = vector.load %arg12[%c1_89, %c0_90, %c0_91] : memref<2x128x256xbf16, #tpu.memory_space<vmem>>, vector<1x128x256xbf16>
    %275 = vector.shape_cast %274 : vector<1x128x256xbf16> to vector<128x256xbf16>
    %cst_92 = arith.constant dense<0.000000e+00> : vector<24x256xf32>
    %276 = tpu.matmul %273, %275, %cst_92 {dimension_numbers = #tpu.dot_dimension_numbers<[1], [0], [0], [1], [0, 0, 1, 1], [], []>} : vector<24x128xbf16>, vector<128x256xbf16>, vector<24x256xf32> -> vector<24x256xf32>
    %c1_93 = arith.constant 1 : index
    %c0_94 = arith.constant 0 : index
    %277 = vector.load %arg8[%c1_93, %c0_94] : memref<2x256xf32, #tpu.memory_space<vmem>>, vector<1x256xf32>
    %278 = vector.shape_cast %277 : vector<1x256xf32> to vector<256xf32>
    %279 = vector.shape_cast %278 : vector<256xf32> to vector<1x256xf32>
    %280 = vector.broadcast %279 : vector<1x256xf32> to vector<24x256xf32>
    %281 = arith.addf %276, %280 : vector<24x256xf32>
    %cst_95 = arith.constant 5.000000e-01 : f32
    %282 = vector.broadcast %cst_95 : f32 to vector<24x256xf32>
    %283 = arith.mulf %282, %281 : vector<24x256xf32>
    %cst_96 = arith.constant 4.471500e-02 : f32
    %284 = vector.broadcast %cst_96 : f32 to vector<24x256xf32>
    %285 = arith.mulf %284, %281 : vector<24x256xf32>
    %286 = arith.mulf %285, %281 : vector<24x256xf32>
    %287 = arith.mulf %286, %281 : vector<24x256xf32>
    %288 = arith.addf %281, %287 : vector<24x256xf32>
    %cst_97 = arith.constant 0.797884583 : f32
    %289 = vector.broadcast %cst_97 : f32 to vector<24x256xf32>
    %290 = arith.mulf %289, %288 : vector<24x256xf32>
    %291 = math.tanh %290 : vector<24x256xf32>
    %cst_98 = arith.constant 1.000000e+00 : f32
    %292 = vector.broadcast %cst_98 : f32 to vector<24x256xf32>
    %293 = arith.addf %292, %291 : vector<24x256xf32>
    %294 = arith.mulf %283, %293 : vector<24x256xf32>
    %295 = arith.truncf %294 : vector<24x256xf32> to vector<24x256xbf16>
    %c1_99 = arith.constant 1 : index
    %c0_100 = arith.constant 0 : index
    %c0_101 = arith.constant 0 : index
    %296 = vector.load %arg13[%c1_99, %c0_100, %c0_101] : memref<2x256x128xbf16, #tpu.memory_space<vmem>>, vector<1x256x128xbf16>
    %297 = vector.shape_cast %296 : vector<1x256x128xbf16> to vector<256x128xbf16>
    %cst_102 = arith.constant dense<0.000000e+00> : vector<24x128xf32>
    %298 = tpu.matmul %295, %297, %cst_102 {dimension_numbers = #tpu.dot_dimension_numbers<[1], [0], [0], [1], [0, 0, 1, 1], [], []>} : vector<24x256xbf16>, vector<256x128xbf16>, vector<24x128xf32> -> vector<24x128xf32>
    %299 = vector.extract_strided_slice %0 {offsets = [14, 0], sizes = [1, 128], strides = [1, 1]} : vector<17x128xf32> to vector<1x128xf32>
    %300 = vector.broadcast %299 : vector<1x128xf32> to vector<24x128xf32>
    %301 = arith.addf %298, %300 : vector<24x128xf32>
    %302 = arith.addf %301, %272 : vector<24x128xf32>
    %303 = vector.extract_strided_slice %0 {offsets = [15, 0], sizes = [1, 128], strides = [1, 1]} : vector<17x128xf32> to vector<1x128xf32>
    %304 = vector.extract_strided_slice %0 {offsets = [16, 0], sizes = [1, 128], strides = [1, 1]} : vector<17x128xf32> to vector<1x128xf32>
    %cst_103 = arith.constant dense<0.000000e+00> : vector<24xf32>
    %305 = vector.multi_reduction <add>, %302, %cst_103 [1] : vector<24x128xf32> to vector<24xf32>
    %306 = vector.shape_cast %305 : vector<24xf32> to vector<24x1xf32>
    %cst_104 = arith.constant 1.280000e+02 : f32
    %307 = vector.broadcast %cst_104 : f32 to vector<24x1xf32>
    %308 = arith.divf %306, %307 : vector<24x1xf32>
    %309 = vector.broadcast %308 : vector<24x1xf32> to vector<24x128xf32>
    %310 = arith.subf %302, %309 : vector<24x128xf32>
    %311 = arith.mulf %310, %310 : vector<24x128xf32>
    %cst_105 = arith.constant dense<0.000000e+00> : vector<24xf32>
    %312 = vector.multi_reduction <add>, %311, %cst_105 [1] : vector<24x128xf32> to vector<24xf32>
    %313 = vector.shape_cast %312 : vector<24xf32> to vector<24x1xf32>
    %cst_106 = arith.constant 1.280000e+02 : f32
    %314 = vector.broadcast %cst_106 : f32 to vector<24x1xf32>
    %315 = arith.divf %313, %314 : vector<24x1xf32>
    %316 = vector.broadcast %308 : vector<24x1xf32> to vector<24x128xf32>
    %317 = arith.subf %302, %316 : vector<24x128xf32>
    %cst_107 = arith.constant 9.99999996E-13 : f32
    %318 = vector.broadcast %cst_107 : f32 to vector<24x1xf32>
    %319 = arith.addf %315, %318 : vector<24x1xf32>
    %320 = math.rsqrt %319 : vector<24x1xf32>
    %321 = vector.broadcast %320 : vector<24x1xf32> to vector<24x128xf32>
    %322 = arith.mulf %317, %321 : vector<24x128xf32>
    %323 = vector.broadcast %303 : vector<1x128xf32> to vector<24x128xf32>
    %324 = arith.mulf %322, %323 : vector<24x128xf32>
    %325 = vector.broadcast %304 : vector<1x128xf32> to vector<24x128xf32>
    %326 = arith.addf %324, %325 : vector<24x128xf32>
    %c0_108 = arith.constant 0 : index
    %c0_109 = arith.constant 0 : index
    %327 = vector.load %arg5[%c0_108, %c0_109] : memref<2x24xf32, #tpu.memory_space<vmem>>, vector<2x24xf32>
    %cst_110 = arith.constant dense<0.000000e+00> : vector<2x128xf32>
    %328 = tpu.matmul %327, %326, %cst_110 {dimension_numbers = #tpu.dot_dimension_numbers<[1], [0], [0], [1], [0, 0, 1, 1], [], []>} : vector<2x24xf32>, vector<24x128xf32>, vector<2x128xf32> -> vector<2x128xf32>
    %cst_111 = arith.constant dense<0.000000e+00> : vector<2xf32>
    %329 = vector.multi_reduction <add>, %327, %cst_111 [1] : vector<2x24xf32> to vector<2xf32>
    %330 = vector.shape_cast %329 : vector<2xf32> to vector<2x1xf32>
    %cst_112 = arith.constant 9.99999971E-10 : f32
    %331 = vector.broadcast %cst_112 : f32 to vector<2x1xf32>
    %332 = arith.maximumf %330, %331 : vector<2x1xf32>
    %333 = vector.broadcast %332 : vector<2x1xf32> to vector<2x128xf32>
    %334 = arith.divf %328, %333 : vector<2x128xf32>
    %c0_113 = arith.constant 0 : index
    %c0_114 = arith.constant 0 : index
    %335 = vector.load %arg14[%c0_113, %c0_114] : memref<128x128xf32, #tpu.memory_space<vmem>>, vector<128x128xf32>
    %cst_115 = arith.constant dense<0.000000e+00> : vector<2x128xf32>
    %336 = tpu.matmul %334, %335, %cst_115 {dimension_numbers = #tpu.dot_dimension_numbers<[1], [0], [0], [1], [0, 0, 1, 1], [], []>} : vector<2x128xf32>, vector<128x128xf32>, vector<2x128xf32> -> vector<2x128xf32>
    %337 = vector.extract_strided_slice %0 {offsets = [4, 0], sizes = [1, 128], strides = [1, 1]} : vector<17x128xf32> to vector<1x128xf32>
    %338 = vector.broadcast %337 : vector<1x128xf32> to vector<2x128xf32>
    %339 = arith.addf %336, %338 : vector<2x128xf32>
    %c0_116 = arith.constant 0 : index
    %c0_117 = arith.constant 0 : index
    %340 = vector.load %arg15[%c0_116, %c0_117] : memref<2x128xf32, #tpu.memory_space<vmem>>, vector<2x128xf32>
    tpu.vector_store %arg15[%c0_116, %c0_117], %339 {strides = array<i32>} : memref<2x128xf32, #tpu.memory_space<vmem>>, vector<2x128xf32>,
    return
  }
  func.func @transform_0(%arg0: i32) -> (i32, i32) {
    %c0_i32 = arith.constant 0 : i32
    %c0_i32_0 = arith.constant 0 : i32
    %c0_i32_1 = arith.constant 0 : i32
    return %c0_i32, %c0_i32_0 : i32, i32
  }
  func.func @transform_1(%arg0: i32) -> (i32, i32) {
    %c0_i32 = arith.constant 0 : i32
    %c0_i32_0 = arith.constant 0 : i32
    %c0_i32_1 = arith.constant 0 : i32
    return %c0_i32, %c0_i32_0 : i32, i32
  }
  func.func @transform_2(%arg0: i32) -> (i32, i32) {
    %c0_i32 = arith.constant 0 : i32
    %c0_i32_0 = arith.constant 0 : i32
    %c0_i32_1 = arith.constant 0 : i32
    return %c0_i32, %c0_i32_0 : i32, i32
  }
  func.func @transform_3(%arg0: i32) -> (i32, i32) {
    %c0_i32 = arith.constant 0 : i32
    %c0_i32_0 = arith.constant 0 : i32
    %c0_i32_1 = arith.constant 0 : i32
    return %c0_i32, %c0_i32_0 : i32, i32
  }
  func.func @transform_4(%arg0: i32) -> (i32, i32) {
    %c0_i32 = arith.constant 0 : i32
    %c0_i32_0 = arith.constant 0 : i32
    %c0_i32_1 = arith.constant 0 : i32
    return %c0_i32, %c0_i32_0 : i32, i32
  }
  func.func @transform_5(%arg0: i32) -> (i32, i32) {
    %c0_i32 = arith.constant 0 : i32
    %c0_i32_0 = arith.constant 0 : i32
    %c0_i32_1 = arith.constant 0 : i32
    return %c0_i32, %c0_i32_0 : i32, i32
  }
  func.func @transform_6(%arg0: i32) -> (i32, i32) {
    %c0_i32 = arith.constant 0 : i32
    %c0_i32_0 = arith.constant 0 : i32
    %c0_i32_1 = arith.constant 0 : i32
    return %c0_i32, %c0_i32_0 : i32, i32
  }
  func.func @transform_7(%arg0: i32) -> (i32, i32) {
    %c0_i32 = arith.constant 0 : i32
    %c0_i32_0 = arith.constant 0 : i32
    %c0_i32_1 = arith.constant 0 : i32
    return %c0_i32, %c0_i32_0 : i32, i32
  }
  func.func @transform_8(%arg0: i32) -> (i32, i32) {
    %c0_i32 = arith.constant 0 : i32
    %c0_i32_0 = arith.constant 0 : i32
    %c0_i32_1 = arith.constant 0 : i32
    return %c0_i32, %c0_i32_0 : i32, i32
  }
  func.func @transform_9(%arg0: i32) -> (i32, i32, i32) {
    %c0_i32 = arith.constant 0 : i32
    %c0_i32_0 = arith.constant 0 : i32
    %c0_i32_1 = arith.constant 0 : i32
    %c0_i32_2 = arith.constant 0 : i32
    return %c0_i32, %c0_i32_0, %c0_i32_1 : i32, i32, i32
  }
  func.func @transform_10(%arg0: i32) -> (i32, i32, i32) {
    %c0_i32 = arith.constant 0 : i32
    %c0_i32_0 = arith.constant 0 : i32
    %c0_i32_1 = arith.constant 0 : i32
    %c0_i32_2 = arith.constant 0 : i32
    return %c0_i32, %c0_i32_0, %c0_i32_1 : i32, i32, i32
  }
  func.func @transform_11(%arg0: i32) -> (i32, i32, i32) {
    %c0_i32 = arith.constant 0 : i32
    %c0_i32_0 = arith.constant 0 : i32
    %c0_i32_1 = arith.constant 0 : i32
    %c0_i32_2 = arith.constant 0 : i32
    return %c0_i32, %c0_i32_0, %c0_i32_1 : i32, i32, i32
  }
  func.func @transform_12(%arg0: i32) -> (i32, i32, i32) {
    %c0_i32 = arith.constant 0 : i32
    %c0_i32_0 = arith.constant 0 : i32
    %c0_i32_1 = arith.constant 0 : i32
    %c0_i32_2 = arith.constant 0 : i32
    return %c0_i32, %c0_i32_0, %c0_i32_1 : i32, i32, i32
  }
  func.func @transform_13(%arg0: i32) -> (i32, i32) {
    %c0_i32 = arith.constant 0 : i32
    %c0_i32_0 = arith.constant 0 : i32
    %c0_i32_1 = arith.constant 0 : i32
    return %c0_i32, %c0_i32_0 : i32, i32
  }
  func.func @transform_14(%arg0: i32) -> (i32, i32) {
    %c0_i32 = arith.constant 0 : i32
    %c0_i32_0 = arith.constant 0 : i32
    %c0_i32_1 = arith.constant 0 : i32
    return %c0_i32, %c0_i32_0 : i32, i32
  }
}

</mosaic_0001>

<bundles_post_ra>
// kernel: multimodal_forward.1
= control target key start
LH: loop header
LB: loop body
LE: loop exit
PB: predicated region body
PF: predicated region fallthrough
CT: control target
= control target key end

     0   :  { %19 = vsyncpa [#allocation3], 0  ;;  %s4691_s0 = inlined_call_operand.vmem [shape: f32[16,128], index: 0, kind: input, shape index: {}]   ;;  %s4692_s1 = inlined_call_operand.vmem [shape: bf16[8,64], index: 1, kind: input, shape index: {}]   ;;  %s4693_s2 = inlined_call_operand.vmem [shape: f32[8,128], index: 2, kind: input, shape index: {}]   ;;  %s4694_s3 = inlined_call_operand.vmem [shape: f32[24,24], index: 3, kind: input, shape index: {}]   ;;  %s4695_s4 = inlined_call_operand.vmem [shape: f32[2,24], index: 4, kind: input, shape index: {}]   ;;  %s4696_s5 = inlined_call_operand.vmem [shape: f32[17,128], index: 5, kind: input, shape index: {}]   ;;  %s4697_s6 = inlined_call_operand.vmem [shape: f32[2,768], index: 6, kind: input, shape index: {}]   ;;  %s4698_s7 = inlined_call_operand.vmem [shape: f32[2,256], index: 7, kind: input, shape index: {}]   ;;  %s4699_s8 = inlined_call_operand.vmem [shape: bf16[64,128], index: 8, kind: input, shape index: {}]   ;;  %s4700_s9 = inlined_call_operand.hbm [shape: bf16[2,128,768], index: 9, kind: input, shape index: {}]   ;;  %s4701_s10 = inlined_call_operand.hbm [shape: bf16[2,256,128], index: 10, kind: input, shape index: {}]   ;;  %s4702_s11 = inlined_call_operand.hbm [shape: bf16[2,128,256], index: 11, kind: input, shape index: {}]   ;;  %s4703_s12 = inlined_call_operand.hbm [shape: bf16[2,256,128], index: 12, kind: input, shape index: {}]   ;;  %s4704_s13 = inlined_call_operand.vmem [shape: f32[128,128], index: 13, kind: input, shape index: {}]   ;;  %s4705_s14 = inlined_call_operand.vmem [shape: f32[2,128], index: 14, kind: output, shape index: {}]  }
   0x1   :  { %20 = vsyncpa [#allocation5], 0  ;;  %s57_s15 = sshll.u32 %s4701_s10, 4  ;;  %s58_s15 = int_to_ptr.hbm [resolvable:$true] %s57_s15 }
   0x2   :  { %21 = vsyncpa [#allocation8], 0  ;;  %s4194_s16 = smov [#allocation4]   ;;  %s44_s20 = sshll.u32 %s4700_s9, 4  ;;  %s45_s20 = int_to_ptr.hbm [resolvable:$true] %s44_s20 }
   0x3   :  { %s59_s17 = sshll.u32 %s4194_s16, 4  ;;  %s4195_s21 = smov 64   ;;  %s60_s17 = int_to_ptr.vmem [resolvable:$true] %s59_s17 }
   0x4   :  { %s4196_s22 = smov 4   ;;  %s4197_s23 = smov [#allocation2]  }
   0x5   :  { %65 = dma.hbm_to_vmem [thread:$0]  %s58_s15, 4096, %s60_s17, [#allocation5], %s4195_s21, %s4195_s21, %s4196_s22  }
   0x6   :  { %s46_s24 = sshll.u32 %s4197_s23, 4  ;;  %s4198_s25 = smov 384   ;;  %s47_s24 = int_to_ptr.vmem [resolvable:$true] %s46_s24 }
   0x7   :  { %s4199_s26 = smov 24   ;;  %s70_s28 = sshll.u32 %s4702_s11, 4  ;;  %s71_s28 = int_to_ptr.hbm [resolvable:$true] %s70_s28 }
   0x8   :  { %52 = dma.hbm_to_vmem [thread:$0]  %s45_s20, 12288, %s47_s24, [#allocation3], %s4198_s25, %s4198_s25, %s4199_s26  }
   0x9   :  { %s4200_s29 = smov [#allocation6]   ;;  %s83_s18 = sshll.u32 %s4703_s12, 4  ;;  %s84_s18 = int_to_ptr.hbm [resolvable:$true] %s83_s18 }
   0xa   :  { %s72_s30 = sshll.u32 %s4200_s29, 4  ;;  %s4201_s15 = smov 128   ;;  %s73_s30 = int_to_ptr.vmem [resolvable:$true] %s72_s30 }
   0xb   :  { %s4202_s17 = smov 8   ;;  %s4203_s19 = smov [#allocation7]  }
   0xc   :  { %78 = dma.hbm_to_vmem [thread:$0]  %s71_s28, 4096, %s73_s30, [#allocation5], %s4201_s15, %s4201_s15, %s4202_s17  }
   0xd   :  { %s85_s23 = sshll.u32 %s4203_s19, 4  ;;  %s86_s23 = int_to_ptr.vmem [resolvable:$true] %s85_s23 }
   0xe   :  { %91 = dma.hbm_to_vmem [thread:$0]  %s84_s18, 4096, %s86_s23, [#allocation8], %s4195_s21, %s4195_s21, %s4196_s22  }
   0xf   :  { %4188 = dma.done.wait [#allocation3], 12288  }
  0x10   :  { %4189 = vsyncadd [#allocation3], 4294955008 }
  0x11   :  { %4190 = dma.done.wait [#allocation5], 8192  }
  0x12   :  { %4191 = vsyncadd [#allocation5], 4294959104 }
  0x13   :  { %4192 = dma.done.wait [#allocation8], 4096  }
  0x14   :  { %4193 = vsyncadd [#allocation8], 4294963200  ;;  %v114_v0 = vld [vmem:[%s4691_s0] sm:$0xff]  ;;  %v3775_v1 = vld [vmem:[%s4699_s8 + $0x18] sm:$0xff]  ;;  %vm203_vm0 = vcmask 523264   ;;  %v4204_v7 = vmov 128.0  }
  0x15   :  { %116 = vadd.xlane.f32.xlu0 %v114_v0  ;;  %211 = vmatpush.bf16.msra.mxu0 %v3775_v1  ;;  %v3774_v2 = vld [vmem:[%s4699_s8 + $0x10] sm:$0xff]  ;;  %v115_v3 = vld [vmem:[%s4691_s0 + $0x8] sm:$0xff]  ;;  %v3772_v5 = vld [vmem:[%s4699_s8] sm:$0xff]  ;;  %3980 = vrcp.f32 %v4204_v7  ;;  %vm760_vm11 = vcmask 1043456   ;;  %vm709_vm12 = vcmask 195584  }
  0x16   :  { %v3773_v4 = vld [vmem:[%s4699_s8 + $0x8] sm:$0xff]  ;;  %v169_v6 = vld [vmem:[%s4692_s1] sm:$0xf]  ;;  %v3163_v26 = vld [vmem:[#allocation2 + $0x150] sm:$0xf] }
  0x17   :  { %v178_v19 = vld [vmem:[%s4693_s2] sm:$0xff]  ;;  %v3821_v27 = vld [vmem:[#allocation2 + $0x164] sm:$0xf0]  ;;  %v3818_v28 = vld [vmem:[#allocation2 + $0x154] sm:$0xf] }
  0x18   :  { %v3164_v29 = vor.u32 %v3821_v27, %v3163_v26  ;;  %v3165_v30 = vld [vmem:[#allocation2 + $0x168] sm:$0xf0]  ;;  %v3171_v31 = vld [vmem:[#allocation2 + $0x158] sm:$0xf]  ;;  %v3822_v32 = vld [vmem:[#allocation2 + $0x16c] sm:$0xf0] }
  0x19   :  { %212 = vmatpush.bf16.msra.mxu0 %v3774_v2  ;;  %v3168_v33 = vor.u32 %v3818_v28, %v3165_v30  ;;  %v3172_v34 = vor.u32 %v3822_v32, %v3171_v31  ;;  %v3819_v35 = vld [vmem:[#allocation2 + $0x15c] sm:$0xf]  ;;  %v3173_v36 = vld [vmem:[#allocation2 + $0x170] sm:$0xf0]  ;;  %v3139_v38 = vld [vmem:[#allocation2 + $0x120] sm:$0xf] }
  0x1a   :  { %551 = vmatpush.bf16.msra.mxu1 %v3164_v29  ;;  %v3176_v37 = vor.u32 %v3819_v35, %v3173_v36  ;;  %v3815_v39 = vld [vmem:[#allocation2 + $0x134] sm:$0xf0]  ;;  %v3812_v41 = vld [vmem:[#allocation2 + $0x124] sm:$0xf]  ;;  %v3141_v42 = vld [vmem:[#allocation2 + $0x138] sm:$0xf0] }
  0x1b   :  { %v3981_v8 = vpop.eup %3980  ;;  %569 = vmatpush.bf16.msra.mxu2 %v3168_v33  ;;  %587 = vmatpush.bf16.msra.mxu3 %v3172_v34  ;;  %v3140_v40 = vor.u32 %v3815_v39, %v3139_v38  ;;  %v3147_v43 = vld [vmem:[#allocation2 + $0x128] sm:$0xf]  ;;  %v3144_v44 = vor.u32 %v3812_v41, %v3141_v42  ;;  %v3816_v45 = vld [vmem:[#allocation2 + $0x13c] sm:$0xf0]  ;;  %v3813_v46 = vld [vmem:[#allocation2 + $0x12c] sm:$0xf] }
  0x1c   :  { %v121_v9 = vmul.f32 128.0, %v3981_v8  ;;  %vm125_vm1 = vweird.f32 %v3981_v8  ;;  %v3148_v47 = vor.u32 %v3816_v45, %v3147_v43  ;;  %v3149_v48 = vld [vmem:[#allocation2 + $0x140] sm:$0xf0]  ;;  %v3115_v50 = vld [vmem:[#allocation2 + $0xf0] sm:$0xf] }
  0x1d   :  { %118 = vadd.xlane.f32.xlu0 %v115_v3  ;;  %213 = vmatpush.bf16.msra.mxu0 %v3773_v4  ;;  %v3152_v49 = vor.u32 %v3813_v46, %v3149_v48  ;;  %v3809_v51 = vld [vmem:[#allocation2 + $0x104] sm:$0xf0]  ;;  %v3806_v52 = vld [vmem:[#allocation2 + $0xf4] sm:$0xf]  ;;  %v3117_v54 = vld [vmem:[#allocation2 + $0x108] sm:$0xf0] }
  0x1e   :  { %v122_v10 = vsub.f32 1.0, %v121_v9  ;;  %552 = vmatpush.bf16.msra.mxu1 %v3140_v40  ;;  %v3116_v53 = vor.u32 %v3809_v51, %v3115_v50  ;;  %v3123_v55 = vld [vmem:[#allocation2 + $0xf8] sm:$0xf]  ;;  %v3810_v56 = vld [vmem:[#allocation2 + $0x10c] sm:$0xf0]  ;;  %v3120_v57 = vor.u32 %v3806_v52, %v3117_v54 }
  0x1f   :  { %570 = vmatpush.bf16.msra.mxu2 %v3144_v44  ;;  %588 = vmatpush.bf16.msra.mxu3 %v3148_v47  ;;  %v3124_v58 = vor.u32 %v3810_v56, %v3123_v55  ;;  %v3807_v59 = vld [vmem:[#allocation2 + $0xfc] sm:$0xf]  ;;  %v3125_v60 = vld [vmem:[#allocation2 + $0x110] sm:$0xf0]  ;;  %v3091_v62 = vld [vmem:[#allocation2 + $0xc0] sm:$0xf] }
  0x20   :  { %v123_v11 = vmul.f32 %v3981_v8, %v122_v10  ;;  %v3128_v61 = vor.u32 %v3807_v59, %v3125_v60  ;;  %v3803_v63 = vld [vmem:[#allocation2 + $0xd4] sm:$0xf0]  ;;  %v3099_v4 = vld [vmem:[#allocation2 + $0xc8] sm:$0xf]  ;;  %v3801_v9 = vld [vmem:[#allocation2 + $0xcc] sm:$0xf] }
  0x21   :  { %214 = vmatpush.bf16.msra.mxu0 %v3772_v5  ;;  %v3092_v2 = vor.u32 %v3803_v63, %v3091_v62  ;;  %v3804_v5 = vld [vmem:[#allocation2 + $0xdc] sm:$0xf0]  ;;  %v3101_v10 = vld [vmem:[#allocation2 + $0xe0] sm:$0xf0]  ;;  %v3077_v26 = vld [vmem:[#allocation2 + $0xb0] sm:$0xf0] }
  0x22   :  { %v124_v13 = vadd.f32 %v3981_v8, %v123_v11  ;;  %553 = vmatpush.bf16.msra.mxu1 %v3116_v53  ;;  %v3104_v11 = vor.u32 %v3801_v9, %v3101_v10  ;;  %v3043_v29 = vld [vmem:[#allocation2 + $0x60] sm:$0xf]  ;;  %v3791_v30 = vld [vmem:[#allocation2 + $0x74] sm:$0xf0]  ;;  %v3788_v31 = vld [vmem:[#allocation2 + $0x64] sm:$0xf] }
  0x23   :  { %571 = vmatpush.bf16.msra.mxu2 %v3120_v57  ;;  %589 = vmatpush.bf16.msra.mxu3 %v3124_v58  ;;  %v3044_v32 = vor.u32 %v3791_v30, %v3043_v29  ;;  %v3045_v33 = vld [vmem:[#allocation2 + $0x78] sm:$0xf0]  ;;  %v3051_v34 = vld [vmem:[#allocation2 + $0x68] sm:$0xf]  ;;  %v3792_v35 = vld [vmem:[#allocation2 + $0x7c] sm:$0xf0] }
  0x24   :  { %2992 = vmatmul.msk.bf16.vlgmr.msra.gmra.mxu0 %vm203_vm0, %v169_v6  ;;  %v4313_v14 = vsel %vm125_vm1, %v3981_v8, %v124_v13  ;;  %v3100_v8 = vor.u32 %v3804_v5, %v3099_v4  ;;  %v3067_v13 = vld [vmem:[#allocation2 + $0x90] sm:$0xf]  ;;  %v3048_v36 = vor.u32 %v3788_v31, %v3045_v33  ;;  %v3789_v38 = vld [vmem:[#allocation2 + $0x6c] sm:$0xf]  ;;  %v3053_v39 = vld [vmem:[#allocation2 + $0x80] sm:$0xf0] }
  0x25   :  { %605 = vmatpush.bf16.msrb.mxu0 %v3176_v37  ;;  %v3052_v37 = vor.u32 %v3792_v35, %v3051_v34  ;;  %v3056_v40 = vor.u32 %v3789_v38, %v3053_v39  ;;  %v3019_v41 = vld [vmem:[#allocation2 + $0x30] sm:$0xf]  ;;  %v3785_v42 = vld [vmem:[#allocation2 + $0x44] sm:$0xf0]  ;;  %v3782_v43 = vld [vmem:[#allocation2 + $0x34] sm:$0xf] }
  0x26   :  { %554 = vmatpush.bf16.msra.mxu1 %v3092_v2  ;;  %v3020_v44 = vor.u32 %v3785_v42, %v3019_v41  ;;  %v3021_v45 = vld [vmem:[#allocation2 + $0x48] sm:$0xf0]  ;;  %v3027_v46 = vld [vmem:[#allocation2 + $0x38] sm:$0xf]  ;;  %v3786_v47 = vld [vmem:[#allocation2 + $0x4c] sm:$0xf0] }
  0x27   :  { %590 = vmatpush.bf16.msra.mxu3 %v3100_v8  ;;  %v3024_v48 = vor.u32 %v3782_v43, %v3021_v45  ;;  %v3783_v50 = vld [vmem:[#allocation2 + $0x3c] sm:$0xf]  ;;  %v3029_v51 = vld [vmem:[#allocation2 + $0x50] sm:$0xf0]  ;;  %v2995_v56 = vld [vmem:[#allocation2] sm:$0xf] }
  0x28   :  { %v3032_v53 = vor.u32 %v3783_v50, %v3029_v51  ;;  %v3779_v57 = vld [vmem:[#allocation2 + $0x14] sm:$0xf0]  ;;  %v3776_v58 = vld [vmem:[#allocation2 + $0x4] sm:$0xf]  ;;  %v2997_v60 = vld [vmem:[#allocation2 + $0x18] sm:$0xf0] }
  0x29   :  { %606 = vmatpush.bf16.msrb.mxu0 %v3152_v49  ;;  %v3028_v49 = vor.u32 %v3786_v47, %v3027_v46  ;;  %v2996_v59 = vor.u32 %v3779_v57, %v2995_v56  ;;  %v3000_v63 = vor.u32 %v3776_v58, %v2997_v60  ;;  %v3005_v2 = vld [vmem:[#allocation2 + $0x20] sm:$0xf0]  ;;  %v3823_v35 = vld [vmem:[#allocation2 + $0x174] sm:$0xf0]  ;;  %v3155_v39 = vld [vmem:[#allocation2 + $0x130] sm:$0xf] }
  0x2a   :  { %v3814_v41 = vld [vmem:[#allocation2 + $0x134] sm:$0xf]  ;;  %v3157_v43 = vld [vmem:[#allocation2 + $0x148] sm:$0xf0]  ;;  %v3131_v45 = vld [vmem:[#allocation2 + $0x100] sm:$0xf] }
  0x2b   :  { %v3811_v46 = vld [vmem:[#allocation2 + $0x114] sm:$0xf0]  ;;  %v3808_v47 = vld [vmem:[#allocation2 + $0x104] sm:$0xf]  ;;  %v3107_v51 = vld [vmem:[#allocation2 + $0xd0] sm:$0xf] }
  0x2c   :  { %v3083_v57 = vld [vmem:[#allocation2 + $0xa0] sm:$0xf]  ;;  %v3799_v58 = vld [vmem:[#allocation2 + $0xb4] sm:$0xf0] }
  0x2d   :  { %607 = vmatpush.bf16.msrb.mxu0 %v3128_v61  ;;  %v3003_v61 = vld [vmem:[#allocation2 + $0x8] sm:$0xf]  ;;  %v3084_v60 = vor.u32 %v3799_v58, %v3083_v57 }
  0x31   :  { %608 = vmatpush.bf16.msrb.mxu0 %v3104_v11 }
  0x88   :  { %v117_v12 = vpop.xlane.xlu0 %116 }
  0x89   :  { %v127_v20 = vmul.f32 %v4313_v14, %v117_v12 }
  0x8b   :  { %v4326_v23 = vsub.f32 %v114_v0, %v127_v20  ;;  %v3800_v0 = vld [vmem:[#allocation2 + $0xc4] sm:$0xf]  ;;  %v3075_v20 = vld [vmem:[#allocation2 + $0x98] sm:$0xf] }
  0x8d   :  { %v131_v24 = vmul.f32 %v4326_v23, %v4326_v23 }
  0x90   :  { %v119_v15 = vpop.xlane.xlu0 %118 }
  0x91   :  { %v128_v16 = vmul.f32 %v4313_v14, %v119_v15  ;;  %v3797_v15 = vld [vmem:[#allocation2 + $0xa4] sm:$0xf0] }
  0x93   :  { %v4316_v17 = vsub.f32 %v115_v3, %v128_v16  ;;  %v3093_v3 = vld [vmem:[#allocation2 + $0xd8] sm:$0xf0]  ;;  %v3068_v16 = vor.u32 %v3797_v15, %v3067_v13 }
  0x94   :  { %v3096_v7 = vor.u32 %v3800_v0, %v3093_v3  ;;  %v3780_v0 = vld [vmem:[#allocation2 + $0x1c] sm:$0xf0] }
  0x95   :  { %v132_v18 = vmul.f32 %v4316_v17, %v4316_v17  ;;  %555 = vmatpush.bf16.msra.mxu1 %v3068_v16  ;;  %v3004_v4 = vor.u32 %v3780_v0, %v3003_v61  ;;  %v3085_v61 = vld [vmem:[#allocation2 + $0xb8] sm:$0xf0] }
  0x96   :  { %572 = vmatpush.bf16.msra.mxu2 %v3096_v7 }
  0x97   :  { %135 = vadd.xlane.f32.xlu2 %v132_v18  ;;  %v3794_v18 = vld [vmem:[#allocation2 + $0x94] sm:$0xf] }
  0x99   :  { %556 = vmatpush.bf16.msra.mxu1 %v3044_v32 }
  0x9d   :  { %557 = vmatpush.bf16.msra.mxu1 %v3020_v44  ;;  %v3160_v44 = vor.u32 %v3814_v41, %v3157_v43 }
  0xa1   :  { %v216_v21 = vpop.f32.mrf.mxu0  ;;  %558 = vmatpush.bf16.msra.mxu1 %v2996_v59  ;;  %v3796_v59 = vld [vmem:[#allocation2 + $0xa4] sm:$0xf] }
  0xa2   :  { %v4324_v22 = vadd.f32 %v216_v21, %v178_v19  ;;  %v3069_v19 = vld [vmem:[#allocation2 + $0xa8] sm:$0xf0]  ;;  %v3088_v0 = vor.u32 %v3796_v59, %v3085_v61 }
  0xa3   :  { %v3072_v21 = vor.u32 %v3794_v18, %v3069_v19  ;;  %v4347_v19 = vld [vmem:[%s4696_s5] sm:$0xff] }
  0xa4   :  { %220 = vadd.xlane.f32.xlu1 %v4324_v22  ;;  %v166_v29 = vperm.slane %v4347_v19, 1 }
  0xa5   :  { %573 = vmatpush.bf16.msra.mxu2 %v3072_v21 }
  0xa9   :  { %v218_v25 = vpop.f32.mrf.mxu0  ;;  %574 = vmatpush.bf16.msra.mxu2 %v3048_v36 }
  0xaa   :  { %v3795_v25 = vld [vmem:[#allocation2 + $0x9c] sm:$0xf] }
  0xab   :  { %v3080_v28 = vor.u32 %v3795_v25, %v3077_v26 }
  0xac   :  { %133 = vadd.xlane.f32.xlu1 %v131_v24  ;;  %v3798_v24 = vld [vmem:[#allocation2 + $0xac] sm:$0xf0] }
  0xad   :  { %v3076_v27 = vor.u32 %v3798_v24, %v3075_v20  ;;  %609 = vmatpush.bf16.msrb.mxu0 %v3080_v28  ;;  %575 = vmatpush.bf16.msra.mxu2 %v3024_v48  ;;  %v3132_v48 = vor.u32 %v3811_v46, %v3131_v45 }
  0xaf   :  { %591 = vmatpush.bf16.msra.mxu3 %v3076_v27 }
  0xb1   :  { %610 = vmatpush.bf16.msrb.mxu0 %v3056_v40  ;;  %576 = vmatpush.bf16.msra.mxu2 %v3000_v63  ;;  %v3817_v40 = vld [vmem:[#allocation2 + $0x144] sm:$0xf0] }
  0xb2   :  { %v3156_v42 = vor.u32 %v3817_v40, %v3155_v39 }
  0xb3   :  { %592 = vmatpush.bf16.msra.mxu3 %v3052_v37  ;;  %v3181_v37 = vld [vmem:[#allocation2 + $0x178] sm:$0xf0] }
  0xb5   :  { %611 = vmatpush.bf16.msrb.mxu0 %v3032_v53  ;;  %v3802_v53 = vld [vmem:[#allocation2 + $0xd4] sm:$0xf] }
  0xb7   :  { %593 = vmatpush.bf16.msra.mxu3 %v3028_v49  ;;  %v3133_v49 = vld [vmem:[#allocation2 + $0x118] sm:$0xf0] }
  0xb8   :  { %v3136_v50 = vor.u32 %v3808_v47, %v3133_v49 }
  0xbb   :  { %594 = vmatpush.bf16.msra.mxu3 %v3004_v4 }
 0x10a   :  { %v136_v1 = vpop.xlane.xlu2 %135 }
 0x10b   :  { %v138_v6 = vmul.f32 %v136_v1, %v4313_v14  ;;  %v3777_v1 = vld [vmem:[#allocation2 + $0xc] sm:$0xf] }
 0x10c   :  { %v3008_v5 = vor.u32 %v3777_v1, %v3005_v2  ;;  %v3059_v1 = vld [vmem:[#allocation2 + $0x70] sm:$0xf]  ;;  %v3793_v2 = vld [vmem:[#allocation2 + $0x84] sm:$0xf0] }
 0x10d   :  { %v4332_v12 = vadd.f32 1e-12, %v138_v6 }
 0x10e   :  { %612 = vmatpush.bf16.msrb.mxu0 %v3008_v5  ;;  %v3060_v5 = vor.u32 %v3793_v2, %v3059_v1 }
 0x10f   :  { %3982 = vrsqrt.f32 %v4332_v12  ;;  %vm157_vm2 = vweird.f32 %v4332_v12 }
 0x115   :  { %v3983_v54 = vpop.eup %3982 }
 0x116   :  { %v152_v3 = vmul.f32 %v3983_v54, %v4332_v12  ;;  %vm158_vm3 = vweird.f32 %v3983_v54  ;;  %v163_v12 = vperm.slane %v4347_v19, 0 }
 0x117   :  { %v221_v52 = vpop.xlane.xlu1 %220  ;;  %vm159_vm4 = vmor %vm157_vm2, %vm158_vm3 }
 0x118   :  { %v222_v55 = vmul.f32 %v221_v52, %v4313_v14  ;;  %v153_v7 = vmul.f32 %v3983_v54, %v152_v3  ;;  %v3805_v52 = vld [vmem:[#allocation2 + $0xe4] sm:$0xf0]  ;;  %v3790_v3 = vld [vmem:[#allocation2 + $0x74] sm:$0xf] }
 0x11a   :  { %v4337_v62 = vsub.f32 %v4324_v22, %v222_v55  ;;  %v154_v10 = vmul.f32 0.5, %v153_v7  ;;  %v3109_v55 = vld [vmem:[#allocation2 + $0xe8] sm:$0xf0] }
 0x11b   :  { %v3112_v56 = vor.u32 %v3802_v53, %v3109_v55 }
 0x11c   :  { %v224_v6 = vmul.f32 %v4337_v62, %v4337_v62  ;;  %v155_v11 = vsub.f32 1.5, %v154_v10  ;;  %v3784_v10 = vld [vmem:[#allocation2 + $0x44] sm:$0xf] }
 0x11e   :  { %225 = vadd.xlane.f32.xlu2 %v224_v6  ;;  %v156_v15 = vmul.f32 %v3983_v54, %v155_v11  ;;  %v3061_v6 = vld [vmem:[#allocation2 + $0x88] sm:$0xf0]  ;;  %v3037_v11 = vld [vmem:[#allocation2 + $0x58] sm:$0xf0] }
 0x11f   :  { %v134_v22 = vpop.xlane.xlu1 %133  ;;  %v3064_v7 = vor.u32 %v3790_v3, %v3061_v6 }
 0x120   :  { %v137_v8 = vmul.f32 %v134_v22, %v4313_v14  ;;  %v160_v20 = vsel %vm159_vm4, %v3983_v54, %v156_v15  ;;  %v3108_v54 = vor.u32 %v3805_v52, %v3107_v51  ;;  %v3035_v22 = vld [vmem:[#allocation2 + $0x40] sm:$0xf]  ;;  %v3040_v15 = vor.u32 %v3784_v10, %v3037_v11 }
 0x121   :  { %v162_v25 = vmul.f32 %v160_v20, %v4316_v17  ;;  %v3179_v17 = vld [vmem:[#allocation2 + $0x160] sm:$0xf] }
 0x122   :  { %v139_v9 = vadd.f32 1e-12, %v137_v8  ;;  %v3180_v36 = vor.u32 %v3823_v35, %v3179_v17  ;;  %v3787_v8 = vld [vmem:[#allocation2 + $0x54] sm:$0xf0] }
 0x123   :  { %v165_v28 = vmul.f32 %v163_v12, %v162_v25  ;;  %v3013_v25 = vld [vmem:[#allocation2 + $0x28] sm:$0xf0] }
 0x124   :  { %3984 = vrsqrt.f32 %v139_v9  ;;  %vm147_vm5 = vweird.f32 %v139_v9  ;;  %623 = vmatpush.bf16.msrb.mxu1 %v3180_v36 }
 0x125   :  { %v4353_v32 = vadd.f32 %v166_v29, %v165_v28 }
 0x128   :  { %624 = vmatpush.bf16.msrb.mxu1 %v3156_v42 }
 0x12a   :  { %v3985_v13 = vpop.eup %3984 }
 0x12b   :  { %v142_v16 = vmul.f32 %v3985_v13, %v139_v9  ;;  %vm148_vm6 = vweird.f32 %v3985_v13 }
 0x12c   :  { %vm149_vm7 = vmor %vm147_vm5, %vm148_vm6  ;;  %625 = vmatpush.bf16.msrb.mxu1 %v3132_v48  ;;  %v297_v48 = vld [vmem:[%s4697_s6] ss:$2 sm:$0x3f] }
 0x12d   :  { %v143_v18 = vmul.f32 %v3985_v13, %v142_v16  ;;  %v3011_v16 = vld [vmem:[#allocation2 + $0x10] sm:$0xf]  ;;  %v299_v49 = vperm.slane %v297_v48, 0  ;;  %v301_v51 = vperm.slane %v297_v48, 2 }
 0x12f   :  { %v144_v21 = vmul.f32 0.5, %v143_v18  ;;  %v3781_v18 = vld [vmem:[#allocation2 + $0x24] sm:$0xf0] }
 0x130   :  { %626 = vmatpush.bf16.msrb.mxu1 %v3108_v54 }
 0x131   :  { %v145_v24 = vsub.f32 1.5, %v144_v21  ;;  %v3012_v21 = vor.u32 %v3781_v18, %v3011_v16 }
 0x133   :  { %v146_v26 = vmul.f32 %v3985_v13, %v145_v24  ;;  %v3778_v24 = vld [vmem:[#allocation2 + $0x14] sm:$0xf] }
 0x134   :  { %627 = vmatpush.bf16.msrb.mxu1 %v3084_v60 }
 0x135   :  { %v150_v27 = vsel %vm149_vm7, %v3985_v13, %v146_v26  ;;  %v3036_v13 = vor.u32 %v3787_v8, %v3035_v22  ;;  %v3016_v26 = vor.u32 %v3778_v24, %v3013_v25 }
 0x136   :  { %v161_v30 = vmul.f32 %v150_v27, %v4326_v23  ;;  %v3820_v23 = vld [vmem:[#allocation2 + $0x164] sm:$0xf] }
 0x137   :  { %v3184_v38 = vor.u32 %v3820_v23, %v3181_v37  ;;  %v242_v23 = vperm.slane %v4347_v19, 3 }
 0x138   :  { %v164_v31 = vmul.f32 %v163_v12, %v161_v30  ;;  %628 = vmatpush.bf16.msrb.mxu1 %v3060_v5 }
 0x139   :  { %641 = vmatpush.bf16.msrb.mxu2 %v3184_v38 }
 0x13a   :  { %v4355_v33 = vadd.f32 %v166_v29, %v164_v31  ;;  %v240_v31 = vperm.slane %v4347_v19, 2 }
 0x13c   :  { %v4359_v34 = vpack.c.bf16 %v4353_v32, %v4355_v33  ;;  %629 = vmatpush.bf16.msrb.mxu1 %v3036_v13 }
 0x13d   :  { %642 = vmatpush.bf16.msrb.mxu2 %v3160_v44 }
 0x13e   :  { %559 = vmatmul.bf16.vlgmr.msra.gmra.mxu1 %v4359_v34  ;;  %577 = vmatmul.bf16.vlgmr.msra.gmra.mxu2 %v4359_v34 }
 0x13f   :  { %595 = vmatmul.bf16.vlgmr.msra.gmra.mxu3 %v4359_v34  ;;  %613 = vmatmul.bf16.vlgmr.msrb.gmra.mxu0 %v4359_v34 }
 0x140   :  { %630 = vmatpush.bf16.msrb.mxu1 %v3012_v21 }
 0x141   :  { %643 = vmatpush.bf16.msrb.mxu2 %v3136_v50  ;;  %v300_v50 = vperm.slane %v297_v48, 1 }
 0x145   :  { %644 = vmatpush.bf16.msrb.mxu2 %v3112_v56 }
 0x149   :  { %645 = vmatpush.bf16.msrb.mxu2 %v3088_v0 }
 0x14d   :  { %646 = vmatpush.bf16.msrb.mxu2 %v3064_v7 }
 0x151   :  { %647 = vmatpush.bf16.msrb.mxu2 %v3040_v15 }
 0x155   :  { %648 = vmatpush.bf16.msrb.mxu2 %v3016_v26 }
 0x191   :  { %v226_v63 = vpop.xlane.xlu2 %225 }
 0x192   :  { %v227_v4 = vmul.f32 %v226_v63, %v4313_v14 }
 0x194   :  { %v228_v9 = vadd.f32 1e-12, %v227_v4 }
 0x196   :  { %3986 = vrsqrt.f32 %v228_v9  ;;  %vm235_vm9 = vweird.f32 %v228_v9 }
 0x19c   :  { %v3987_v20 = vpop.eup %3986 }
 0x19d   :  { %v230_v12 = vmul.f32 %v3987_v20, %v228_v9  ;;  %vm236_vm8 = vweird.f32 %v3987_v20 }
 0x19e   :  { %vm237_vm10 = vmor %vm235_vm9, %vm236_vm8 }
 0x19f   :  { %v231_v27 = vmul.f32 %v3987_v20, %v230_v12 }
 0x1a1   :  { %v232_v28 = vmul.f32 0.5, %v231_v27 }
 0x1a3   :  { %v233_v29 = vsub.f32 1.5, %v232_v28 }
 0x1a5   :  { %v234_v30 = vmul.f32 %v3987_v20, %v233_v29 }
 0x1a7   :  { %v238_v17 = vsel %vm237_vm10, %v3987_v20, %v234_v30 }
 0x1a8   :  { %v239_v35 = vmul.f32 %v238_v17, %v4337_v62 }
 0x1aa   :  { %v241_v36 = vmul.f32 %v240_v31, %v239_v35 }
 0x1ac   :  { %v4369_v37 = vadd.f32 %v242_v23, %v241_v36 }
 0x1ae   :  { %v248_v38 = vpack.c.bf16 %v4369_v37, %v4369_v37 }
 0x1b0   :  { %564 = vmatmul.bf16.gmra.mxu1 %v248_v38  ;;  %582 = vmatmul.bf16.gmra.mxu2 %v248_v38 }
 0x1b1   :  { %600 = vmatmul.bf16.gmra.mxu3 %v248_v38  ;;  %618 = vmatmul.bf16.gmra.mxu0 %v248_v38 }
 0x1bb   :  { %v560_v39 = vpop.f32.mrf.mxu1 }
 0x1bc   :  { %v614_v62 = vpop.f32.mrf.mxu0  ;;  %v561_v22 = vadd.f32 %v560_v39, %v299_v49  ;;  %v303_v39 = vperm.slane %v297_v48, 4 }
 0x1c0   :  { %631 = vmatmul.bf16.vlgmr.msrb.gmra.mxu1 %v4359_v34  ;;  %649 = vmatmul.bf16.vlgmr.msrb.gmra.mxu2 %v4359_v34  ;;  %v302_v34 = vperm.slane %v297_v48, 3 }
 0x1c1   :  { %v578_v40 = vpop.f32.mrf.mxu2 }
 0x1c2   :  { %v596_v41 = vpop.f32.mrf.mxu3  ;;  %v615_v2 = vadd.f32 %v614_v62, %v302_v34  ;;  %v579_v4 = vadd.f32 %v578_v40, %v300_v50 }
 0x1c3   :  { %v562_v42 = vpop.f32.mrf.mxu1  ;;  %v597_v60 = vadd.f32 %v596_v41, %v301_v51 }
 0x1c4   :  { %v616_v43 = vpop.f32.mrf.mxu0  ;;  %v563_v5 = vadd.f32 %v562_v42, %v299_v49  ;;  %v659_v16 = vpack.c.bf16 %v579_v4, %v561_v22  ;;  %v244_v22 = vld [vmem:[%s4694_s3] sm:$0xff] }
 0x1c5   :  { %v617_v61 = vadd.f32 %v616_v43, %v302_v34  ;;  %v4383_v9 = vpack.c.bf16 %v615_v2, %v597_v60 }
 0x1c6   :  { %v678_v27 = vunpack.c.h.b16 %v659_v16  ;;  %v671_v17 = vunpack.c.l.b16 %v659_v16 }
 0x1c7   :  { %v748_v25 = vunpack.c.l.b16 %v4383_v9 }
 0x1c9   :  { %v580_v44 = vpop.f32.mrf.mxu2 }
 0x1ca   :  { %v598_v45 = vpop.f32.mrf.mxu3  ;;  %v581_v63 = vadd.f32 %v580_v44, %v300_v50 }
 0x1cb   :  { %v599_v53 = vadd.f32 %v598_v45, %v301_v51 }
 0x1cc   :  { %v662_v10 = vpack.c.bf16 %v581_v63, %v563_v5 }
 0x1cd   :  { %v4380_v6 = vpack.c.bf16 %v617_v61, %v599_v53 }
 0x1ce   :  { %v679_v12 = vunpack.c.h.b16 %v662_v10  ;;  %v672_v30 = vunpack.c.l.b16 %v662_v10 }
 0x1cf   :  { %v749_v18 = vunpack.c.l.b16 %v4380_v6 }
 0x1d0   :  { %636 = vmatmul.bf16.gmra.mxu1 %v248_v38  ;;  %654 = vmatmul.bf16.gmra.mxu2 %v248_v38  ;;  %v681_v28 = vpack.c.b16 %v679_v12, %v678_v27  ;;  %v674_v35 = vpack.c.b16 %v672_v30, %v671_v17  ;;  %v304_v38 = vperm.slane %v297_v48, 5 }
 0x1d1   :  { %v751_v26 = vpack.c.b16 %v749_v18, %v748_v25  ;;  %v246_v18 = vld [vmem:[%s4694_s3 + $0x10] sm:$0xff] }
 0x22d   :  { %v565_v46 = vpop.f32.mrf.mxu1 }
 0x22e   :  { %v619_v47 = vpop.f32.mrf.mxu0  ;;  %v566_v54 = vadd.f32 %v565_v46, %v299_v49 }
 0x22f   :  { %v620_v57 = vadd.f32 %v619_v47, %v302_v34 }
 0x233   :  { %v583_v52 = vpop.f32.mrf.mxu2 }
 0x234   :  { %v584_v55 = vadd.f32 %v583_v52, %v300_v50  ;;  %v601_v56 = vpop.f32.mrf.mxu3 }
 0x235   :  { %v602_v58 = vadd.f32 %v601_v56, %v301_v51  ;;  %v567_v59 = vpop.f32.mrf.mxu1 }
 0x236   :  { %v665_v0 = vpack.c.bf16 %v584_v55, %v566_v54  ;;  %v621_v1 = vpop.f32.mrf.mxu0 }
 0x237   :  { %v4378_v3 = vpack.c.bf16 %v620_v57, %v602_v58  ;;  %v782_v1 = vunpack.c.h.b16 %v4383_v9  ;;  %v245_v9 = vld [vmem:[%s4694_s3 + $0x8] sm:$0xff] }
 0x238   :  { %v680_v7 = vunpack.c.h.b16 %v665_v0  ;;  %v673_v46 = vunpack.c.l.b16 %v665_v0  ;;  %v783_v0 = vunpack.c.h.b16 %v4380_v6 }
 0x239   :  { %v750_v8 = vunpack.c.l.b16 %v4378_v3  ;;  %v784_v4 = vunpack.c.h.b16 %v4378_v3 }
 0x23a   :  { %v682_v11 = vpack.c.b16 %v680_v7, %v680_v7  ;;  %v675_v53 = vpack.c.b16 %v673_v46, %v673_v46  ;;  %v785_v2 = vpack.c.b16 %v783_v0, %v782_v1 }
 0x23b   :  { %v752_v13 = vpack.c.b16 %v750_v8, %v750_v8  ;;  %v585_v15 = vpop.f32.mrf.mxu2  ;;  %v786_v5 = vpack.c.b16 %v784_v4, %v784_v4 }
 0x23c   :  { %v603_v20 = vpop.f32.mrf.mxu3  ;;  %691 = vmatpush.bf16.xpose.msrb.mxu3 %v682_v11 }
 0x23d   :  { %v632_v21 = vpop.f32.mrf.mxu1  ;;  %v762_v24 = vsel %vm760_vm11, %v752_v13, 0 }
 0x23e   :  { %770 = vmatpush.bf16.msra.mxu0 %v762_v24  ;;  %v633_v49 = vadd.f32 %v632_v21, %v303_v39 }
 0x242   :  { %771 = vmatpush.bf16.msra.mxu0 %v751_v26 }
 0x243   :  { %v650_v29 = vpop.f32.mrf.mxu2 }
 0x244   :  { %692 = vmatpush.bf16.xpose.msrb.mxu3 %v681_v28  ;;  %v651_v43 = vadd.f32 %v650_v29, %v304_v38 }
 0x245   :  { %v634_v31 = vpop.f32.mrf.mxu1 }
 0x246   :  { %v635_v44 = vadd.f32 %v634_v31, %v303_v39  ;;  %v661_v52 = vpack.c.bf16 %v651_v43, %v633_v49 }
 0x248   :  { %v858_v58 = vunpack.c.h.b16 %v661_v52  ;;  %v792_v61 = vunpack.c.l.b16 %v661_v52 }
 0x24b   :  { %v652_v23 = vpop.f32.mrf.mxu2  ;;  %693 = vmatmul.bf16.vlgmr.msrb.gmra.mxu3 %v674_v35 }
 0x24c   :  { %v653_v62 = vadd.f32 %v652_v23, %v304_v38 }
 0x24d   :  { %v637_v36 = vpop.f32.mrf.mxu1 }
 0x24e   :  { %v638_v41 = vadd.f32 %v637_v36, %v303_v39  ;;  %v664_v50 = vpack.c.bf16 %v653_v62, %v635_v44 }
 0x250   :  { %v859_v56 = vunpack.c.h.b16 %v664_v50  ;;  %v793_v59 = vunpack.c.l.b16 %v664_v50 }
 0x252   :  { %v861_v60 = vpack.c.b16 %v859_v56, %v858_v58  ;;  %v795_v63 = vpack.c.b16 %v793_v59, %v792_v61 }
 0x253   :  { %v655_v40 = vpop.f32.mrf.mxu2 }
 0x254   :  { %v656_v42 = vadd.f32 %v655_v40, %v304_v38 }
 0x255   :  { %v639_v45 = vpop.f32.mrf.mxu1 }
 0x256   :  { %v667_v47 = vpack.c.bf16 %v656_v42, %v638_v41 }
 0x258   :  { %v794_v51 = vunpack.c.l.b16 %v667_v47  ;;  %v860_v34 = vunpack.c.h.b16 %v667_v47 }
 0x25a   :  { %v796_v54 = vpack.c.b16 %v794_v51, %v794_v51  ;;  %v862_v55 = vpack.c.b16 %v860_v34, %v860_v34 }
 0x25b   :  { %v657_v57 = vpop.f32.mrf.mxu2  ;;  %698 = vmatmul.bf16.gmra.mxu3 %v675_v53 }
 0x25c   :  { %805 = vmatpush.bf16.xpose.msra.mxu1 %v796_v54  ;;  %v871_v48 = vsel %vm760_vm11, %v862_v55, 0 }
 0x25d   :  { %879 = vmatpush.bf16.msra.mxu2 %v871_v48 }
 0x261   :  { %880 = vmatpush.bf16.msra.mxu2 %v861_v60 }
 0x264   :  { %806 = vmatpush.bf16.xpose.msra.mxu1 %v795_v63 }
 0x26b   :  { %807 = vmatmul.bf16.vlgmr.msra.gmra.mxu1 %v785_v2 }
 0x27b   :  { %812 = vmatmul.bf16.gmra.mxu1 %v786_v5 }
 0x2ce   :  { %v694_v7 = vpop.f32.mrf.mxu3 }
 0x2cf   :  { %v703_v8 = vmul.f32 0.125, %v694_v7 }
 0x2d1   :  { %v706_v10 = vadd.f32 %v703_v8, %v244_v22 }
 0x2d3   :  { %v710_v11 = vsel %vm709_vm12, %v706_v10, -inf }
 0x2d4   :  { %711 = vmax.xlane.f32.xlu0 %v710_v11 }
 0x2d6   :  { %v696_v6 = vpop.f32.mrf.mxu3 }
 0x2d7   :  { %v704_v13 = vmul.f32 0.125, %v696_v6 }
 0x2d9   :  { %v707_v3 = vadd.f32 %v704_v13, %v245_v9 }
 0x2db   :  { %v713_v15 = vsel %vm709_vm12, %v707_v3, -inf }
 0x2dc   :  { %714 = vmax.xlane.f32.xlu1 %v713_v15 }
 0x2de   :  { %v699_v16 = vpop.f32.mrf.mxu3 }
 0x2df   :  { %v705_v20 = vmul.f32 0.125, %v699_v16 }
 0x2e1   :  { %v708_v21 = vadd.f32 %v705_v20, %v246_v18  ;;  %v3830_v20 = vld [vmem:[#allocation4 + $0x30] sm:$0xff] }
 0x2e3   :  { %v716_v24 = vsel %vm709_vm12, %v708_v21, -inf }
 0x2e4   :  { %717 = vmax.xlane.f32.xlu1 %v716_v24 }
 0x2e6   :  { %v701_v25 = vpop.f32.mrf.mxu3 }
 0x2e7   :  { %v3829_v25 = vld [vmem:[#allocation4 + $0x28] sm:$0xff] }
 0x2e8   :  { %v808_v12 = vpop.f32.mrf.mxu1 }
 0x2e9   :  { %v817_v26 = vmul.f32 0.125, %v808_v12 }
 0x2eb   :  { %v820_v27 = vadd.f32 %v817_v26, %v244_v22  ;;  %v3828_v26 = vld [vmem:[#allocation4 + $0x20] sm:$0xff] }
 0x2ed   :  { %v823_v28 = vsel %vm709_vm12, %v820_v27, -inf }
 0x2ee   :  { %824 = vmax.xlane.f32.xlu2 %v823_v28 }
 0x2f0   :  { %v810_v29 = vpop.f32.mrf.mxu1 }
 0x2f1   :  { %v818_v30 = vmul.f32 0.125, %v810_v29 }
 0x2f3   :  { %v821_v31 = vadd.f32 %v818_v30, %v245_v9 }
 0x2f5   :  { %v826_v17 = vsel %vm709_vm12, %v821_v31, -inf }
 0x2f6   :  { %827 = vmax.xlane.f32.xlu0 %v826_v17  ;;  %v3827_v17 = vld [vmem:[#allocation4 + $0x18] sm:$0xff] }
 0x2f8   :  { %v813_v35 = vpop.f32.mrf.mxu1 }
 0x2f9   :  { %v819_v23 = vmul.f32 0.125, %v813_v35 }
 0x2fb   :  { %v822_v36 = vadd.f32 %v819_v23, %v246_v18  ;;  %v3831_v18 = vld [vmem:[#allocation4 + $0x38] sm:$0xff] }
 0x2fc   :  { %1024 = vmatpush.bf16.msra.mxu3 %v3831_v18 }
 0x2fd   :  { %v829_v38 = vsel %vm709_vm12, %v822_v36, -inf }
 0x2fe   :  { %830 = vmax.xlane.f32.xlu2 %v829_v38  ;;  %v3826_v38 = vld [vmem:[#allocation4 + $0x10] sm:$0xff] }
 0x300   :  { %v815_v39 = vpop.f32.mrf.mxu1  ;;  %1025 = vmatpush.bf16.msra.mxu3 %v3830_v20 }
 0x301   :  { %v3825_v39 = vld [vmem:[#allocation4 + $0x8] sm:$0xff] }
 0x304   :  { %1026 = vmatpush.bf16.msra.mxu3 %v3829_v25 }
 0x308   :  { %1027 = vmatpush.bf16.msra.mxu3 %v3828_v26 }
 0x30c   :  { %1028 = vmatpush.bf16.msra.mxu3 %v3827_v17 }
 0x310   :  { %1029 = vmatpush.bf16.msra.mxu3 %v3826_v38 }
 0x314   :  { %1030 = vmatpush.bf16.msra.mxu3 %v3825_v39  ;;  %v3305_v39 = vld [vmem:[#allocation6 + $0x68] sm:$0xf0] }
 0x347   :  { %v712_v62 = vpop.xlane.xlu0 %711 }
 0x348   :  { %v719_v40 = vsub.f32 %v706_v10, %v712_v62  ;;  %v3824_v62 = vld [vmem:[#allocation4] sm:$0xff] }
 0x349   :  { %1031 = vmatpush.bf16.msra.mxu3 %v3824_v62 }
 0x34a   :  { %v722_v41 = vmul.f32 1.442695, %v719_v40  ;;  %v3839_v40 = vld [vmem:[#allocation4 + $0x78] sm:$0xff] }
 0x34b   :  { %1042 = vmatpush.bf16.msrb.mxu0 %v3839_v40  ;;  %v3295_v40 = vld [vmem:[#allocation6 + $0x50] sm:$0xf] }
 0x34c   :  { %3988 = vpow2.f32 %v722_v41  ;;  %v3838_v41 = vld [vmem:[#allocation4 + $0x70] sm:$0xff] }
 0x34f   :  { %v715_v42 = vpop.xlane.xlu1 %714  ;;  %1043 = vmatpush.bf16.msrb.mxu0 %v3838_v41  ;;  %v3851_v41 = vld [vmem:[#allocation6 + $0x54] sm:$0xf0] }
 0x350   :  { %v720_v43 = vsub.f32 %v707_v3, %v715_v42  ;;  %v3837_v42 = vld [vmem:[#allocation4 + $0x68] sm:$0xff] }
 0x352   :  { %v3989_v44 = vpop.eup %3988  ;;  %v724_v45 = vmul.f32 1.442695, %v720_v43  ;;  %v3836_v43 = vld [vmem:[#allocation4 + $0x60] sm:$0xff] }
 0x353   :  { %v728_v46 = vsel %vm709_vm12, %v3989_v44, 0.0  ;;  %1044 = vmatpush.bf16.msrb.mxu0 %v3837_v42  ;;  %v3850_v42 = vld [vmem:[#allocation6 + $0x54] sm:$0xf] }
 0x354   :  { %3990 = vpow2.f32 %v724_v45  ;;  %729 = vadd.xlane.f32.xlu0 %v728_v46  ;;  %v3834_v45 = vld [vmem:[#allocation4 + $0x50] sm:$0xff] }
 0x357   :  { %v718_v47 = vpop.xlane.xlu1 %717  ;;  %1045 = vmatpush.bf16.msrb.mxu0 %v3836_v43  ;;  %v3296_v43 = vor.u32 %v3851_v41, %v3295_v40  ;;  %v1123_v40 = vperm.slane %v4347_v19, 6 }
 0x358   :  { %v721_v49 = vsub.f32 %v708_v21, %v718_v47  ;;  %v3833_v47 = vld [vmem:[#allocation4 + $0x48] sm:$0xff] }
 0x35a   :  { %v3991_v50 = vpop.eup %3990  ;;  %v726_v51 = vmul.f32 1.442695, %v721_v49  ;;  %v3832_v49 = vld [vmem:[#allocation4 + $0x40] sm:$0xff] }
 0x35b   :  { %v731_v34 = vsel %vm709_vm12, %v3991_v50, 0.0 }
 0x35c   :  { %3992 = vpow2.f32 %v726_v51  ;;  %732 = vadd.xlane.f32.xlu1 %v731_v34 }
 0x361   :  { %v825_v52 = vpop.xlane.xlu2 %824 }
 0x362   :  { %v3993_v53 = vpop.eup %3992  ;;  %v832_v54 = vsub.f32 %v820_v27, %v825_v52 }
 0x363   :  { %v734_v55 = vsel %vm709_vm12, %v3993_v53, 0.0 }
 0x364   :  { %v835_v56 = vmul.f32 1.442695, %v832_v54  ;;  %735 = vadd.xlane.f32.xlu1 %v734_v55 }
 0x366   :  { %3994 = vpow2.f32 %v835_v56 }
 0x369   :  { %v828_v57 = vpop.xlane.xlu0 %827 }
 0x36a   :  { %v833_v48 = vsub.f32 %v821_v31, %v828_v57 }
 0x36c   :  { %v3995_v58 = vpop.eup %3994  ;;  %v837_v59 = vmul.f32 1.442695, %v833_v48 }
 0x36d   :  { %v841_v60 = vsel %vm709_vm12, %v3995_v58, 0.0 }
 0x36e   :  { %3996 = vpow2.f32 %v837_v59  ;;  %842 = vadd.xlane.f32.xlu2 %v841_v60 }
 0x371   :  { %v831_v61 = vpop.xlane.xlu2 %830 }
 0x372   :  { %v834_v63 = vsub.f32 %v822_v36, %v831_v61 }
 0x374   :  { %v3997_v0 = vpop.eup %3996  ;;  %v839_v1 = vmul.f32 1.442695, %v834_v63  ;;  %v927_v63 = vperm.slane %v4347_v19, 5 }
 0x375   :  { %v844_v2 = vsel %vm709_vm12, %v3997_v0, 0.0 }
 0x376   :  { %3998 = vpow2.f32 %v839_v1  ;;  %845 = vadd.xlane.f32.xlu0 %v844_v2 }
 0x37c   :  { %v3999_v4 = vpop.eup %3998 }
 0x37d   :  { %v847_v5 = vsel %vm709_vm12, %v3999_v4, 0.0 }
 0x37e   :  { %848 = vadd.xlane.f32.xlu2 %v847_v5 }
 0x3c7   :  { %v730_v7 = vpop.xlane.xlu0 %729 }
 0x3c8   :  { %4000 = vrcp.f32 %v730_v7 }
 0x3ce   :  { %v4001_v8 = vpop.eup %4000 }
 0x3cf   :  { %v733_v22 = vpop.xlane.xlu1 %732  ;;  %v740_v11 = vmul.f32 %v4001_v8, %v3989_v44  ;;  %v3835_v44 = vld [vmem:[#allocation4 + $0x58] sm:$0xff] }
 0x3d0   :  { %4002 = vrcp.f32 %v733_v22  ;;  %1046 = vmatpush.bf16.msrb.mxu0 %v3835_v44  ;;  %v3297_v44 = vld [vmem:[#allocation6 + $0x58] sm:$0xf0] }
 0x3d4   :  { %1047 = vmatpush.bf16.msrb.mxu0 %v3834_v45  ;;  %v3300_v45 = vor.u32 %v3850_v42, %v3297_v44 }
 0x3d6   :  { %v4003_v10 = vpop.eup %4002 }
 0x3d7   :  { %v741_v6 = vmul.f32 %v4003_v10, %v3991_v50  ;;  %v736_v13 = vpop.xlane.xlu1 %735 }
 0x3d8   :  { %4004 = vrcp.f32 %v736_v13  ;;  %1048 = vmatpush.bf16.msrb.mxu0 %v3833_v47  ;;  %v3849_v47 = vld [vmem:[#allocation6 + $0x44] sm:$0xf0] }
 0x3d9   :  { %v743_v9 = vpack.c.bf16 %v741_v6, %v740_v11 }
 0x3db   :  { %3185 = vmatmul.msk.bf16.vlgmr.msra.gmra.mxu0 %vm709_vm12, %v743_v9 }
 0x3dc   :  { %1049 = vmatpush.bf16.msrb.mxu0 %v3832_v49  ;;  %v3848_v49 = vld [vmem:[#allocation6 + $0x44] sm:$0xf] }
 0x3de   :  { %v4005_v3 = vpop.eup %4004 }
 0x3df   :  { %v742_v16 = vmul.f32 %v4005_v3, %v3993_v53 }
 0x3e1   :  { %v843_v15 = vpop.xlane.xlu2 %842  ;;  %v744_v24 = vpack.c.bf16 %v742_v16, %v742_v16 }
 0x3e2   :  { %4006 = vrcp.f32 %v843_v15 }
 0x3e8   :  { %v4007_v12 = vpop.eup %4006 }
 0x3e9   :  { %v846_v21 = vpop.xlane.xlu0 %845  ;;  %v853_v28 = vmul.f32 %v4007_v12, %v3995_v58 }
 0x3ea   :  { %4008 = vrcp.f32 %v846_v21 }
 0x3eb   :  { %3186 = vmatmul.msk.bf16.gmra.mxu0 %vm709_vm12, %v744_v24 }
 0x3f0   :  { %v4009_v27 = vpop.eup %4008 }
 0x3f1   :  { %v854_v29 = vmul.f32 %v4009_v27, %v3997_v0  ;;  %v849_v31 = vpop.xlane.xlu2 %848  ;;  %v3311_v27 = vld [vmem:[#allocation6 + $0x70] sm:$0xf] }
 0x3f2   :  { %4010 = vrcp.f32 %v849_v31  ;;  %v3313_v31 = vld [vmem:[#allocation6 + $0x78] sm:$0xf0] }
 0x3f3   :  { %v856_v30 = vpack.c.bf16 %v854_v29, %v853_v28  ;;  %v3855_v28 = vld [vmem:[#allocation6 + $0x74] sm:$0xf0]  ;;  %v3854_v29 = vld [vmem:[#allocation6 + $0x74] sm:$0xf] }
 0x3f4   :  { %v3316_v17 = vor.u32 %v3854_v29, %v3313_v31 }
 0x3f5   :  { %3187 = vmatmul.msk.bf16.vlgmr.msra.gmra.mxu2 %vm709_vm12, %v856_v30  ;;  %v3312_v30 = vor.u32 %v3855_v28, %v3311_v27 }
 0x3f6   :  { %1253 = vmatpush.bf16.msrb.mxu2 %v3316_v17 }
 0x3f7   :  { %1235 = vmatpush.bf16.msrb.mxu1 %v3312_v30 }
 0x3f8   :  { %v4011_v35 = vpop.eup %4010 }
 0x3f9   :  { %v855_v23 = vmul.f32 %v4011_v35, %v3999_v4  ;;  %v3303_v35 = vld [vmem:[#allocation6 + $0x60] sm:$0xf] }
 0x3fb   :  { %v857_v36 = vpack.c.bf16 %v855_v23, %v855_v23  ;;  %v3853_v23 = vld [vmem:[#allocation6 + $0x64] sm:$0xf0] }
 0x3fc   :  { %v3304_v38 = vor.u32 %v3853_v23, %v3303_v35 }
 0x3fe   :  { %1236 = vmatpush.bf16.msrb.mxu1 %v3304_v38 }
 0x402   :  { %1237 = vmatpush.bf16.msrb.mxu1 %v3296_v43 }
 0x405   :  { %3188 = vmatmul.msk.bf16.gmra.mxu2 %vm709_vm12, %v857_v36  ;;  %v3852_v36 = vld [vmem:[#allocation6 + $0x64] sm:$0xf] }
 0x406   :  { %v3308_v62 = vor.u32 %v3852_v36, %v3305_v39 }
 0x408   :  { %1254 = vmatpush.bf16.msrb.mxu2 %v3308_v62 }
 0x40c   :  { %1255 = vmatpush.bf16.msrb.mxu2 %v3300_v45 }
 0x458   :  { %v773_v46 = vpop.f32.mrf.mxu0 }
 0x460   :  { %v775_v50 = vpop.f32.mrf.mxu0 }
 0x461   :  { %v891_v51 = vpack.c.bf16 %v775_v50, %v773_v46  ;;  %v3287_v46 = vld [vmem:[#allocation6 + $0x40] sm:$0xf] }
 0x462   :  { %v3288_v50 = vor.u32 %v3849_v47, %v3287_v46  ;;  %v4086_v47 = vld [vmem:[%s4696_s5] sm:$0xff] }
 0x463   :  { %1032 = vmatmul.bf16.vlgmr.msra.gmra.mxu3 %v891_v51  ;;  %v3289_v51 = vld [vmem:[#allocation6 + $0x48] sm:$0xf0] }
 0x464   :  { %1238 = vmatpush.bf16.msrb.mxu1 %v3288_v50 }
 0x468   :  { %v778_v34 = vpop.f32.mrf.mxu0 }
 0x469   :  { %v893_v53 = vpack.c.bf16 %v778_v34, %v778_v34  ;;  %v3292_v34 = vor.u32 %v3848_v49, %v3289_v51  ;;  %v1127_v49 = vperm.slane %v4086_v47, 7 }
 0x46b   :  { %1256 = vmatpush.bf16.msrb.mxu2 %v3292_v34 }
 0x470   :  { %v780_v52 = vpop.f32.mrf.mxu0 }
 0x471   :  { %v3279_v52 = vld [vmem:[#allocation6 + $0x30] sm:$0xf] }
 0x473   :  { %1037 = vmatmul.bf16.gmra.mxu3 %v893_v53  ;;  %v3847_v53 = vld [vmem:[#allocation6 + $0x34] sm:$0xf0] }
 0x478   :  { %v882_v54 = vpop.f32.mrf.mxu2 }
 0x480   :  { %v884_v55 = vpop.f32.mrf.mxu2 }
 0x481   :  { %v892_v56 = vpack.c.bf16 %v884_v55, %v882_v54  ;;  %v3846_v54 = vld [vmem:[#allocation6 + $0x34] sm:$0xf]  ;;  %v3280_v55 = vor.u32 %v3847_v53, %v3279_v52 }
 0x483   :  { %1050 = vmatmul.bf16.vlgmr.msrb.gmra.mxu0 %v892_v56  ;;  %v3281_v56 = vld [vmem:[#allocation6 + $0x38] sm:$0xf0]  ;;  %1239 = vmatpush.bf16.msrb.mxu1 %v3280_v55 }
 0x488   :  { %v887_v57 = vpop.f32.mrf.mxu2 }
 0x489   :  { %v894_v58 = vpack.c.bf16 %v887_v57, %v887_v57  ;;  %v3284_v57 = vor.u32 %v3846_v54, %v3281_v56 }
 0x48b   :  { %1257 = vmatpush.bf16.msrb.mxu2 %v3284_v57 }
 0x490   :  { %v889_v48 = vpop.f32.mrf.mxu2 }
 0x491   :  { %v3271_v48 = vld [vmem:[#allocation6 + $0x20] sm:$0xf] }
 0x493   :  { %1055 = vmatmul.bf16.gmra.mxu0 %v894_v58  ;;  %v3845_v58 = vld [vmem:[#allocation6 + $0x24] sm:$0xf0] }
 0x4e6   :  { %v1033_v59 = vpop.f32.mrf.mxu3 }
 0x4e7   :  { %v1034_v1 = vadd.f32 %v1033_v59, %v927_v63  ;;  %v3844_v59 = vld [vmem:[#allocation6 + $0x24] sm:$0xf] }
 0x4ee   :  { %v1035_v60 = vpop.f32.mrf.mxu3 }
 0x4ef   :  { %v1036_v7 = vadd.f32 %v1035_v60, %v927_v63  ;;  %v3272_v60 = vor.u32 %v3845_v58, %v3271_v48  ;;  %v3863_v48 = vld [vmem:[#allocation7 + $0x38] sm:$0xff]  ;;  %v3862_v58 = vld [vmem:[#allocation7 + $0x30] sm:$0xff] }
 0x4f0   :  { %1458 = vmatpush.bf16.msrb.mxu3 %v3863_v48 }
 0x4f1   :  { %1240 = vmatpush.bf16.msrb.mxu1 %v3272_v60  ;;  %v3861_v60 = vld [vmem:[#allocation7 + $0x28] sm:$0xff] }
 0x4f4   :  { %1459 = vmatpush.bf16.msrb.mxu3 %v3862_v58 }
 0x4f6   :  { %v1038_v61 = vpop.f32.mrf.mxu3 }
 0x4f7   :  { %v1039_v11 = vadd.f32 %v1038_v61, %v927_v63  ;;  %v3273_v61 = vld [vmem:[#allocation6 + $0x28] sm:$0xf0] }
 0x4f8   :  { %v3276_v63 = vor.u32 %v3844_v59, %v3273_v61  ;;  %v3871_v59 = vld [vmem:[#allocation7 + $0x78] sm:$0xff]  ;;  %1460 = vmatpush.bf16.msrb.mxu3 %v3861_v60  ;;  %v3870_v61 = vld [vmem:[#allocation7 + $0x70] sm:$0xff] }
 0x4f9   :  { %1476 = vmatpush.bf16.msra.mxu0 %v3871_v59 }
 0x4fa   :  { %1258 = vmatpush.bf16.msrb.mxu2 %v3276_v63  ;;  %v3860_v63 = vld [vmem:[#allocation7 + $0x20] sm:$0xff] }
 0x4fc   :  { %1461 = vmatpush.bf16.msrb.mxu3 %v3860_v63 }
 0x4fd   :  { %1477 = vmatpush.bf16.msra.mxu0 %v3870_v61 }
 0x4fe   :  { %v1040_v0 = vpop.f32.mrf.mxu3 }
 0x4ff   :  { %v3263_v0 = vld [vmem:[#allocation6 + $0x10] sm:$0xf] }
 0x500   :  { %v1051_v2 = vpop.f32.mrf.mxu0 }
 0x501   :  { %v1052_v4 = vadd.f32 %v1051_v2, %v1034_v1  ;;  %v3843_v1 = vld [vmem:[#allocation6 + $0x14] sm:$0xf0]  ;;  %v3842_v2 = vld [vmem:[#allocation6 + $0x14] sm:$0xf] }
 0x503   :  { %v1060_v5 = vadd.f32 %v1052_v4, %v4355_v33  ;;  %v3264_v4 = vor.u32 %v3843_v1, %v3263_v0  ;;  %v3859_v0 = vld [vmem:[#allocation7 + $0x18] sm:$0xff]  ;;  %v3868_v1 = vld [vmem:[#allocation7 + $0x60] sm:$0xff] }
 0x504   :  { %1462 = vmatpush.bf16.msrb.mxu3 %v3859_v0 }
 0x505   :  { %1063 = vadd.xlane.f32.xlu0 %v1060_v5  ;;  %1241 = vmatpush.bf16.msrb.mxu1 %v3264_v4  ;;  %v3867_v4 = vld [vmem:[#allocation7 + $0x58] sm:$0xff] }
 0x508   :  { %v1053_v22 = vpop.f32.mrf.mxu0 }
 0x509   :  { %v1054_v8 = vadd.f32 %v1053_v22, %v1036_v7 }
 0x50b   :  { %v1061_v10 = vadd.f32 %v1054_v8, %v4353_v32 }
 0x50d   :  { %1065 = vadd.xlane.f32.xlu1 %v1061_v10 }
 0x510   :  { %v1056_v6 = vpop.f32.mrf.mxu0 }
 0x511   :  { %v1057_v9 = vadd.f32 %v1056_v6, %v1039_v11  ;;  %v3841_v11 = vld [vmem:[#allocation6 + $0x4] sm:$0xf0]  ;;  %v3840_v6 = vld [vmem:[#allocation6 + $0x4] sm:$0xf] }
 0x513   :  { %v1062_v13 = vadd.f32 %v1057_v9, %v4369_v37 }
 0x515   :  { %1067 = vadd.xlane.f32.xlu2 %v1062_v13 }
 0x518   :  { %v1058_v3 = vpop.f32.mrf.mxu0 }
 0x519   :  { %v3257_v3 = vld [vmem:[#allocation6 + $0x8] sm:$0xf0] }
 0x578   :  { %v1064_v15 = vpop.xlane.xlu0 %1063 }
 0x579   :  { %v1069_v16 = vmul.f32 %v1064_v15, %v4313_v14  ;;  %v3260_v15 = vor.u32 %v3840_v6, %v3257_v3 }
 0x57b   :  { %v4422_v18 = vsub.f32 %v1060_v5, %v1069_v16  ;;  %v3265_v5 = vld [vmem:[#allocation6 + $0x18] sm:$0xf0] }
 0x57c   :  { %v3268_v22 = vor.u32 %v3842_v2, %v3265_v5  ;;  %v3858_v2 = vld [vmem:[#allocation7 + $0x10] sm:$0xff]  ;;  %v3857_v5 = vld [vmem:[#allocation7 + $0x8] sm:$0xff] }
 0x57d   :  { %v1075_v33 = vmul.f32 %v4422_v18, %v4422_v18  ;;  %1463 = vmatpush.bf16.msrb.mxu3 %v3858_v2 }
 0x57e   :  { %1259 = vmatpush.bf16.msrb.mxu2 %v3268_v22  ;;  %v3866_v22 = vld [vmem:[#allocation7 + $0x50] sm:$0xff] }
 0x57f   :  { %1078 = vadd.xlane.f32.xlu0 %v1075_v33 }
 0x580   :  { %v1066_v20 = vpop.xlane.xlu1 %1065 }
 0x581   :  { %v1070_v32 = vmul.f32 %v1066_v20, %v4313_v14  ;;  %1464 = vmatpush.bf16.msrb.mxu3 %v3857_v5 }
 0x582   :  { %1260 = vmatpush.bf16.msrb.mxu2 %v3260_v15 }
 0x583   :  { %v4427_v21 = vsub.f32 %v1061_v10, %v1070_v32  ;;  %v3255_v10 = vld [vmem:[#allocation6] sm:$0xf] }
 0x585   :  { %v1076_v24 = vmul.f32 %v4427_v21, %v4427_v21 }
 0x587   :  { %1080 = vadd.xlane.f32.xlu1 %v1076_v24 }
 0x588   :  { %v1068_v37 = vpop.xlane.xlu2 %1067 }
 0x589   :  { %v1071_v25 = vmul.f32 %v1068_v37, %v4313_v14 }
 0x58b   :  { %v4432_v12 = vsub.f32 %v1062_v13, %v1071_v25  ;;  %v3256_v13 = vor.u32 %v3841_v11, %v3255_v10  ;;  %v3856_v10 = vld [vmem:[#allocation7] sm:$0xff]  ;;  %v3865_v11 = vld [vmem:[#allocation7 + $0x48] sm:$0xff] }
 0x58c   :  { %1465 = vmatpush.bf16.msrb.mxu3 %v3856_v10 }
 0x58d   :  { %v1077_v26 = vmul.f32 %v4432_v12, %v4432_v12  ;;  %1242 = vmatpush.bf16.msrb.mxu1 %v3256_v13  ;;  %v3864_v13 = vld [vmem:[#allocation7 + $0x40] sm:$0xff] }
 0x58f   :  { %1082 = vadd.xlane.f32.xlu2 %v1077_v26 }
 0x5f2   :  { %v1079_v7 = vpop.xlane.xlu0 %1078 }
 0x5f3   :  { %v1084_v8 = vmul.f32 %v1079_v7, %v4313_v14  ;;  %v1149_v7 = vld [vmem:[%s4698_s7] ss:$2 sm:$0x3] }
 0x5f4   :  { %v1152_v15 = vperm.slane %v1149_v7, 1 }
 0x5f5   :  { %v1087_v9 = vadd.f32 1e-12, %v1084_v8  ;;  %v1151_v8 = vperm.slane %v1149_v7, 0 }
 0x5f7   :  { %4012 = vrsqrt.f32 %v1087_v9  ;;  %vm1096_vm14 = vweird.f32 %v1087_v9 }
 0x5fa   :  { %v1081_v16 = vpop.xlane.xlu1 %1080 }
 0x5fb   :  { %v1085_v33 = vmul.f32 %v1081_v16, %v4313_v14 }
 0x5fd   :  { %v4013_v20 = vpop.eup %4012  ;;  %v1088_v32 = vadd.f32 1e-12, %v1085_v33 }
 0x5fe   :  { %v1091_v24 = vmul.f32 %v4013_v20, %v1087_v9  ;;  %vm1097_vm13 = vweird.f32 %v4013_v20 }
 0x5ff   :  { %4014 = vrsqrt.f32 %v1088_v32  ;;  %vm1098_vm15 = vmor %vm1096_vm14, %vm1097_vm13  ;;  %vm1106_vm1 = vweird.f32 %v1088_v32 }
 0x600   :  { %v1092_v37 = vmul.f32 %v4013_v20, %v1091_v24 }
 0x602   :  { %v1093_v25 = vmul.f32 0.5, %v1092_v37  ;;  %v1083_v26 = vpop.xlane.xlu2 %1082 }
 0x603   :  { %v1086_v27 = vmul.f32 %v1083_v26, %v4313_v14 }
 0x604   :  { %v1094_v28 = vsub.f32 1.5, %v1093_v25 }
 0x605   :  { %v4015_v29 = vpop.eup %4014  ;;  %v1089_v30 = vadd.f32 1e-12, %v1086_v27 }
 0x606   :  { %v1095_v31 = vmul.f32 %v4013_v20, %v1094_v28  ;;  %v1101_v17 = vmul.f32 %v4015_v29, %v1088_v32  ;;  %vm1107_vm0 = vweird.f32 %v4015_v29 }
 0x607   :  { %4016 = vrsqrt.f32 %v1089_v30  ;;  %vm1108_vm2 = vmor %vm1106_vm1, %vm1107_vm0  ;;  %vm1116_vm4 = vweird.f32 %v1089_v30 }
 0x608   :  { %v1102_v35 = vmul.f32 %v4015_v29, %v1101_v17  ;;  %v1099_v23 = vsel %vm1098_vm15, %v4013_v20, %v1095_v31 }
 0x609   :  { %v1120_v62 = vmul.f32 %v1099_v23, %v4422_v18 }
 0x60a   :  { %v1103_v36 = vmul.f32 0.5, %v1102_v35 }
 0x60b   :  { %v1124_v46 = vmul.f32 %v1123_v40, %v1120_v62 }
 0x60c   :  { %v1104_v38 = vsub.f32 1.5, %v1103_v36 }
 0x60d   :  { %v4017_v39 = vpop.eup %4016  ;;  %v4445_v18 = vadd.f32 %v1127_v49, %v1124_v46 }
 0x60e   :  { %v1105_v41 = vmul.f32 %v4015_v29, %v1104_v38  ;;  %v1111_v42 = vmul.f32 %v4017_v39, %v1089_v30  ;;  %vm1117_vm3 = vweird.f32 %v4017_v39 }
 0x60f   :  { %vm1118_vm5 = vmor %vm1116_vm4, %vm1117_vm3 }
 0x610   :  { %v1109_v43 = vsel %vm1108_vm2, %v4015_v29, %v1105_v41  ;;  %v1112_v44 = vmul.f32 %v4017_v39, %v1111_v42 }
 0x611   :  { %v1121_v45 = vmul.f32 %v1109_v43, %v4427_v21 }
 0x612   :  { %v1113_v50 = vmul.f32 0.5, %v1112_v44 }
 0x613   :  { %v1125_v51 = vmul.f32 %v1123_v40, %v1121_v45 }
 0x614   :  { %v1114_v34 = vsub.f32 1.5, %v1113_v50 }
 0x615   :  { %v4447_v19 = vadd.f32 %v1127_v49, %v1125_v51 }
 0x616   :  { %v1115_v52 = vmul.f32 %v4017_v39, %v1114_v34 }
 0x617   :  { %v1131_v21 = vpack.c.bf16 %v4447_v19, %v4445_v18 }
 0x618   :  { %v1119_v53 = vsel %vm1118_vm5, %v4017_v39, %v1115_v52 }
 0x619   :  { %1243 = vmatmul.bf16.vlgmr.msrb.gmra.mxu1 %v1131_v21  ;;  %1261 = vmatmul.bf16.vlgmr.msrb.gmra.mxu2 %v1131_v21  ;;  %v1122_v54 = vmul.f32 %v1119_v53, %v4432_v12  ;;  %v3869_v12 = vld [vmem:[#allocation7 + $0x68] sm:$0xff] }
 0x61a   :  { %1478 = vmatpush.bf16.msra.mxu0 %v3869_v12 }
 0x61b   :  { %v1126_v55 = vmul.f32 %v1123_v40, %v1122_v54 }
 0x61d   :  { %v4452_v56 = vadd.f32 %v1127_v49, %v1126_v55 }
 0x61e   :  { %1479 = vmatpush.bf16.msra.mxu0 %v3868_v1 }
 0x61f   :  { %v1132_v57 = vpack.c.bf16 %v4452_v56, %v4452_v56 }
 0x622   :  { %1480 = vmatpush.bf16.msra.mxu0 %v3867_v4 }
 0x626   :  { %1481 = vmatpush.bf16.msra.mxu0 %v3866_v22 }
 0x629   :  { %1248 = vmatmul.bf16.gmra.mxu1 %v1132_v57  ;;  %1266 = vmatmul.bf16.gmra.mxu2 %v1132_v57 }
 0x62a   :  { %1482 = vmatpush.bf16.msra.mxu0 %v3865_v11 }
 0x62e   :  { %1483 = vmatpush.bf16.msra.mxu0 %v3864_v13 }
 0x696   :  { %v1244_v6 = vpop.f32.mrf.mxu1 }
 0x697   :  { %v1245_v9 = vadd.f32 %v1244_v6, %v1151_v8 }
 0x699   :  { %v1277_v3 = vmul.f32 0.044715, %v1245_v9  ;;  %v1271_v58 = vmul.f32 0.5, %v1245_v9 }
 0x69b   :  { %v1283_v16 = vmul.f32 %v1277_v3, %v1245_v9 }
 0x69c   :  { %v1262_v33 = vpop.f32.mrf.mxu2 }
 0x69d   :  { %v1289_v20 = vmul.f32 %v1283_v16, %v1245_v9  ;;  %v1263_v32 = vadd.f32 %v1262_v33, %v1152_v15 }
 0x69e   :  { %v1246_v24 = vpop.f32.mrf.mxu1 }
 0x69f   :  { %v1295_v37 = vadd.f32 %v1289_v20, %v1245_v9  ;;  %v1278_v25 = vmul.f32 0.044715, %v1263_v32  ;;  %v1247_v26 = vadd.f32 %v1246_v24, %v1151_v8  ;;  %v1272_v10 = vmul.f32 0.5, %v1263_v32 }
 0x6a1   :  { %v1284_v27 = vmul.f32 %v1278_v25, %v1263_v32  ;;  %v1279_v28 = vmul.f32 0.044715, %v1247_v26  ;;  %v1301_v29 = vmul.f32 0.7978846, %v1295_v37  ;;  %v1273_v59 = vmul.f32 0.5, %v1247_v26 }
 0x6a3   :  { %v1290_v30 = vmul.f32 %v1284_v27, %v1263_v32  ;;  %v1285_v31 = vmul.f32 %v1279_v28, %v1247_v26  ;;  %4018 = vtanh.f32 %v1301_v29 }
 0x6a4   :  { %v1264_v17 = vpop.f32.mrf.mxu2 }
 0x6a5   :  { %v1296_v35 = vadd.f32 %v1290_v30, %v1263_v32  ;;  %v1291_v23 = vmul.f32 %v1285_v31, %v1247_v26  ;;  %v1265_v36 = vadd.f32 %v1264_v17, %v1152_v15  ;;  %v4462_v32 = vld [vmem:[%s4696_s5 + $0x8] sm:$0xff] }
 0x6a6   :  { %v1249_v38 = vpop.f32.mrf.mxu1  ;;  %v1361_v29 = vperm.slane %v4462_v32, 0 }
 0x6a7   :  { %v1297_v39 = vadd.f32 %v1291_v23, %v1247_v26  ;;  %v1280_v62 = vmul.f32 0.044715, %v1265_v36  ;;  %v1250_v40 = vadd.f32 %v1249_v38, %v1151_v8  ;;  %v1302_v41 = vmul.f32 0.7978846, %v1296_v35 }
 0x6a8   :  { %v1274_v11 = vmul.f32 0.5, %v1265_v36 }
 0x6a9   :  { %v1303_v42 = vmul.f32 0.7978846, %v1297_v39  ;;  %v1286_v43 = vmul.f32 %v1280_v62, %v1265_v36  ;;  %v1281_v44 = vmul.f32 0.044715, %v1250_v40  ;;  %v4019_v49 = vpop.eup %4018  ;;  %v1275_v33 = vmul.f32 0.5, %v1250_v40 }
 0x6aa   :  { %v1313_v54 = vadd.f32 1.0, %v4019_v49 }
 0x6ab   :  { %v1292_v45 = vmul.f32 %v1286_v43, %v1265_v36  ;;  %4020 = vtanh.f32 %v1303_v42  ;;  %v1287_v47 = vmul.f32 %v1281_v44, %v1250_v40 }
 0x6ac   :  { %v1267_v46 = vpop.f32.mrf.mxu2  ;;  %4022 = vtanh.f32 %v1302_v41  ;;  %v1319_v1 = vmul.f32 %v1313_v54, %v1271_v58  ;;  %v3914_v58 = vld [vmem:[#allocation2 + $0x2d4] sm:$0xf] }
 0x6ad   :  { %v1298_v50 = vadd.f32 %v1292_v45, %v1265_v36  ;;  %v1268_v51 = vadd.f32 %v1267_v46, %v1152_v15  ;;  %v1293_v52 = vmul.f32 %v1287_v47, %v1250_v40 }
 0x6ae   :  { %v1251_v34 = vpop.f32.mrf.mxu1 }
 0x6af   :  { %v1304_v21 = vmul.f32 0.7978846, %v1298_v50  ;;  %v1282_v53 = vmul.f32 0.044715, %v1268_v51  ;;  %v1299_v55 = vadd.f32 %v1293_v52, %v1250_v40  ;;  %v1276_v26 = vmul.f32 0.5, %v1268_v51 }
 0x6b1   :  { %v4021_v57 = vpop.eup %4020  ;;  %4024 = vtanh.f32 %v1304_v21  ;;  %v1288_v48 = vmul.f32 %v1282_v53, %v1268_v51  ;;  %v1305_v61 = vmul.f32 0.7978846, %v1299_v55 }
 0x6b2   :  { %v1315_v60 = vadd.f32 1.0, %v4021_v57  ;;  %v4023_v63 = vpop.eup %4022  ;;  %v3552_v57 = vld [vmem:[#allocation2 + $0x2d0] sm:$0xf] }
 0x6b3   :  { %v1294_v12 = vmul.f32 %v1288_v48, %v1268_v51  ;;  %4026 = vtanh.f32 %v1305_v61  ;;  %v1314_v7 = vadd.f32 1.0, %v4023_v63  ;;  %v3917_v48 = vld [vmem:[#allocation2 + $0x2e4] sm:$0xf0]  ;;  %v3560_v61 = vld [vmem:[#allocation2 + $0x2d8] sm:$0xf] }
 0x6b4   :  { %v1269_v0 = vpop.f32.mrf.mxu2  ;;  %v1321_v2 = vmul.f32 %v1315_v60, %v1273_v59  ;;  %v3553_v59 = vor.u32 %v3917_v48, %v3552_v57  ;;  %v3554_v60 = vld [vmem:[#allocation2 + $0x2e8] sm:$0xf0]  ;;  %v3918_v63 = vld [vmem:[#allocation2 + $0x2ec] sm:$0xf0]  ;;  %v3432_v48 = vld [vmem:[#allocation2 + $0x1e0] sm:$0xf] }
 0x6b5   :  { %v1300_v4 = vadd.f32 %v1294_v12, %v1268_v51  ;;  %v1320_v13 = vmul.f32 %v1314_v7, %v1272_v10  ;;  %v3557_v12 = vor.u32 %v3914_v58, %v3554_v60  ;;  %v3561_v0 = vor.u32 %v3918_v63, %v3560_v61  ;;  %v3911_v7 = vld [vmem:[#allocation2 + $0x2b4] sm:$0xf0]  ;;  %v3530_v10 = vld [vmem:[#allocation2 + $0x2b8] sm:$0xf0]  ;;  %v3440_v63 = vld [vmem:[#allocation2 + $0x1e8] sm:$0xf] }
 0x6b6   :  { %v1325_v5 = vpack.c.bf16 %v1321_v2, %v1319_v1  ;;  %v3915_v1 = vld [vmem:[#allocation2 + $0x2dc] sm:$0xf]  ;;  %v3562_v2 = vld [vmem:[#allocation2 + $0x2f0] sm:$0xf0]  ;;  %1871 = vmatpush.bf16.msra.mxu1 %v3553_v59  ;;  %v3887_v58 = vld [vmem:[#allocation2 + $0x1f4] sm:$0xf0] }
 0x6b7   :  { %v4025_v22 = vpop.eup %4024  ;;  %v1306_v8 = vmul.f32 0.7978846, %v1300_v4  ;;  %v3565_v4 = vor.u32 %v3915_v1, %v3562_v2  ;;  %1889 = vmatpush.bf16.msra.mxu2 %v3557_v12  ;;  %1907 = vmatpush.bf16.msra.mxu3 %v3561_v0  ;;  %v3884_v59 = vld [vmem:[#allocation2 + $0x1e4] sm:$0xf]  ;;  %v3433_v60 = vor.u32 %v3887_v58, %v3432_v48  ;;  %v3434_v61 = vld [vmem:[#allocation2 + $0x1f8] sm:$0xf0] }
 0x6b8   :  { %1466 = vmatmul.bf16.vlgmr.msrb.gmra.mxu3 %v1325_v5  ;;  %v1316_v6 = vadd.f32 1.0, %v4025_v22  ;;  %v3528_v5 = vld [vmem:[#allocation2 + $0x2a0] sm:$0xf]  ;;  %v3908_v22 = vld [vmem:[#allocation2 + $0x2a4] sm:$0xf]  ;;  %v3437_v0 = vor.u32 %v3884_v59, %v3434_v61 }
 0x6b9   :  { %v4027_v3 = vpop.eup %4026  ;;  %4028 = vtanh.f32 %v1306_v8  ;;  %1925 = vmatpush.bf16.msrb.mxu0 %v3565_v4  ;;  %v3529_v8 = vor.u32 %v3911_v7, %v3528_v5  ;;  %v3888_v12 = vld [vmem:[#allocation2 + $0x1fc] sm:$0xf0]  ;;  %v3885_v2 = vld [vmem:[#allocation2 + $0x1ec] sm:$0xf]  ;;  %v3442_v4 = vld [vmem:[#allocation2 + $0x200] sm:$0xf0] }
 0x6ba   :  { %v1322_v9 = vmul.f32 %v1316_v6, %v1274_v11  ;;  %v1317_v16 = vadd.f32 1.0, %v4027_v3  ;;  %v3536_v11 = vld [vmem:[#allocation2 + $0x2a8] sm:$0xf]  ;;  %v3912_v6 = vld [vmem:[#allocation2 + $0x2bc] sm:$0xf0]  ;;  %v3441_v1 = vor.u32 %v3888_v12, %v3440_v63  ;;  %v3445_v5 = vor.u32 %v3885_v2, %v3442_v4 }
 0x6bb   :  { %v3909_v3 = vld [vmem:[#allocation2 + $0x2ac] sm:$0xf]  ;;  %1872 = vmatpush.bf16.msra.mxu1 %v3529_v8  ;;  %v3408_v7 = vld [vmem:[#allocation2 + $0x1b0] sm:$0xf]  ;;  %v3878_v8 = vld [vmem:[#allocation2 + $0x1b4] sm:$0xf] }
 0x6bc   :  { %v1326_v15 = vpack.c.bf16 %v1322_v9, %v1320_v13  ;;  %v1323_v24 = vmul.f32 %v1317_v16, %v1275_v33  ;;  %v3533_v13 = vor.u32 %v3908_v22, %v3530_v10  ;;  %v3537_v9 = vor.u32 %v3912_v6, %v3536_v11  ;;  %v3504_v33 = vld [vmem:[#allocation2 + $0x270] sm:$0xf]  ;;  %v3881_v22 = vld [vmem:[#allocation2 + $0x1c4] sm:$0xf0]  ;;  %v3410_v11 = vld [vmem:[#allocation2 + $0x1c8] sm:$0xf0] }
 0x6bd   :  { %v3409_v10 = vor.u32 %v3881_v22, %v3408_v7  ;;  %v3416_v6 = vld [vmem:[#allocation2 + $0x1b8] sm:$0xf]  ;;  %v3904_v58 = vld [vmem:[#allocation2 + $0x284] sm:$0xf]  ;;  %v3522_v59 = vld [vmem:[#allocation2 + $0x298] sm:$0xf0] }
 0x6be   :  { %1484 = vmatmul.bf16.vlgmr.msra.gmra.mxu0 %v1326_v15  ;;  %v1327_v25 = vpack.c.bf16 %v1323_v24, %v1323_v24  ;;  %v3538_v15 = vld [vmem:[#allocation2 + $0x2c0] sm:$0xf0]  ;;  %1890 = vmatpush.bf16.msra.mxu2 %v3533_v13  ;;  %v3902_v24 = vld [vmem:[#allocation2 + $0x274] sm:$0xf]  ;;  %v3882_v13 = vld [vmem:[#allocation2 + $0x1cc] sm:$0xf0]  ;;  %v3525_v61 = vor.u32 %v3904_v58, %v3522_v59 }
 0x6bf   :  { %v4029_v20 = vpop.eup %4028  ;;  %v3541_v16 = vor.u32 %v3909_v3, %v3538_v15  ;;  %1908 = vmatpush.bf16.msra.mxu3 %v3537_v9  ;;  %v3413_v3 = vor.u32 %v3878_v8, %v3410_v11  ;;  %v3417_v15 = vor.u32 %v3882_v13, %v3416_v6  ;;  %v3901_v63 = vld [vmem:[#allocation2 + $0x264] sm:$0xf0]  ;;  %v3898_v12 = vld [vmem:[#allocation2 + $0x254] sm:$0xf] }
 0x6c0   :  { %v1318_v37 = vadd.f32 1.0, %v4029_v20  ;;  %v3905_v20 = vld [vmem:[#allocation2 + $0x284] sm:$0xf0] }
 0x6c1   :  { %1926 = vmatpush.bf16.msrb.mxu0 %v3541_v16  ;;  %v3879_v16 = vld [vmem:[#allocation2 + $0x1bc] sm:$0xf] }
 0x6c2   :  { %v1324_v27 = vmul.f32 %v1318_v37, %v1276_v26  ;;  %v3505_v37 = vor.u32 %v3905_v20, %v3504_v33  ;;  %v3512_v26 = vld [vmem:[#allocation2 + $0x278] sm:$0xf]  ;;  %v3418_v33 = vld [vmem:[#allocation2 + $0x1d0] sm:$0xf0] }
 0x6c4   :  { %v1328_v28 = vpack.c.bf16 %v1324_v27, %v1324_v27  ;;  %v3906_v27 = vld [vmem:[#allocation2 + $0x28c] sm:$0xf0]  ;;  %1873 = vmatpush.bf16.msra.mxu1 %v3505_v37  ;;  %v3384_v37 = vld [vmem:[#allocation2 + $0x180] sm:$0xf] }
 0x6c8   :  { %1471 = vmatmul.bf16.gmra.mxu3 %v1327_v25  ;;  %v3506_v25 = vld [vmem:[#allocation2 + $0x288] sm:$0xf0] }
 0x6ce   :  { %1489 = vmatmul.bf16.gmra.mxu0 %v1328_v28  ;;  %v3509_v28 = vor.u32 %v3902_v24, %v3506_v25  ;;  %v3421_v24 = vor.u32 %v3879_v16, %v3418_v33  ;;  %v3875_v25 = vld [vmem:[#allocation2 + $0x194] sm:$0xf0] }
 0x6d0   :  { %1891 = vmatpush.bf16.msra.mxu2 %v3509_v28  ;;  %v3385_v28 = vor.u32 %v3875_v25, %v3384_v37 }
 0x73b   :  { %v1467_v30 = vpop.f32.mrf.mxu3  ;;  %v1485_v31 = vpop.f32.mrf.mxu0 }
 0x73c   :  { %v1468_v17 = vadd.f32 %v1467_v30, %v1361_v29  ;;  %v3903_v30 = vld [vmem:[#allocation2 + $0x27c] sm:$0xf] }
 0x73e   :  { %v1486_v35 = vadd.f32 %v1485_v31, %v1468_v17  ;;  %v3514_v31 = vld [vmem:[#allocation2 + $0x290] sm:$0xf0] }
 0x73f   :  { %v3517_v17 = vor.u32 %v3903_v30, %v3514_v31  ;;  %v3392_v30 = vld [vmem:[#allocation2 + $0x188] sm:$0xf] }
 0x740   :  { %v1494_v23 = vadd.f32 %v1486_v35, %v4445_v18  ;;  %v3480_v35 = vld [vmem:[#allocation2 + $0x240] sm:$0xf] }
 0x741   :  { %1927 = vmatpush.bf16.msrb.mxu0 %v3517_v17  ;;  %v3876_v17 = vld [vmem:[#allocation2 + $0x19c] sm:$0xf0] }
 0x742   :  { %1497 = vadd.xlane.f32.xlu0 %v1494_v23 }
 0x743   :  { %v1469_v36 = vpop.f32.mrf.mxu3  ;;  %v1487_v38 = vpop.f32.mrf.mxu0 }
 0x744   :  { %v1470_v39 = vadd.f32 %v1469_v36, %v1361_v29  ;;  %v3896_v36 = vld [vmem:[#allocation2 + $0x244] sm:$0xf] }
 0x746   :  { %v1488_v62 = vadd.f32 %v1487_v38, %v1470_v39  ;;  %v3482_v39 = vld [vmem:[#allocation2 + $0x258] sm:$0xf0] }
 0x748   :  { %v1495_v40 = vadd.f32 %v1488_v62, %v4447_v19  ;;  %v3488_v62 = vld [vmem:[#allocation2 + $0x248] sm:$0xf] }
 0x74a   :  { %1499 = vadd.xlane.f32.xlu1 %v1495_v40 }
 0x74b   :  { %v1472_v41 = vpop.f32.mrf.mxu3  ;;  %v1490_v42 = vpop.f32.mrf.mxu0 }
 0x74c   :  { %v1473_v43 = vadd.f32 %v1472_v41, %v1361_v29  ;;  %v3513_v29 = vor.u32 %v3906_v27, %v3512_v26  ;;  %v3485_v41 = vor.u32 %v3896_v36, %v3482_v39  ;;  %v3872_v26 = vld [vmem:[#allocation2 + $0x184] sm:$0xf]  ;;  %v3393_v36 = vor.u32 %v3876_v17, %v3392_v30  ;;  %v3568_v39 = vld [vmem:[#allocation2 + $0x2e0] sm:$0xf]  ;;  %v3450_v30 = vld [vmem:[#allocation2 + $0x208] sm:$0xf0] }
 0x74e   :  { %v1491_v44 = vadd.f32 %v1490_v42, %v1473_v43  ;;  %1909 = vmatpush.bf16.msra.mxu3 %v3513_v29  ;;  %v3897_v43 = vld [vmem:[#allocation2 + $0x24c] sm:$0xf]  ;;  %1892 = vmatpush.bf16.msra.mxu2 %v3485_v41  ;;  %v3386_v29 = vld [vmem:[#allocation2 + $0x198] sm:$0xf0] }
 0x74f   :  { %v3389_v31 = vor.u32 %v3872_v26, %v3386_v29  ;;  %v3448_v26 = vld [vmem:[#allocation2 + $0x1f0] sm:$0xf]  ;;  %v3886_v29 = vld [vmem:[#allocation2 + $0x1f4] sm:$0xf] }
 0x750   :  { %v1496_v45 = vadd.f32 %v1491_v44, %v4452_v56  ;;  %v3490_v44 = vld [vmem:[#allocation2 + $0x260] sm:$0xf0]  ;;  %v3453_v17 = vor.u32 %v3886_v29, %v3450_v30 }
 0x752   :  { %1501 = vadd.xlane.f32.xlu2 %v1496_v45 }
 0x753   :  { %v1474_v46 = vpop.f32.mrf.mxu3  ;;  %v1492_v47 = vpop.f32.mrf.mxu0 }
 0x754   :  { %v3456_v46 = vld [vmem:[#allocation2 + $0x210] sm:$0xf]  ;;  %v3893_v47 = vld [vmem:[#allocation2 + $0x224] sm:$0xf0] }
 0x7b5   :  { %v1498_v49 = vpop.xlane.xlu0 %1497 }
 0x7b6   :  { %v1503_v18 = vmul.f32 %v1498_v49, %v4313_v14  ;;  %v3890_v49 = vld [vmem:[#allocation2 + $0x214] sm:$0xf] }
 0x7b8   :  { %v4469_v50 = vsub.f32 %v1494_v23, %v1503_v18  ;;  %v3899_v23 = vld [vmem:[#allocation2 + $0x254] sm:$0xf0]  ;;  %v3457_v18 = vor.u32 %v3893_v47, %v3456_v46  ;;  %v3544_v46 = vld [vmem:[#allocation2 + $0x2b0] sm:$0xf]  ;;  %v3913_v47 = vld [vmem:[#allocation2 + $0x2c4] sm:$0xf0] }
 0x7b9   :  { %v3481_v38 = vor.u32 %v3899_v23, %v3480_v35  ;;  %v3873_v35 = vld [vmem:[#allocation2 + $0x18c] sm:$0xf]  ;;  %v3394_v23 = vld [vmem:[#allocation2 + $0x1a0] sm:$0xf0] }
 0x7ba   :  { %v1509_v51 = vmul.f32 %v4469_v50, %v4469_v50 }
 0x7bb   :  { %1874 = vmatpush.bf16.msra.mxu1 %v3481_v38  ;;  %v3397_v38 = vor.u32 %v3873_v35, %v3394_v23  ;;  %v3424_v35 = vld [vmem:[#allocation2 + $0x1c0] sm:$0xf]  ;;  %v3883_v23 = vld [vmem:[#allocation2 + $0x1d4] sm:$0xf0] }
 0x7bc   :  { %1512 = vadd.xlane.f32.xlu0 %v1509_v51  ;;  %v3458_v51 = vld [vmem:[#allocation2 + $0x228] sm:$0xf0] }
 0x7bd   :  { %v1500_v19 = vpop.xlane.xlu1 %1499 }
 0x7be   :  { %v1504_v34 = vmul.f32 %v1500_v19, %v4313_v14  ;;  %v3464_v19 = vld [vmem:[#allocation2 + $0x218] sm:$0xf] }
 0x7bf   :  { %1875 = vmatpush.bf16.msra.mxu1 %v3457_v18 }
 0x7c0   :  { %v4474_v52 = vsub.f32 %v1495_v40, %v1504_v34  ;;  %v3900_v40 = vld [vmem:[#allocation2 + $0x25c] sm:$0xf0]  ;;  %v3894_v34 = vld [vmem:[#allocation2 + $0x22c] sm:$0xf0] }
 0x7c1   :  { %v3489_v42 = vor.u32 %v3900_v40, %v3488_v62  ;;  %v3919_v62 = vld [vmem:[#allocation2 + $0x2f4] sm:$0xf0]  ;;  %v3916_v40 = vld [vmem:[#allocation2 + $0x2e4] sm:$0xf] }
 0x7c2   :  { %v1510_v56 = vmul.f32 %v4474_v52, %v4474_v52  ;;  %v3569_v41 = vor.u32 %v3919_v62, %v3568_v39  ;;  %v3880_v62 = vld [vmem:[#allocation2 + $0x1c4] sm:$0xf] }
 0x7c3   :  { %1910 = vmatpush.bf16.msra.mxu3 %v3489_v42  ;;  %1876 = vmatpush.bf16.msra.mxu1 %v3433_v60  ;;  %v3570_v42 = vld [vmem:[#allocation2 + $0x2f8] sm:$0xf0]  ;;  %v3496_v60 = vld [vmem:[#allocation2 + $0x250] sm:$0xf] }
 0x7c4   :  { %1514 = vadd.xlane.f32.xlu1 %v1510_v56  ;;  %v3461_v56 = vor.u32 %v3890_v49, %v3458_v51  ;;  %v3910_v49 = vld [vmem:[#allocation2 + $0x2b4] sm:$0xf] }
 0x7c5   :  { %v1502_v21 = vpop.xlane.xlu2 %1501 }
 0x7c6   :  { %v1505_v53 = vmul.f32 %v1502_v21, %v4313_v14  ;;  %v3465_v21 = vor.u32 %v3894_v34, %v3464_v19  ;;  %1893 = vmatpush.bf16.msra.mxu2 %v3461_v56  ;;  %v3545_v19 = vor.u32 %v3913_v47, %v3544_v46  ;;  %v3546_v34 = vld [vmem:[#allocation2 + $0x2c8] sm:$0xf0]  ;;  %v3400_v47 = vld [vmem:[#allocation2 + $0x190] sm:$0xf] }
 0x7c7   :  { %1877 = vmatpush.bf16.msra.mxu1 %v3409_v10 }
 0x7c8   :  { %v4479_v54 = vsub.f32 %v1496_v45, %v1505_v53  ;;  %v3493_v45 = vor.u32 %v3897_v43, %v3490_v44  ;;  %v3891_v53 = vld [vmem:[#allocation2 + $0x21c] sm:$0xf]  ;;  %1911 = vmatpush.bf16.msra.mxu3 %v3465_v21  ;;  %v3573_v44 = vor.u32 %v3916_v40, %v3570_v42  ;;  %v3549_v21 = vor.u32 %v3910_v49, %v3546_v34  ;;  %v3877_v49 = vld [vmem:[#allocation2 + $0x1a4] sm:$0xf0]  ;;  %v3874_v34 = vld [vmem:[#allocation2 + $0x194] sm:$0xf] }
 0x7c9   :  { %v3426_v40 = vld [vmem:[#allocation2 + $0x1d8] sm:$0xf0] }
 0x7ca   :  { %v1511_v55 = vmul.f32 %v4479_v54, %v4479_v54  ;;  %1928 = vmatpush.bf16.msrb.mxu0 %v3493_v45  ;;  %1894 = vmatpush.bf16.msra.mxu2 %v3437_v0  ;;  %v3498_v0 = vld [vmem:[#allocation2 + $0x268] sm:$0xf0]  ;;  %v3429_v46 = vor.u32 %v3880_v62, %v3426_v40 }
 0x7cb   :  { %1878 = vmatpush.bf16.msra.mxu1 %v3385_v28  ;;  %v3501_v22 = vor.u32 %v3898_v12, %v3498_v0  ;;  %v3889_v28 = vld [vmem:[#allocation2 + $0x204] sm:$0xf0] }
 0x7cc   :  { %1516 = vadd.xlane.f32.xlu2 %v1511_v55  ;;  %v3466_v55 = vld [vmem:[#allocation2 + $0x230] sm:$0xf0]  ;;  %1912 = vmatpush.bf16.msra.mxu3 %v3441_v1 }
 0x7cd   :  { %v3469_v57 = vor.u32 %v3891_v53, %v3466_v55  ;;  %v3520_v53 = vld [vmem:[#allocation2 + $0x280] sm:$0xf]  ;;  %v3907_v55 = vld [vmem:[#allocation2 + $0x294] sm:$0xf0] }
 0x7ce   :  { %1895 = vmatpush.bf16.msra.mxu2 %v3413_v3  ;;  %v3521_v48 = vor.u32 %v3907_v55, %v3520_v53  ;;  %v3895_v3 = vld [vmem:[#allocation2 + $0x234] sm:$0xf0]  ;;  %v3401_v53 = vor.u32 %v3877_v49, %v3400_v47 }
 0x7cf   :  { %1929 = vmatpush.bf16.msrb.mxu0 %v3469_v57  ;;  %1943 = vmatpush.bf16.msrb.mxu1 %v3569_v41 }
 0x7d0   :  { %1913 = vmatpush.bf16.msra.mxu3 %v3417_v15  ;;  %v3892_v15 = vld [vmem:[#allocation2 + $0x224] sm:$0xf] }
 0x7d2   :  { %1896 = vmatpush.bf16.msra.mxu2 %v3389_v31 }
 0x7d3   :  { %1930 = vmatpush.bf16.msrb.mxu0 %v3445_v5  ;;  %1944 = vmatpush.bf16.msrb.mxu1 %v3545_v19  ;;  %v3497_v5 = vor.u32 %v3901_v63, %v3496_v60 }
 0x7d4   :  { %1914 = vmatpush.bf16.msra.mxu3 %v3393_v36 }
 0x7d6   :  { %1961 = vmatpush.bf16.msrb.mxu2 %v3573_v44 }
 0x7d7   :  { %1931 = vmatpush.bf16.msrb.mxu0 %v3421_v24  ;;  %1945 = vmatpush.bf16.msrb.mxu1 %v3521_v48 }
 0x7da   :  { %1962 = vmatpush.bf16.msrb.mxu2 %v3549_v21 }
 0x7db   :  { %1932 = vmatpush.bf16.msrb.mxu0 %v3397_v38  ;;  %1946 = vmatpush.bf16.msrb.mxu1 %v3497_v5  ;;  %v1557_v38 = vperm.slane %v4462_v32, 1 }
 0x7de   :  { %1963 = vmatpush.bf16.msrb.mxu2 %v3525_v61 }
 0x7e2   :  { %1964 = vmatpush.bf16.msrb.mxu2 %v3501_v22 }
 0x82f   :  { %v1513_v9 = vpop.xlane.xlu0 %1512 }
 0x830   :  { %v1518_v20 = vmul.f32 %v1513_v9, %v4313_v14  ;;  %v3472_v9 = vld [vmem:[#allocation2 + $0x220] sm:$0xf] }
 0x831   :  { %v3473_v33 = vor.u32 %v3895_v3, %v3472_v9 }
 0x832   :  { %v4484_v27 = vadd.f32 1e-12, %v1518_v20  ;;  %v3474_v20 = vld [vmem:[#allocation2 + $0x238] sm:$0xf0] }
 0x833   :  { %v3477_v25 = vor.u32 %v3892_v15, %v3474_v20  ;;  %1947 = vmatpush.bf16.msrb.mxu1 %v3473_v33 }
 0x834   :  { %4030 = vrsqrt.f32 %v4484_v27  ;;  %vm1530_vm7 = vweird.f32 %v4484_v27 }
 0x835   :  { %1965 = vmatpush.bf16.msrb.mxu2 %v3477_v25 }
 0x837   :  { %v1515_v43 = vpop.xlane.xlu1 %1514 }
 0x838   :  { %v1519_v45 = vmul.f32 %v1515_v43, %v4313_v14  ;;  %v3425_v43 = vor.u32 %v3883_v23, %v3424_v35 }
 0x839   :  { %1966 = vmatpush.bf16.msrb.mxu2 %v3453_v17 }
 0x83a   :  { %v4031_v18 = vpop.eup %4030  ;;  %v4488_v51 = vadd.f32 1e-12, %v1519_v45 }
 0x83b   :  { %v1525_v56 = vmul.f32 %v4031_v18, %v4484_v27  ;;  %vm1531_vm6 = vweird.f32 %v4031_v18  ;;  %v3449_v27 = vor.u32 %v3889_v28, %v3448_v26 }
 0x83c   :  { %4032 = vrsqrt.f32 %v4488_v51  ;;  %vm4498_vm8 = vmor %vm1530_vm7, %vm1531_vm6  ;;  %vm1540_vm10 = vweird.f32 %v4488_v51 }
 0x83d   :  { %v1526_v57 = vmul.f32 %v4031_v18, %v1525_v56  ;;  %1948 = vmatpush.bf16.msrb.mxu1 %v3449_v27  ;;  %v3402_v56 = vld [vmem:[#allocation2 + $0x1a8] sm:$0xf0]  ;;  %1967 = vmatpush.bf16.msrb.mxu2 %v3429_v46 }
 0x83f   :  { %v1527_v1 = vmul.f32 0.5, %v1526_v57  ;;  %v1517_v2 = vpop.xlane.xlu2 %1516  ;;  %v3405_v57 = vor.u32 %v3874_v34, %v3402_v56 }
 0x840   :  { %v1520_v4 = vmul.f32 %v1517_v2, %v4313_v14 }
 0x841   :  { %v1528_v7 = vsub.f32 1.5, %v1527_v1  ;;  %1949 = vmatpush.bf16.msrb.mxu1 %v3425_v43  ;;  %1968 = vmatpush.bf16.msrb.mxu2 %v3405_v57 }
 0x842   :  { %v4033_v8 = vpop.eup %4032  ;;  %v4493_v10 = vadd.f32 1e-12, %v1520_v4 }
 0x843   :  { %v1529_v11 = vmul.f32 %v4031_v18, %v1528_v7  ;;  %v1535_v6 = vmul.f32 %v4033_v8, %v4488_v51  ;;  %vm1541_vm9 = vweird.f32 %v4033_v8 }
 0x844   :  { %4034 = vrsqrt.f32 %v4493_v10  ;;  %vm1542_vm13 = vmor %vm1540_vm10, %vm1541_vm9  ;;  %vm1550_vm15 = vweird.f32 %v4493_v10  ;;  %vm2911_vm9 = vcmask 189440  }
 0x845   :  { %v1536_v13 = vmul.f32 %v4033_v8, %v1535_v6  ;;  %v1533_v24 = vsel %vm4498_vm8, %v4031_v18, %v1529_v11  ;;  %v1561_v18 = vperm.slane %v4462_v32, 2  ;;  %1950 = vmatpush.bf16.msrb.mxu1 %v3401_v53  ;;  %v3381_v11 = vld [vmem:[%s4697_s6 + $0x1] ss:$2 sm:$0x3f] }
 0x846   :  { %v1554_v39 = vmul.f32 %v1533_v24, %v4469_v50  ;;  %v1619_v6 = vperm.slane %v3381_v11, 0  ;;  %v1621_v9 = vperm.slane %v3381_v11, 2  ;;  %v1622_v3 = vperm.slane %v3381_v11, 3 }
 0x847   :  { %v1537_v37 = vmul.f32 0.5, %v1536_v13  ;;  %v1620_v13 = vperm.slane %v3381_v11, 1 }
 0x848   :  { %v1558_v19 = vmul.f32 %v1557_v38, %v1554_v39 }
 0x849   :  { %v1538_v31 = vsub.f32 1.5, %v1537_v37 }
 0x84a   :  { %v4035_v36 = vpop.eup %4034  ;;  %v4510_v48 = vadd.f32 %v1561_v18, %v1558_v19 }
 0x84b   :  { %v1539_v41 = vmul.f32 %v4033_v8, %v1538_v31  ;;  %v1545_v42 = vmul.f32 %v4035_v36, %v4493_v10  ;;  %vm1551_vm14 = vweird.f32 %v4035_v36 }
 0x84c   :  { %vm1552_vm0 = vmor %vm1550_vm15, %vm1551_vm14 }
 0x84d   :  { %v1543_v44 = vsel %vm1542_vm13, %v4033_v8, %v1539_v41  ;;  %v1546_v45 = vmul.f32 %v4035_v36, %v1545_v42 }
 0x84e   :  { %v1555_v50 = vmul.f32 %v1543_v44, %v4474_v52 }
 0x84f   :  { %v1547_v21 = vmul.f32 0.5, %v1546_v45 }
 0x850   :  { %v1559_v51 = vmul.f32 %v1557_v38, %v1555_v50 }
 0x851   :  { %v1548_v55 = vsub.f32 1.5, %v1547_v21 }
 0x852   :  { %v4512_v58 = vadd.f32 %v1561_v18, %v1559_v51 }
 0x853   :  { %v1549_v59 = vmul.f32 %v4035_v36, %v1548_v55 }
 0x854   :  { %v1565_v32 = vpack.c.bf16 %v4512_v58, %v4510_v48 }
 0x855   :  { %v1553_v52 = vsel %vm1552_vm0, %v4035_v36, %v1549_v59 }
 0x856   :  { %1879 = vmatmul.bf16.vlgmr.msra.gmra.mxu1 %v1565_v32  ;;  %1897 = vmatmul.bf16.vlgmr.msra.gmra.mxu2 %v1565_v32  ;;  %v1556_v60 = vmul.f32 %v1553_v52, %v4479_v54 }
 0x857   :  { %1915 = vmatmul.bf16.vlgmr.msra.gmra.mxu3 %v1565_v32  ;;  %1933 = vmatmul.bf16.vlgmr.msrb.gmra.mxu0 %v1565_v32 }
 0x858   :  { %v1560_v61 = vmul.f32 %v1557_v38, %v1556_v60 }
 0x85a   :  { %v4518_v63 = vadd.f32 %v1561_v18, %v1560_v61  ;;  %v1624_v61 = vperm.slane %v3381_v11, 5 }
 0x85c   :  { %v1566_v12 = vpack.c.bf16 %v4518_v63, %v4518_v63 }
 0x866   :  { %1884 = vmatmul.bf16.gmra.mxu1 %v1566_v12  ;;  %1902 = vmatmul.bf16.gmra.mxu2 %v1566_v12 }
 0x867   :  { %1920 = vmatmul.bf16.gmra.mxu3 %v1566_v12  ;;  %1938 = vmatmul.bf16.gmra.mxu0 %v1566_v12 }
 0x876   :  { %1951 = vmatmul.bf16.vlgmr.msrb.gmra.mxu1 %v1565_v32  ;;  %1969 = vmatmul.bf16.vlgmr.msrb.gmra.mxu2 %v1565_v32 }
 0x886   :  { %1956 = vmatmul.bf16.gmra.mxu1 %v1566_v12  ;;  %1974 = vmatmul.bf16.gmra.mxu2 %v1566_v12  ;;  %v1623_v12 = vperm.slane %v3381_v11, 4 }
 0x8d3   :  { %v1880_v0 = vpop.f32.mrf.mxu1 }
 0x8d4   :  { %v1934_v1 = vpop.f32.mrf.mxu0  ;;  %v1881_v40 = vadd.f32 %v1880_v0, %v1619_v6 }
 0x8d5   :  { %v1935_v17 = vadd.f32 %v1934_v1, %v1622_v3 }
 0x8d9   :  { %v1898_v2 = vpop.f32.mrf.mxu2 }
 0x8da   :  { %v1916_v4 = vpop.f32.mrf.mxu3  ;;  %v1899_v23 = vadd.f32 %v1898_v2, %v1620_v13 }
 0x8db   :  { %v1882_v5 = vpop.f32.mrf.mxu1  ;;  %v1917_v28 = vadd.f32 %v1916_v4, %v1621_v9 }
 0x8dc   :  { %v1936_v54 = vpop.f32.mrf.mxu0  ;;  %v1883_v36 = vadd.f32 %v1882_v5, %v1619_v6  ;;  %v1979_v46 = vpack.c.bf16 %v1899_v23, %v1881_v40 }
 0x8dd   :  { %v1937_v27 = vadd.f32 %v1936_v54, %v1622_v3  ;;  %v1980_v41 = vpack.c.bf16 %v1935_v17, %v1917_v28 }
 0x8de   :  { %v1998_v56 = vunpack.c.h.b16 %v1979_v46  ;;  %v1991_v59 = vunpack.c.l.b16 %v1979_v46 }
 0x8df   :  { %v2067_v50 = vunpack.c.l.b16 %v1980_v41 }
 0x8e1   :  { %v1900_v7 = vpop.f32.mrf.mxu2 }
 0x8e2   :  { %v1918_v22 = vpop.f32.mrf.mxu3  ;;  %v1901_v29 = vadd.f32 %v1900_v7, %v1620_v13 }
 0x8e3   :  { %v1885_v8 = vpop.f32.mrf.mxu1  ;;  %v1919_v16 = vadd.f32 %v1918_v22, %v1621_v9 }
 0x8e4   :  { %v1939_v10 = vpop.f32.mrf.mxu0  ;;  %v1886_v33 = vadd.f32 %v1885_v8, %v1619_v6  ;;  %v1982_v42 = vpack.c.bf16 %v1901_v29, %v1883_v36 }
 0x8e5   :  { %v1940_v37 = vadd.f32 %v1939_v10, %v1622_v3  ;;  %v4527_v38 = vpack.c.bf16 %v1937_v27, %v1919_v16 }
 0x8e6   :  { %v1999_v34 = vunpack.c.h.b16 %v1982_v42  ;;  %v1992_v55 = vunpack.c.l.b16 %v1982_v42 }
 0x8e7   :  { %v2068_v47 = vunpack.c.l.b16 %v4527_v38  ;;  %v2101_v29 = vunpack.c.h.b16 %v4527_v38  ;;  %v4088_v38 = vld [vmem:[%s4694_s3 + $0x8] sm:$0xff] }
 0x8e8   :  { %v2001_v51 = vpack.c.b16 %v1999_v34, %v1998_v56  ;;  %v1994_v32 = vpack.c.b16 %v1992_v55, %v1991_v59 }
 0x8e9   :  { %v1903_v15 = vpop.f32.mrf.mxu2  ;;  %v2070_v21 = vpack.c.b16 %v2068_v47, %v2067_v50  ;;  %v4089_v47 = vld [vmem:[%s4694_s3 + $0x10] sm:$0xff] }
 0x8ea   :  { %v1904_v20 = vadd.f32 %v1903_v15, %v1620_v13  ;;  %v1921_v24 = vpop.f32.mrf.mxu3 }
 0x8eb   :  { %v1922_v25 = vadd.f32 %v1921_v24, %v1621_v9  ;;  %v1887_v26 = vpop.f32.mrf.mxu1 }
 0x8ec   :  { %v1985_v30 = vpack.c.bf16 %v1904_v20, %v1886_v33  ;;  %v1941_v31 = vpop.f32.mrf.mxu0 }
 0x8ed   :  { %v4525_v35 = vpack.c.bf16 %v1940_v37, %v1922_v25 }
 0x8ee   :  { %v2000_v39 = vunpack.c.h.b16 %v1985_v30  ;;  %v1993_v22 = vunpack.c.l.b16 %v1985_v30  ;;  %v2100_v30 = vunpack.c.h.b16 %v1980_v41 }
 0x8ef   :  { %v2069_v62 = vunpack.c.l.b16 %v4525_v35  ;;  %v2102_v17 = vunpack.c.h.b16 %v4525_v35 }
 0x8f0   :  { %v2002_v43 = vpack.c.b16 %v2000_v39, %v2000_v39  ;;  %v1995_v15 = vpack.c.b16 %v1993_v22, %v1993_v22  ;;  %v2103_v31 = vpack.c.b16 %v2101_v29, %v2100_v30 }
 0x8f1   :  { %v2071_v44 = vpack.c.b16 %v2069_v62, %v2069_v62  ;;  %v1905_v45 = vpop.f32.mrf.mxu2  ;;  %v2104_v23 = vpack.c.b16 %v2102_v17, %v2102_v17  ;;  %v4087_v62 = vld [vmem:[%s4694_s3] sm:$0xff] }
 0x8f2   :  { %v1923_v49 = vpop.f32.mrf.mxu3  ;;  %2011 = vmatpush.bf16.xpose.msrb.mxu3 %v2002_v43 }
 0x8f3   :  { %v1952_v18 = vpop.f32.mrf.mxu1  ;;  %v2080_v19 = vsel %vm760_vm11, %v2071_v44, 0 }
 0x8f4   :  { %2088 = vmatpush.bf16.msra.mxu0 %v2080_v19  ;;  %v1953_v10 = vadd.f32 %v1952_v18, %v1623_v12 }
 0x8f8   :  { %2089 = vmatpush.bf16.msra.mxu0 %v2070_v21 }
 0x8f9   :  { %v1970_v53 = vpop.f32.mrf.mxu2 }
 0x8fa   :  { %2012 = vmatpush.bf16.xpose.msrb.mxu3 %v2001_v51  ;;  %v1971_v5 = vadd.f32 %v1970_v53, %v1624_v61 }
 0x8fb   :  { %v1954_v57 = vpop.f32.mrf.mxu1 }
 0x8fc   :  { %v1955_v54 = vadd.f32 %v1954_v57, %v1623_v12  ;;  %v1981_v3 = vpack.c.bf16 %v1971_v5, %v1953_v10 }
 0x8fe   :  { %v2176_v37 = vunpack.c.h.b16 %v1981_v3  ;;  %v2110_v28 = vunpack.c.l.b16 %v1981_v3 }
 0x901   :  { %v1972_v52 = vpop.f32.mrf.mxu2  ;;  %2013 = vmatmul.bf16.vlgmr.msrb.gmra.mxu3 %v1994_v32 }
 0x902   :  { %v1973_v0 = vadd.f32 %v1972_v52, %v1624_v61 }
 0x903   :  { %v1957_v60 = vpop.f32.mrf.mxu1 }
 0x904   :  { %v1958_v2 = vadd.f32 %v1957_v60, %v1623_v12  ;;  %v1984_v6 = vpack.c.bf16 %v1973_v0, %v1955_v54 }
 0x906   :  { %v2177_v20 = vunpack.c.h.b16 %v1984_v6  ;;  %v2111_v25 = vunpack.c.l.b16 %v1984_v6 }
 0x908   :  { %v2179_v26 = vpack.c.b16 %v2177_v20, %v2176_v37  ;;  %v2113_v27 = vpack.c.b16 %v2111_v25, %v2110_v28 }
 0x909   :  { %v1975_v1 = vpop.f32.mrf.mxu2 }
 0x90a   :  { %v1976_v4 = vadd.f32 %v1975_v1, %v1624_v61 }
 0x90b   :  { %v1959_v7 = vpop.f32.mrf.mxu1 }
 0x90c   :  { %v1987_v8 = vpack.c.bf16 %v1976_v4, %v1958_v2 }
 0x90e   :  { %v2112_v13 = vunpack.c.l.b16 %v1987_v8  ;;  %v2178_v9 = vunpack.c.h.b16 %v1987_v8 }
 0x910   :  { %v2114_v16 = vpack.c.b16 %v2112_v13, %v2112_v13  ;;  %v2180_v33 = vpack.c.b16 %v2178_v9, %v2178_v9 }
 0x911   :  { %v1977_v24 = vpop.f32.mrf.mxu2  ;;  %2018 = vmatmul.bf16.gmra.mxu3 %v1995_v15 }
 0x912   :  { %2123 = vmatpush.bf16.xpose.msra.mxu1 %v2114_v16  ;;  %v2189_v11 = vsel %vm760_vm11, %v2180_v33, 0 }
 0x913   :  { %2197 = vmatpush.bf16.msra.mxu2 %v2189_v11 }
 0x917   :  { %2198 = vmatpush.bf16.msra.mxu2 %v2179_v26 }
 0x91a   :  { %2124 = vmatpush.bf16.xpose.msra.mxu1 %v2113_v27 }
 0x921   :  { %2125 = vmatmul.bf16.vlgmr.msra.gmra.mxu1 %v2103_v31 }
 0x931   :  { %2130 = vmatmul.bf16.gmra.mxu1 %v2104_v23 }
 0x984   :  { %v2014_v36 = vpop.f32.mrf.mxu3 }
 0x985   :  { %v2023_v39 = vmul.f32 0.125, %v2014_v36 }
 0x987   :  { %v2026_v40 = vadd.f32 %v4087_v62, %v2023_v39 }
 0x989   :  { %v2029_v42 = vsel %vm709_vm12, %v2026_v40, -inf }
 0x98a   :  { %2030 = vmax.xlane.f32.xlu0 %v2029_v42 }
 0x98c   :  { %v2016_v43 = vpop.f32.mrf.mxu3 }
 0x98d   :  { %v2024_v44 = vmul.f32 0.125, %v2016_v43 }
 0x98f   :  { %v2027_v41 = vadd.f32 %v4088_v38, %v2024_v44 }
 0x991   :  { %v2032_v35 = vsel %vm709_vm12, %v2027_v41, -inf }
 0x992   :  { %2033 = vmax.xlane.f32.xlu1 %v2032_v35 }
 0x994   :  { %v2019_v45 = vpop.f32.mrf.mxu3 }
 0x995   :  { %v2025_v46 = vmul.f32 0.125, %v2019_v45  ;;  %v3927_v45 = vld [vmem:[#allocation4 + $0xb8] sm:$0xff] }
 0x996   :  { %2343 = vmatpush.bf16.msra.mxu3 %v3927_v45 }
 0x997   :  { %v2028_v49 = vadd.f32 %v4089_v47, %v2025_v46  ;;  %v3926_v46 = vld [vmem:[#allocation4 + $0xb0] sm:$0xff] }
 0x999   :  { %v2035_v18 = vsel %vm709_vm12, %v2028_v49, -inf }
 0x99a   :  { %2036 = vmax.xlane.f32.xlu1 %v2035_v18  ;;  %2344 = vmatpush.bf16.msra.mxu3 %v3926_v46  ;;  %v3925_v18 = vld [vmem:[#allocation4 + $0xa8] sm:$0xff] }
 0x99c   :  { %v2021_v19 = vpop.f32.mrf.mxu3 }
 0x99e   :  { %v2126_v50 = vpop.f32.mrf.mxu1  ;;  %2345 = vmatpush.bf16.msra.mxu3 %v3925_v18 }
 0x99f   :  { %v2135_v34 = vmul.f32 0.125, %v2126_v50  ;;  %v3924_v50 = vld [vmem:[#allocation4 + $0xa0] sm:$0xff] }
 0x9a1   :  { %v2138_v56 = vadd.f32 %v4087_v62, %v2135_v34 }
 0x9a2   :  { %2346 = vmatpush.bf16.msra.mxu3 %v3924_v50 }
 0x9a3   :  { %v2141_v21 = vsel %vm709_vm12, %v2138_v56, -inf }
 0x9a4   :  { %2142 = vmax.xlane.f32.xlu2 %v2141_v21 }
 0x9a6   :  { %v2128_v51 = vpop.f32.mrf.mxu1 }
 0x9a7   :  { %v2136_v53 = vmul.f32 0.125, %v2128_v51 }
 0x9a9   :  { %v2139_v55 = vadd.f32 %v4088_v38, %v2136_v53 }
 0x9ab   :  { %v2144_v57 = vsel %vm709_vm12, %v2139_v55, -inf }
 0x9ac   :  { %2145 = vmax.xlane.f32.xlu0 %v2144_v57 }
 0x9ae   :  { %v2131_v59 = vpop.f32.mrf.mxu1 }
 0x9af   :  { %v2137_v32 = vmul.f32 0.125, %v2131_v59 }
 0x9b1   :  { %v2140_v52 = vadd.f32 %v4089_v47, %v2137_v32 }
 0x9b3   :  { %v2147_v60 = vsel %vm709_vm12, %v2140_v52, -inf }
 0x9b4   :  { %2148 = vmax.xlane.f32.xlu2 %v2147_v60  ;;  %v3921_v60 = vld [vmem:[#allocation4 + $0x88] sm:$0xff] }
 0x9b6   :  { %v2133_v61 = vpop.f32.mrf.mxu1 }
 0x9b7   :  { %v3920_v61 = vld [vmem:[#allocation4 + $0x80] sm:$0xff] }
 0x9fd   :  { %v2031_v12 = vpop.xlane.xlu0 %2030 }
 0x9fe   :  { %v2038_v0 = vsub.f32 %v2026_v40, %v2031_v12  ;;  %v3935_v12 = vld [vmem:[#allocation4 + $0xf8] sm:$0xff] }
 0x9ff   :  { %2361 = vmatpush.bf16.msrb.mxu0 %v3935_v12  ;;  %v3685_v12 = vld [vmem:[#allocation6 + $0xd0] sm:$0xf] }
 0xa00   :  { %v2041_v1 = vmul.f32 1.442695, %v2038_v0  ;;  %v3934_v0 = vld [vmem:[#allocation4 + $0xf0] sm:$0xff] }
 0xa02   :  { %4036 = vpow2.f32 %v2041_v1  ;;  %v3933_v1 = vld [vmem:[#allocation4 + $0xe8] sm:$0xff] }
 0xa03   :  { %2362 = vmatpush.bf16.msrb.mxu0 %v3934_v0  ;;  %v3947_v0 = vld [vmem:[#allocation6 + $0xd4] sm:$0xf0] }
 0xa05   :  { %v2034_v2 = vpop.xlane.xlu1 %2033 }
 0xa06   :  { %v2039_v4 = vsub.f32 %v2027_v41, %v2034_v2  ;;  %v3932_v2 = vld [vmem:[#allocation4 + $0xe0] sm:$0xff] }
 0xa07   :  { %2363 = vmatpush.bf16.msrb.mxu0 %v3933_v1  ;;  %v3946_v1 = vld [vmem:[#allocation6 + $0xd4] sm:$0xf] }
 0xa08   :  { %v4037_v5 = vpop.eup %4036  ;;  %v2043_v54 = vmul.f32 1.442695, %v2039_v4  ;;  %v3931_v4 = vld [vmem:[#allocation4 + $0xd8] sm:$0xff] }
 0xa09   :  { %v2047_v7 = vsel %vm709_vm12, %v4037_v5, 0.0 }
 0xa0a   :  { %4038 = vpow2.f32 %v2043_v54  ;;  %2048 = vadd.xlane.f32.xlu0 %v2047_v7  ;;  %v3929_v7 = vld [vmem:[#allocation4 + $0xc8] sm:$0xff] }
 0xa0b   :  { %2364 = vmatpush.bf16.msrb.mxu0 %v3932_v2  ;;  %v3686_v2 = vor.u32 %v3947_v0, %v3685_v12 }
 0xa0d   :  { %v2037_v22 = vpop.xlane.xlu1 %2036 }
 0xa0e   :  { %v2040_v8 = vsub.f32 %v2028_v49, %v2037_v22  ;;  %v3928_v22 = vld [vmem:[#allocation4 + $0xc0] sm:$0xff] }
 0xa0f   :  { %2365 = vmatpush.bf16.msrb.mxu0 %v3931_v4  ;;  %v3687_v4 = vld [vmem:[#allocation6 + $0xd8] sm:$0xf0] }
 0xa10   :  { %v4039_v10 = vpop.eup %4038  ;;  %v2045_v6 = vmul.f32 1.442695, %v2040_v8 }
 0xa11   :  { %v2050_v13 = vsel %vm709_vm12, %v4039_v10, 0.0 }
 0xa12   :  { %4040 = vpow2.f32 %v2045_v6  ;;  %2051 = vadd.xlane.f32.xlu1 %v2050_v13 }
 0xa17   :  { %v2143_v9 = vpop.xlane.xlu2 %2142 }
 0xa18   :  { %v4041_v3 = vpop.eup %4040  ;;  %v2150_v15 = vsub.f32 %v2138_v56, %v2143_v9 }
 0xa19   :  { %v2053_v16 = vsel %vm709_vm12, %v4041_v3, 0.0 }
 0xa1a   :  { %v2153_v33 = vmul.f32 1.442695, %v2150_v15  ;;  %2054 = vadd.xlane.f32.xlu1 %v2053_v16 }
 0xa1c   :  { %4042 = vpow2.f32 %v2153_v33 }
 0xa1f   :  { %v2146_v20 = vpop.xlane.xlu0 %2145 }
 0xa20   :  { %v2151_v24 = vsub.f32 %v2139_v55, %v2146_v20  ;;  %v3923_v55 = vld [vmem:[#allocation4 + $0x98] sm:$0xff] }
 0xa21   :  { %2347 = vmatpush.bf16.msra.mxu3 %v3923_v55 }
 0xa22   :  { %v4043_v11 = vpop.eup %4042  ;;  %v2155_v37 = vmul.f32 1.442695, %v2151_v24 }
 0xa23   :  { %v2159_v25 = vsel %vm709_vm12, %v4043_v11, 0.0 }
 0xa24   :  { %4044 = vpow2.f32 %v2155_v37  ;;  %2160 = vadd.xlane.f32.xlu2 %v2159_v25 }
 0xa27   :  { %v2149_v26 = vpop.xlane.xlu2 %2148 }
 0xa28   :  { %v2152_v28 = vsub.f32 %v2140_v52, %v2149_v26  ;;  %v3922_v52 = vld [vmem:[#allocation4 + $0x90] sm:$0xff]  ;;  %v4563_v26 = vld [vmem:[%s4696_s5 + $0x8] sm:$0xff] }
 0xa29   :  { %2348 = vmatpush.bf16.msra.mxu3 %v3922_v52 }
 0xa2a   :  { %v4045_v27 = vpop.eup %4044  ;;  %v2157_v29 = vmul.f32 1.442695, %v2152_v28  ;;  %v2246_v28 = vperm.slane %v4563_v26, 3 }
 0xa2b   :  { %v2162_v30 = vsel %vm709_vm12, %v4045_v27, 0.0 }
 0xa2c   :  { %4046 = vpow2.f32 %v2157_v29  ;;  %2163 = vadd.xlane.f32.xlu0 %v2162_v30 }
 0xa2d   :  { %2349 = vmatpush.bf16.msra.mxu3 %v3921_v60  ;;  %v3695_v60 = vld [vmem:[#allocation6 + $0xe8] sm:$0xf0] }
 0xa31   :  { %2350 = vmatpush.bf16.msra.mxu3 %v3920_v61 }
 0xa32   :  { %v4047_v31 = vpop.eup %4046 }
 0xa33   :  { %v2165_v17 = vsel %vm709_vm12, %v4047_v31, 0.0 }
 0xa34   :  { %2166 = vadd.xlane.f32.xlu2 %v2165_v17 }
 0xa7d   :  { %v2049_v23 = vpop.xlane.xlu0 %2048 }
 0xa7e   :  { %4048 = vrcp.f32 %v2049_v23 }
 0xa84   :  { %v4049_v39 = vpop.eup %4048 }
 0xa85   :  { %v2052_v36 = vpop.xlane.xlu1 %2051  ;;  %v2059_v40 = vmul.f32 %v4049_v39, %v4037_v5  ;;  %v3930_v5 = vld [vmem:[#allocation4 + $0xd0] sm:$0xff] }
 0xa86   :  { %4050 = vrcp.f32 %v2052_v36  ;;  %2366 = vmatpush.bf16.msrb.mxu0 %v3930_v5  ;;  %v3690_v5 = vor.u32 %v3946_v1, %v3687_v4 }
 0xa8a   :  { %2367 = vmatpush.bf16.msrb.mxu0 %v3929_v7  ;;  %v3945_v7 = vld [vmem:[#allocation6 + $0xc4] sm:$0xf0] }
 0xa8c   :  { %v4051_v62 = vpop.eup %4050 }
 0xa8d   :  { %v2060_v42 = vmul.f32 %v4051_v62, %v4039_v10  ;;  %v2055_v44 = vpop.xlane.xlu1 %2054 }
 0xa8e   :  { %4052 = vrcp.f32 %v2055_v44  ;;  %2368 = vmatpush.bf16.msrb.mxu0 %v3928_v22  ;;  %v3944_v22 = vld [vmem:[#allocation6 + $0xc4] sm:$0xf] }
 0xa8f   :  { %v2062_v43 = vpack.c.bf16 %v2060_v42, %v2059_v40 }
 0xa91   :  { %3574 = vmatmul.msk.bf16.vlgmr.msra.gmra.mxu0 %vm709_vm12, %v2062_v43 }
 0xa94   :  { %v4053_v38 = vpop.eup %4052 }
 0xa95   :  { %v2061_v41 = vmul.f32 %v4053_v38, %v4041_v3 }
 0xa97   :  { %v2161_v35 = vpop.xlane.xlu2 %2160  ;;  %v2063_v49 = vpack.c.bf16 %v2061_v41, %v2061_v41 }
 0xa98   :  { %4054 = vrcp.f32 %v2161_v35 }
 0xa9e   :  { %v4055_v19 = vpop.eup %4054 }
 0xa9f   :  { %v2164_v47 = vpop.xlane.xlu0 %2163  ;;  %v2171_v56 = vmul.f32 %v4055_v19, %v4043_v11 }
 0xaa0   :  { %4056 = vrcp.f32 %v2164_v47 }
 0xaa1   :  { %3575 = vmatmul.msk.bf16.gmra.mxu0 %vm709_vm12, %v2063_v49 }
 0xaa6   :  { %v4057_v34 = vpop.eup %4056 }
 0xaa7   :  { %v2172_v21 = vmul.f32 %v4057_v34, %v4045_v27  ;;  %v2167_v53 = vpop.xlane.xlu2 %2166  ;;  %v3701_v34 = vld [vmem:[#allocation6 + $0xf0] sm:$0xf] }
 0xaa8   :  { %4058 = vrcp.f32 %v2167_v53  ;;  %v3703_v53 = vld [vmem:[#allocation6 + $0xf8] sm:$0xf0] }
 0xaa9   :  { %v2174_v51 = vpack.c.bf16 %v2172_v21, %v2171_v56  ;;  %v3951_v56 = vld [vmem:[#allocation6 + $0xf4] sm:$0xf0]  ;;  %v3950_v21 = vld [vmem:[#allocation6 + $0xf4] sm:$0xf] }
 0xaaa   :  { %v3706_v55 = vor.u32 %v3950_v21, %v3703_v53 }
 0xaab   :  { %3576 = vmatmul.msk.bf16.vlgmr.msra.gmra.mxu2 %vm709_vm12, %v2174_v51  ;;  %v3702_v51 = vor.u32 %v3951_v56, %v3701_v34 }
 0xaac   :  { %2574 = vmatpush.bf16.msrb.mxu2 %v3706_v55 }
 0xaad   :  { %2556 = vmatpush.bf16.msrb.mxu1 %v3702_v51 }
 0xaae   :  { %v4059_v57 = vpop.eup %4058 }
 0xaaf   :  { %v2173_v59 = vmul.f32 %v4059_v57, %v4047_v31  ;;  %v3693_v57 = vld [vmem:[#allocation6 + $0xe0] sm:$0xf] }
 0xab1   :  { %v2175_v32 = vpack.c.bf16 %v2173_v59, %v2173_v59  ;;  %v3949_v59 = vld [vmem:[#allocation6 + $0xe4] sm:$0xf0] }
 0xab2   :  { %v3694_v52 = vor.u32 %v3949_v59, %v3693_v57 }
 0xab4   :  { %2557 = vmatpush.bf16.msrb.mxu1 %v3694_v52 }
 0xab8   :  { %2558 = vmatpush.bf16.msrb.mxu1 %v3686_v2 }
 0xabb   :  { %3577 = vmatmul.msk.bf16.gmra.mxu2 %vm709_vm12, %v2175_v32  ;;  %v3948_v32 = vld [vmem:[#allocation6 + $0xe4] sm:$0xf] }
 0xabc   :  { %v3698_v61 = vor.u32 %v3948_v32, %v3695_v60 }
 0xabe   :  { %2575 = vmatpush.bf16.msrb.mxu2 %v3698_v61  ;;  %v2442_v61 = vperm.slane %v4563_v26, 4 }
 0xac2   :  { %2576 = vmatpush.bf16.msrb.mxu2 %v3690_v5  ;;  %v2446_v5 = vperm.slane %v4563_v26, 5 }
 0xb0e   :  { %v2091_v54 = vpop.f32.mrf.mxu0 }
 0xb16   :  { %v2093_v8 = vpop.f32.mrf.mxu0 }
 0xb17   :  { %v2209_v10 = vpack.c.bf16 %v2093_v8, %v2091_v54  ;;  %v3677_v54 = vld [vmem:[#allocation6 + $0xc0] sm:$0xf] }
 0xb18   :  { %v3678_v8 = vor.u32 %v3945_v7, %v3677_v54 }
 0xb19   :  { %2351 = vmatmul.bf16.vlgmr.msra.gmra.mxu3 %v2209_v10  ;;  %v3679_v10 = vld [vmem:[#allocation6 + $0xc8] sm:$0xf0] }
 0xb1a   :  { %2559 = vmatpush.bf16.msrb.mxu1 %v3678_v8 }
 0xb1e   :  { %v2096_v6 = vpop.f32.mrf.mxu0 }
 0xb1f   :  { %v2211_v9 = vpack.c.bf16 %v2096_v6, %v2096_v6  ;;  %v3682_v6 = vor.u32 %v3944_v22, %v3679_v10 }
 0xb21   :  { %2577 = vmatpush.bf16.msrb.mxu2 %v3682_v6 }
 0xb26   :  { %v2098_v13 = vpop.f32.mrf.mxu0 }
 0xb27   :  { %v3669_v13 = vld [vmem:[#allocation6 + $0xb0] sm:$0xf] }
 0xb29   :  { %2356 = vmatmul.bf16.gmra.mxu3 %v2211_v9  ;;  %v3943_v9 = vld [vmem:[#allocation6 + $0xb4] sm:$0xf0] }
 0xb2e   :  { %v2200_v3 = vpop.f32.mrf.mxu2 }
 0xb36   :  { %v2202_v15 = vpop.f32.mrf.mxu2 }
 0xb37   :  { %v2210_v16 = vpack.c.bf16 %v2202_v15, %v2200_v3  ;;  %v3942_v3 = vld [vmem:[#allocation6 + $0xb4] sm:$0xf]  ;;  %v3670_v15 = vor.u32 %v3943_v9, %v3669_v13 }
 0xb39   :  { %2369 = vmatmul.bf16.vlgmr.msrb.gmra.mxu0 %v2210_v16  ;;  %v3671_v16 = vld [vmem:[#allocation6 + $0xb8] sm:$0xf0]  ;;  %2560 = vmatpush.bf16.msrb.mxu1 %v3670_v15 }
 0xb3e   :  { %v2205_v33 = vpop.f32.mrf.mxu2 }
 0xb3f   :  { %v2212_v24 = vpack.c.bf16 %v2205_v33, %v2205_v33  ;;  %v3674_v33 = vor.u32 %v3942_v3, %v3671_v16 }
 0xb41   :  { %2578 = vmatpush.bf16.msrb.mxu2 %v3674_v33 }
 0xb46   :  { %v2207_v20 = vpop.f32.mrf.mxu2 }
 0xb47   :  { %v3661_v20 = vld [vmem:[#allocation6 + $0xa0] sm:$0xf] }
 0xb49   :  { %2374 = vmatmul.bf16.gmra.mxu0 %v2212_v24  ;;  %v3941_v24 = vld [vmem:[#allocation6 + $0xa4] sm:$0xf0] }
 0xb9c   :  { %v2352_v11 = vpop.f32.mrf.mxu3 }
 0xb9d   :  { %v2353_v29 = vadd.f32 %v2352_v11, %v2246_v28  ;;  %v3940_v11 = vld [vmem:[#allocation6 + $0xa4] sm:$0xf] }
 0xba4   :  { %v2354_v37 = vpop.f32.mrf.mxu3 }
 0xba5   :  { %v2355_v23 = vadd.f32 %v2354_v37, %v2246_v28  ;;  %v3662_v37 = vor.u32 %v3941_v24, %v3661_v20  ;;  %v3959_v20 = vld [vmem:[#allocation7 + $0xb8] sm:$0xff]  ;;  %v3958_v24 = vld [vmem:[#allocation7 + $0xb0] sm:$0xff] }
 0xba6   :  { %2780 = vmatpush.bf16.msrb.mxu3 %v3959_v20 }
 0xba7   :  { %2561 = vmatpush.bf16.msrb.mxu1 %v3662_v37  ;;  %v3957_v37 = vld [vmem:[#allocation7 + $0xa8] sm:$0xff] }
 0xbaa   :  { %2781 = vmatpush.bf16.msrb.mxu3 %v3958_v24 }
 0xbac   :  { %v2357_v25 = vpop.f32.mrf.mxu3 }
 0xbad   :  { %v2358_v40 = vadd.f32 %v2357_v25, %v2246_v28  ;;  %v3663_v25 = vld [vmem:[#allocation6 + $0xa8] sm:$0xf0] }
 0xbae   :  { %v3666_v28 = vor.u32 %v3940_v11, %v3663_v25  ;;  %v3967_v11 = vld [vmem:[#allocation7 + $0xf8] sm:$0xff]  ;;  %2782 = vmatpush.bf16.msrb.mxu3 %v3957_v37  ;;  %v3966_v25 = vld [vmem:[#allocation7 + $0xf0] sm:$0xff] }
 0xbaf   :  { %2798 = vmatpush.bf16.msra.mxu0 %v3967_v11 }
 0xbb0   :  { %2579 = vmatpush.bf16.msrb.mxu2 %v3666_v28  ;;  %v3956_v28 = vld [vmem:[#allocation7 + $0xa0] sm:$0xff] }
 0xbb2   :  { %2783 = vmatpush.bf16.msrb.mxu3 %v3956_v28 }
 0xbb3   :  { %2799 = vmatpush.bf16.msra.mxu0 %v3966_v25 }
 0xbb4   :  { %v2359_v27 = vpop.f32.mrf.mxu3 }
 0xbb5   :  { %v3653_v27 = vld [vmem:[#allocation6 + $0x90] sm:$0xf] }
 0xbb6   :  { %v2370_v30 = vpop.f32.mrf.mxu0 }
 0xbb7   :  { %v2371_v31 = vadd.f32 %v2370_v30, %v2353_v29  ;;  %v3939_v29 = vld [vmem:[#allocation6 + $0x94] sm:$0xf0]  ;;  %v3938_v30 = vld [vmem:[#allocation6 + $0x94] sm:$0xf] }
 0xbb9   :  { %v2379_v17 = vadd.f32 %v2371_v31, %v4510_v48  ;;  %v3654_v31 = vor.u32 %v3939_v29, %v3653_v27  ;;  %v3955_v27 = vld [vmem:[#allocation7 + $0x98] sm:$0xff]  ;;  %v3964_v29 = vld [vmem:[#allocation7 + $0xe0] sm:$0xff] }
 0xbba   :  { %2784 = vmatpush.bf16.msrb.mxu3 %v3955_v27 }
 0xbbb   :  { %2382 = vadd.xlane.f32.xlu0 %v2379_v17  ;;  %2562 = vmatpush.bf16.msrb.mxu1 %v3654_v31  ;;  %v3963_v31 = vld [vmem:[#allocation7 + $0xd8] sm:$0xff] }
 0xbbe   :  { %v2372_v36 = vpop.f32.mrf.mxu0 }
 0xbbf   :  { %v2373_v39 = vadd.f32 %v2372_v36, %v2355_v23 }
 0xbc1   :  { %v2380_v62 = vadd.f32 %v2373_v39, %v4512_v58 }
 0xbc3   :  { %2384 = vadd.xlane.f32.xlu1 %v2380_v62 }
 0xbc6   :  { %v2375_v42 = vpop.f32.mrf.mxu0 }
 0xbc7   :  { %v2376_v43 = vadd.f32 %v2375_v42, %v2358_v40  ;;  %v3937_v40 = vld [vmem:[#allocation6 + $0x84] sm:$0xf0]  ;;  %v3936_v42 = vld [vmem:[#allocation6 + $0x84] sm:$0xf] }
 0xbc9   :  { %v2381_v44 = vadd.f32 %v2376_v43, %v4518_v63 }
 0xbcb   :  { %2386 = vadd.xlane.f32.xlu2 %v2381_v44 }
 0xbce   :  { %v2377_v38 = vpop.f32.mrf.mxu0 }
 0xbcf   :  { %v3647_v38 = vld [vmem:[#allocation6 + $0x88] sm:$0xf0] }
 0xc2e   :  { %v2383_v41 = vpop.xlane.xlu0 %2382 }
 0xc2f   :  { %v2388_v35 = vmul.f32 %v2383_v41, %v4313_v14  ;;  %v3650_v41 = vor.u32 %v3936_v42, %v3647_v38  ;;  %v3961_v42 = vld [vmem:[#allocation7 + $0xc8] sm:$0xff] }
 0xc31   :  { %v4570_v45 = vsub.f32 %v2379_v17, %v2388_v35  ;;  %v3655_v17 = vld [vmem:[#allocation6 + $0x98] sm:$0xf0] }
 0xc32   :  { %v3658_v36 = vor.u32 %v3938_v30, %v3655_v17  ;;  %v3954_v30 = vld [vmem:[#allocation7 + $0x90] sm:$0xff]  ;;  %v3642_v17 = vld [vmem:[%s4698_s7 + $0x1] ss:$2 sm:$0x3] }
 0xc33   :  { %v2394_v48 = vmul.f32 %v4570_v45, %v4570_v45  ;;  %2785 = vmatpush.bf16.msrb.mxu3 %v3954_v30 }
 0xc34   :  { %2580 = vmatpush.bf16.msrb.mxu2 %v3658_v36  ;;  %v3962_v36 = vld [vmem:[#allocation7 + $0xd0] sm:$0xff] }
 0xc35   :  { %2397 = vadd.xlane.f32.xlu0 %v2394_v48 }
 0xc36   :  { %v2385_v46 = vpop.xlane.xlu1 %2384 }
 0xc37   :  { %v2389_v58 = vmul.f32 %v2385_v46, %v4313_v14 }
 0xc38   :  { %2581 = vmatpush.bf16.msrb.mxu2 %v3650_v41  ;;  %v2473_v41 = vperm.slane %v3642_v17, 1 }
 0xc39   :  { %v4575_v47 = vsub.f32 %v2380_v62, %v2389_v58  ;;  %v3645_v62 = vld [vmem:[#allocation6 + $0x80] sm:$0xf] }
 0xc3b   :  { %v2395_v49 = vmul.f32 %v4575_v47, %v4575_v47 }
 0xc3d   :  { %2399 = vadd.xlane.f32.xlu1 %v2395_v49 }
 0xc3e   :  { %v2387_v63 = vpop.xlane.xlu2 %2386 }
 0xc3f   :  { %v2390_v18 = vmul.f32 %v2387_v63, %v4313_v14 }
 0xc41   :  { %v4580_v19 = vsub.f32 %v2381_v44, %v2390_v18  ;;  %v3646_v44 = vor.u32 %v3937_v40, %v3645_v62  ;;  %v3952_v62 = vld [vmem:[#allocation7 + $0x80] sm:$0xff] }
 0xc43   :  { %v2396_v50 = vmul.f32 %v4580_v19, %v4580_v19  ;;  %2563 = vmatpush.bf16.msrb.mxu1 %v3646_v44  ;;  %v3960_v44 = vld [vmem:[#allocation7 + $0xc0] sm:$0xff] }
 0xc45   :  { %2401 = vadd.xlane.f32.xlu2 %v2396_v50 }
 0xca8   :  { %v2398_v23 = vpop.xlane.xlu0 %2397 }
 0xca9   :  { %v2403_v39 = vmul.f32 %v2398_v23, %v4313_v14  ;;  %v3953_v23 = vld [vmem:[#allocation7 + $0x88] sm:$0xff] }
 0xcaa   :  { %2786 = vmatpush.bf16.msrb.mxu3 %v3953_v23 }
 0xcab   :  { %v2406_v43 = vadd.f32 1e-12, %v2403_v39  ;;  %v2472_v39 = vperm.slane %v3642_v17, 0 }
 0xcad   :  { %4060 = vrsqrt.f32 %v2406_v43  ;;  %vm2415_vm1 = vweird.f32 %v2406_v43 }
 0xcae   :  { %2787 = vmatpush.bf16.msrb.mxu3 %v3952_v62 }
 0xcb0   :  { %v2400_v35 = vpop.xlane.xlu1 %2399 }
 0xcb1   :  { %v2404_v48 = vmul.f32 %v2400_v35, %v4313_v14 }
 0xcb3   :  { %v4061_v46 = vpop.eup %4060  ;;  %v2407_v58 = vadd.f32 1e-12, %v2404_v48 }
 0xcb4   :  { %v2410_v49 = vmul.f32 %v4061_v46, %v2406_v43  ;;  %vm2416_vm11 = vweird.f32 %v4061_v46 }
 0xcb5   :  { %4062 = vrsqrt.f32 %v2407_v58  ;;  %vm2417_vm2 = vmor %vm2415_vm1, %vm2416_vm11  ;;  %vm2425_vm4 = vweird.f32 %v2407_v58 }
 0xcb6   :  { %v2411_v63 = vmul.f32 %v4061_v46, %v2410_v49 }
 0xcb8   :  { %v2412_v18 = vmul.f32 0.5, %v2411_v63  ;;  %v2402_v50 = vpop.xlane.xlu2 %2401 }
 0xcb9   :  { %v2405_v34 = vmul.f32 %v2402_v50, %v4313_v14 }
 0xcba   :  { %v2413_v56 = vsub.f32 1.5, %v2412_v18 }
 0xcbb   :  { %v4063_v21 = vpop.eup %4062  ;;  %v2408_v51 = vadd.f32 1e-12, %v2405_v34 }
 0xcbc   :  { %v2414_v53 = vmul.f32 %v4061_v46, %v2413_v56  ;;  %v2420_v55 = vmul.f32 %v4063_v21, %v2407_v58  ;;  %vm2426_vm3 = vweird.f32 %v4063_v21 }
 0xcbd   :  { %4064 = vrsqrt.f32 %v2408_v51  ;;  %vm2427_vm5 = vmor %vm2425_vm4, %vm2426_vm3  ;;  %vm2435_vm7 = vweird.f32 %v2408_v51 }
 0xcbe   :  { %v2421_v57 = vmul.f32 %v4063_v21, %v2420_v55  ;;  %v2418_v59 = vsel %vm2417_vm2, %v4061_v46, %v2414_v53 }
 0xcbf   :  { %v2439_v12 = vmul.f32 %v2418_v59, %v4570_v45 }
 0xcc0   :  { %v2422_v32 = vmul.f32 0.5, %v2421_v57 }
 0xcc1   :  { %v2443_v54 = vmul.f32 %v2442_v61, %v2439_v12 }
 0xcc2   :  { %v2423_v52 = vsub.f32 1.5, %v2422_v32 }
 0xcc3   :  { %v4065_v60 = vpop.eup %4064  ;;  %v4591_v6 = vadd.f32 %v2446_v5, %v2443_v54 }
 0xcc4   :  { %v2424_v0 = vmul.f32 %v4063_v21, %v2423_v52  ;;  %v2430_v1 = vmul.f32 %v4065_v60, %v2408_v51  ;;  %vm2436_vm6 = vweird.f32 %v4065_v60 }
 0xcc5   :  { %vm2437_vm8 = vmor %vm2435_vm7, %vm2436_vm6 }
 0xcc6   :  { %v2428_v2 = vsel %vm2427_vm5, %v4063_v21, %v2424_v0  ;;  %v2431_v4 = vmul.f32 %v4065_v60, %v2430_v1 }
 0xcc7   :  { %v2440_v7 = vmul.f32 %v2428_v2, %v4575_v47 }
 0xcc8   :  { %v2432_v22 = vmul.f32 0.5, %v2431_v4 }
 0xcc9   :  { %v2444_v8 = vmul.f32 %v2442_v61, %v2440_v7 }
 0xcca   :  { %v2433_v10 = vsub.f32 1.5, %v2432_v22 }
 0xccb   :  { %v4593_v13 = vadd.f32 %v2446_v5, %v2444_v8 }
 0xccc   :  { %v2434_v45 = vmul.f32 %v4065_v60, %v2433_v10 }
 0xccd   :  { %v2450_v9 = vpack.c.bf16 %v4593_v13, %v4591_v6 }
 0xcce   :  { %v2438_v3 = vsel %vm2437_vm8, %v4065_v60, %v2434_v45 }
 0xccf   :  { %2564 = vmatmul.bf16.vlgmr.msrb.gmra.mxu1 %v2450_v9  ;;  %2582 = vmatmul.bf16.vlgmr.msrb.gmra.mxu2 %v2450_v9  ;;  %v2441_v15 = vmul.f32 %v2438_v3, %v4580_v19  ;;  %v3965_v19 = vld [vmem:[#allocation7 + $0xe8] sm:$0xff] }
 0xcd0   :  { %2800 = vmatpush.bf16.msra.mxu0 %v3965_v19 }
 0xcd1   :  { %v2445_v47 = vmul.f32 %v2442_v61, %v2441_v15 }
 0xcd3   :  { %v4598_v16 = vadd.f32 %v2446_v5, %v2445_v47 }
 0xcd4   :  { %2801 = vmatpush.bf16.msra.mxu0 %v3964_v29 }
 0xcd5   :  { %v2451_v33 = vpack.c.bf16 %v4598_v16, %v4598_v16 }
 0xcd8   :  { %2802 = vmatpush.bf16.msra.mxu0 %v3963_v31 }
 0xcdc   :  { %2803 = vmatpush.bf16.msra.mxu0 %v3962_v36 }
 0xcdf   :  { %2569 = vmatmul.bf16.gmra.mxu1 %v2451_v33  ;;  %2587 = vmatmul.bf16.gmra.mxu2 %v2451_v33 }
 0xce0   :  { %2804 = vmatpush.bf16.msra.mxu0 %v3961_v42 }
 0xce4   :  { %2805 = vmatpush.bf16.msra.mxu0 %v3960_v44 }
 0xd4c   :  { %v2565_v40 = vpop.f32.mrf.mxu1 }
 0xd4d   :  { %v2566_v43 = vadd.f32 %v2565_v40, %v2472_v39 }
 0xd4f   :  { %v2598_v38 = vmul.f32 0.044715, %v2566_v43  ;;  %v2592_v11 = vmul.f32 0.5, %v2566_v43 }
 0xd51   :  { %v2604_v35 = vmul.f32 %v2598_v38, %v2566_v43 }
 0xd52   :  { %v2583_v48 = vpop.f32.mrf.mxu2 }
 0xd53   :  { %v2610_v46 = vmul.f32 %v2604_v35, %v2566_v43  ;;  %v2584_v58 = vadd.f32 %v2583_v48, %v2473_v41 }
 0xd54   :  { %v2567_v49 = vpop.f32.mrf.mxu1 }
 0xd55   :  { %v2616_v63 = vadd.f32 %v2610_v46, %v2566_v43  ;;  %v2599_v18 = vmul.f32 0.044715, %v2584_v58  ;;  %v2568_v50 = vadd.f32 %v2567_v49, %v2472_v39  ;;  %v2593_v40 = vmul.f32 0.5, %v2584_v58 }
 0xd57   :  { %v2605_v34 = vmul.f32 %v2599_v18, %v2584_v58  ;;  %v2600_v56 = vmul.f32 0.044715, %v2568_v50  ;;  %v2622_v21 = vmul.f32 0.7978846, %v2616_v63  ;;  %v2594_v37 = vmul.f32 0.5, %v2568_v50 }
 0xd59   :  { %v2611_v51 = vmul.f32 %v2605_v34, %v2584_v58  ;;  %v2606_v53 = vmul.f32 %v2600_v56, %v2568_v50  ;;  %4066 = vtanh.f32 %v2622_v21 }
 0xd5a   :  { %v2585_v55 = vpop.f32.mrf.mxu2 }
 0xd5b   :  { %v2617_v57 = vadd.f32 %v2611_v51, %v2584_v58  ;;  %v2612_v59 = vmul.f32 %v2606_v53, %v2568_v50  ;;  %v2586_v32 = vadd.f32 %v2585_v55, %v2473_v41  ;;  %v2683_v58 = vperm.slane %v4563_v26, 6 }
 0xd5c   :  { %v2570_v52 = vpop.f32.mrf.mxu1 }
 0xd5d   :  { %v2618_v60 = vadd.f32 %v2612_v59, %v2568_v50  ;;  %v2601_v61 = vmul.f32 0.044715, %v2586_v32  ;;  %v2571_v12 = vadd.f32 %v2570_v52, %v2472_v39  ;;  %v2623_v0 = vmul.f32 0.7978846, %v2617_v57 }
 0xd5e   :  { %v2595_v42 = vmul.f32 0.5, %v2586_v32 }
 0xd5f   :  { %v2624_v1 = vmul.f32 0.7978846, %v2618_v60  ;;  %v2607_v2 = vmul.f32 %v2601_v61, %v2586_v32  ;;  %v2602_v4 = vmul.f32 0.044715, %v2571_v12  ;;  %v4067_v22 = vpop.eup %4066  ;;  %v2596_v46 = vmul.f32 0.5, %v2571_v12 }
 0xd60   :  { %v2634_v47 = vadd.f32 1.0, %v4067_v22 }
 0xd61   :  { %4068 = vtanh.f32 %v2624_v1  ;;  %v2613_v5 = vmul.f32 %v2607_v2, %v2586_v32  ;;  %v2608_v54 = vmul.f32 %v2602_v4, %v2571_v12 }
 0xd62   :  { %v2588_v7 = vpop.f32.mrf.mxu2  ;;  %4070 = vtanh.f32 %v2623_v0  ;;  %v2640_v30 = vmul.f32 %v2634_v47, %v2592_v11 }
 0xd63   :  { %v2619_v8 = vadd.f32 %v2613_v5, %v2586_v32  ;;  %v2589_v10 = vadd.f32 %v2588_v7, %v2473_v41  ;;  %v2614_v9 = vmul.f32 %v2608_v54, %v2571_v12 }
 0xd64   :  { %v2572_v45 = vpop.f32.mrf.mxu1 }
 0xd65   :  { %v2625_v3 = vmul.f32 0.7978846, %v2619_v8  ;;  %v2603_v15 = vmul.f32 0.044715, %v2589_v10  ;;  %v2620_v33 = vadd.f32 %v2614_v9, %v2571_v12  ;;  %v2597_v34 = vmul.f32 0.5, %v2589_v10 }
 0xd67   :  { %v4069_v20 = vpop.eup %4068  ;;  %4072 = vtanh.f32 %v2625_v3  ;;  %v2609_v24 = vmul.f32 %v2603_v15, %v2589_v10  ;;  %v2626_v28 = vmul.f32 0.7978846, %v2620_v33 }
 0xd68   :  { %v2636_v25 = vadd.f32 1.0, %v4069_v20  ;;  %v4071_v19 = vpop.eup %4070  ;;  %v4623_v20 = vld [vmem:[%s4695_s4] sm:$0x3] }
 0xd69   :  { %v2615_v27 = vmul.f32 %v2609_v24, %v2589_v10  ;;  %4074 = vtanh.f32 %v2626_v28  ;;  %v2635_v23 = vadd.f32 1.0, %v4071_v19  ;;  %v2912_v24 = vsel %vm2911_vm9, %v4623_v20, 0.0 }
 0xd6a   :  { %v2590_v29 = vpop.f32.mrf.mxu2  ;;  %v2642_v31 = vmul.f32 %v2636_v25, %v2594_v37 }
 0xd6b   :  { %v2621_v17 = vadd.f32 %v2615_v27, %v2589_v10  ;;  %v2641_v38 = vmul.f32 %v2635_v23, %v2593_v40  ;;  %v2946_v23 = vld [vmem:[%s4704_s13 + $0x78] sm:$0xff] }
 0xd6c   :  { %v2646_v36 = vpack.c.bf16 %v2642_v31, %v2640_v30  ;;  %2948 = vmatpush.msra.mxu2 %v2946_v23 }
 0xd6d   :  { %v4073_v39 = vpop.eup %4072  ;;  %v2627_v62 = vmul.f32 0.7978846, %v2621_v17 }
 0xd6e   :  { %v2637_v44 = vadd.f32 1.0, %v4073_v39  ;;  %2788 = vmatmul.bf16.vlgmr.msrb.gmra.mxu3 %v2646_v36  ;;  %v2945_v36 = vld [vmem:[%s4704_s13 + $0x70] sm:$0xff] }
 0xd6f   :  { %v4075_v41 = vpop.eup %4074  ;;  %4076 = vtanh.f32 %v2627_v62  ;;  %2949 = vmatpush.msra.mxu2 %v2945_v36 }
 0xd70   :  { %v2643_v43 = vmul.f32 %v2637_v44, %v2595_v42  ;;  %v2638_v48 = vadd.f32 1.0, %v4075_v41  ;;  %v2944_v44 = vld [vmem:[%s4704_s13 + $0x68] sm:$0xff] }
 0xd71   :  { %2950 = vmatpush.msra.mxu2 %v2944_v44 }
 0xd72   :  { %v2647_v35 = vpack.c.bf16 %v2643_v43, %v2641_v38  ;;  %v2644_v63 = vmul.f32 %v2638_v48, %v2596_v46  ;;  %v2943_v38 = vld [vmem:[%s4704_s13 + $0x60] sm:$0xff] }
 0xd73   :  { %2951 = vmatpush.msra.mxu2 %v2943_v38 }
 0xd74   :  { %2806 = vmatmul.bf16.vlgmr.msra.gmra.mxu0 %v2647_v35  ;;  %v2648_v50 = vpack.c.bf16 %v2644_v63, %v2644_v63  ;;  %v2942_v35 = vld [vmem:[%s4704_s13 + $0x58] sm:$0xff] }
 0xd75   :  { %v4077_v49 = vpop.eup %4076  ;;  %2952 = vmatpush.msra.mxu2 %v2942_v35 }
 0xd76   :  { %v2639_v18 = vadd.f32 1.0, %v4077_v49 }
 0xd78   :  { %v2645_v56 = vmul.f32 %v2639_v18, %v2597_v34 }
 0xd7a   :  { %v2649_v21 = vpack.c.bf16 %v2645_v56, %v2645_v56 }
 0xd7e   :  { %2793 = vmatmul.bf16.gmra.mxu3 %v2648_v50 }
 0xd84   :  { %2811 = vmatmul.bf16.gmra.mxu0 %v2649_v21 }
 0xdf1   :  { %v2789_v51 = vpop.f32.mrf.mxu3  ;;  %v2807_v53 = vpop.f32.mrf.mxu0 }
 0xdf2   :  { %v2790_v55 = vadd.f32 %v2789_v51, %v2683_v58 }
 0xdf4   :  { %v2808_v57 = vadd.f32 %v2807_v53, %v2790_v55 }
 0xdf6   :  { %v2816_v59 = vadd.f32 %v2808_v57, %v4591_v6 }
 0xdf8   :  { %2819 = vadd.xlane.f32.xlu2 %v2816_v59 }
 0xdf9   :  { %v2791_v32 = vpop.f32.mrf.mxu3  ;;  %v2809_v52 = vpop.f32.mrf.mxu0 }
 0xdfa   :  { %v2792_v60 = vadd.f32 %v2791_v32, %v2683_v58  ;;  %v2879_v32 = vperm.slane %v4563_v26, 7  ;;  %v2941_v26 = vld [vmem:[%s4704_s13 + $0x50] sm:$0xff] }
 0xdfb   :  { %2953 = vmatpush.msra.mxu2 %v2941_v26 }
 0xdfc   :  { %v2810_v61 = vadd.f32 %v2809_v52, %v2792_v60 }
 0xdfe   :  { %v2817_v12 = vadd.f32 %v2810_v61, %v4593_v13  ;;  %v3979_v61 = vld [vmem:[%s4696_s5 + $0x10] ss:$0 sm:$0xff] }
 0xe00   :  { %2821 = vadd.xlane.f32.xlu1 %v2817_v12 }
 0xe01   :  { %v2794_v0 = vpop.f32.mrf.mxu3  ;;  %v2812_v1 = vpop.f32.mrf.mxu0 }
 0xe02   :  { %v2795_v2 = vadd.f32 %v2794_v0, %v2683_v58 }
 0xe04   :  { %v2813_v4 = vadd.f32 %v2812_v1, %v2795_v2 }
 0xe06   :  { %v2818_v5 = vadd.f32 %v2813_v4, %v4598_v16 }
 0xe08   :  { %2823 = vadd.xlane.f32.xlu0 %v2818_v5 }
 0xe09   :  { %v2796_v54 = vpop.f32.mrf.mxu3  ;;  %v2814_v7 = vpop.f32.mrf.mxu0 }
 0xe0a   :  { %v2939_v54 = vld [vmem:[%s4704_s13 + $0x40] sm:$0xff]  ;;  %v2938_v7 = vld [vmem:[%s4704_s13 + $0x38] sm:$0xff] }
 0xe6b   :  { %v2820_v22 = vpop.xlane.xlu2 %2819 }
 0xe6c   :  { %v2825_v6 = vmul.f32 %v2820_v22, %v4313_v14  ;;  %v2937_v22 = vld [vmem:[%s4704_s13 + $0x30] sm:$0xff] }
 0xe6e   :  { %v4610_v8 = vsub.f32 %v2816_v59, %v2825_v6  ;;  %v2936_v6 = vld [vmem:[%s4704_s13 + $0x28] sm:$0xff] }
 0xe70   :  { %v2831_v10 = vmul.f32 %v4610_v8, %v4610_v8 }
 0xe72   :  { %2834 = vadd.xlane.f32.xlu2 %v2831_v10  ;;  %v2934_v10 = vld [vmem:[%s4704_s13 + $0x18] sm:$0xff] }
 0xe73   :  { %v2822_v13 = vpop.xlane.xlu1 %2821 }
 0xe74   :  { %v2826_v45 = vmul.f32 %v2822_v13, %v4313_v14  ;;  %v2933_v13 = vld [vmem:[%s4704_s13 + $0x10] sm:$0xff] }
 0xe76   :  { %v4615_v9 = vsub.f32 %v2817_v12, %v2826_v45 }
 0xe78   :  { %v2832_v16 = vmul.f32 %v4615_v9, %v4615_v9 }
 0xe7a   :  { %2836 = vadd.xlane.f32.xlu1 %v2832_v16  ;;  %v2932_v16 = vld [vmem:[%s4704_s13 + $0x8] sm:$0xff] }
 0xe7b   :  { %v2824_v3 = vpop.xlane.xlu0 %2823 }
 0xe7c   :  { %v2827_v15 = vmul.f32 %v2824_v3, %v4313_v14  ;;  %v2931_v3 = vld [vmem:[%s4704_s13] sm:$0xff] }
 0xe7e   :  { %v2830_v47 = vsub.f32 %v2818_v5, %v2827_v15  ;;  %v2940_v5 = vld [vmem:[%s4704_s13 + $0x48] sm:$0xff] }
 0xe7f   :  { %2954 = vmatpush.msra.mxu2 %v2940_v5 }
 0xe80   :  { %v2833_v33 = vmul.f32 %v2830_v47, %v2830_v47 }
 0xe81   :  { %2955 = vmatpush.msra.mxu2 %v2939_v54 }
 0xe82   :  { %2838 = vadd.xlane.f32.xlu0 %v2833_v33 }
 0xe83   :  { %2956 = vmatpush.msra.mxu2 %v2938_v7 }
 0xe85   :  { %2957 = vmatpush.msra.mxu2 %v2937_v22 }
 0xe87   :  { %2958 = vmatpush.msra.mxu2 %v2936_v6 }
 0xe8a   :  { %2913 = vadd.xlane.f32.xlu0 %v2912_v24 }
 0xee5   :  { %v2835_v11 = vpop.xlane.xlu2 %2834 }
 0xee6   :  { %v2840_v37 = vmul.f32 %v2835_v11, %v4313_v14 }
 0xee8   :  { %v2843_v25 = vadd.f32 1e-12, %v2840_v37 }
 0xeea   :  { %4078 = vrsqrt.f32 %v2843_v25  ;;  %vm2852_vm0 = vweird.f32 %v2843_v25 }
 0xeed   :  { %v2837_v28 = vpop.xlane.xlu1 %2836 }
 0xeee   :  { %v2841_v19 = vmul.f32 %v2837_v28, %v4313_v14 }
 0xef0   :  { %v2844_v27 = vadd.f32 1e-12, %v2841_v19  ;;  %v4079_v29 = vpop.eup %4078 }
 0xef1   :  { %v2847_v30 = vmul.f32 %v4079_v29, %v2843_v25  ;;  %vm2853_vm13 = vweird.f32 %v4079_v29 }
 0xef2   :  { %4080 = vrsqrt.f32 %v2844_v27  ;;  %vm2862_vm14 = vweird.f32 %v2844_v27  ;;  %vm2854_vm1 = vmor %vm2852_vm0, %vm2853_vm13 }
 0xef3   :  { %v2848_v40 = vmul.f32 %v4079_v29, %v2847_v30  ;;  %v4091_v30 = vld [vmem:[%s4696_s5] sm:$0xff] }
 0xef5   :  { %v2839_v31 = vpop.xlane.xlu0 %2838  ;;  %v2849_v43 = vmul.f32 0.5, %v2848_v40 }
 0xef6   :  { %v2842_v17 = vmul.f32 %v2839_v31, %v4313_v14  ;;  %v2947_v31 = vperm.slane %v4091_v30, 4 }
 0xef7   :  { %v2850_v49 = vsub.f32 1.5, %v2849_v43 }
 0xef8   :  { %v4081_v39 = vpop.eup %4080  ;;  %v2845_v62 = vadd.f32 1e-12, %v2842_v17 }
 0xef9   :  { %v2857_v42 = vmul.f32 %v4081_v39, %v2844_v27  ;;  %vm2863_vm10 = vweird.f32 %v4081_v39  ;;  %v2851_v34 = vmul.f32 %v4079_v29, %v2850_v49 }
 0xefa   :  { %4082 = vrsqrt.f32 %v2845_v62  ;;  %vm2864_vm15 = vmor %vm2862_vm14, %vm2863_vm10  ;;  %vm2872_vm2 = vweird.f32 %v2845_v62 }
 0xefb   :  { %v2858_v14 = vmul.f32 %v4081_v39, %v2857_v42  ;;  %v2855_v51 = vsel %vm2854_vm1, %v4079_v29, %v2851_v34 }
 0xefc   :  { %v2876_v52 = vmul.f32 %v2855_v51, %v4610_v8  ;;  %v2935_v8 = vld [vmem:[%s4704_s13 + $0x20] sm:$0xff] }
 0xefd   :  { %v2859_v41 = vmul.f32 0.5, %v2858_v14  ;;  %2959 = vmatpush.msra.mxu2 %v2935_v8  ;;  %v2914_v45 = vpop.xlane.xlu0 %2913 }
 0xefe   :  { %v2880_v1 = vmul.f32 %v2879_v32, %v2876_v52 }
 0xeff   :  { %v2860_v48 = vsub.f32 1.5, %v2859_v41  ;;  %2960 = vmatpush.msra.mxu2 %v2934_v10 }
 0xf00   :  { %v4083_v46 = vpop.eup %4082  ;;  %v2884_v4 = vadd.f32 %v3979_v61, %v2880_v1 }
 0xf01   :  { %v2867_v63 = vmul.f32 %v4083_v46, %v2845_v62  ;;  %v2861_v18 = vmul.f32 %v4081_v39, %v2860_v48  ;;  %vm2873_vm11 = vweird.f32 %v4083_v46  ;;  %2961 = vmatpush.msra.mxu2 %v2933_v13 }
 0xf02   :  { %vm2874_vm3 = vmor %vm2872_vm2, %vm2873_vm11 }
 0xf03   :  { %v2868_v50 = vmul.f32 %v4083_v46, %v2867_v63  ;;  %v2865_v21 = vsel %vm2864_vm15, %v4081_v39, %v2861_v18  ;;  %2962 = vmatpush.msra.mxu2 %v2932_v16 }
 0xf04   :  { %v2877_v55 = vmul.f32 %v2865_v21, %v4615_v9  ;;  %v2915_v9 = vmax.f32 %v2914_v45, 1e-09 }
 0xf05   :  { %v2869_v56 = vmul.f32 0.5, %v2868_v50  ;;  %2963 = vmatpush.msra.mxu2 %v2931_v3 }
 0xf06   :  { %v2881_v12 = vmul.f32 %v2879_v32, %v2877_v55  ;;  %4084 = vrcp.f32 %v2915_v9  ;;  %v2927_v24 = vand.u32 2147483648, %v2915_v9  ;;  %v2925_v37 = vand.u32 2147483647, %v2915_v9 }
 0xf07   :  { %v2870_v58 = vsub.f32 1.5, %v2869_v56 }
 0xf08   :  { %v2885_v2 = vadd.f32 %v3979_v61, %v2881_v12  ;;  %v2928_v25 = vor.u32 1.1754944e-38, %v2927_v24  ;;  %vm2926_vm6 = vcmp.eq.f32.partialorder %v2925_v37, 8.507059e+37 }
 0xf09   :  { %v2871_v53 = vmul.f32 %v4083_v46, %v2870_v58 }
 0xf0b   :  { %v2875_v57 = vsel %vm2874_vm3, %v4083_v46, %v2871_v53 }
 0xf0c   :  { %v2878_v59 = vmul.f32 %v2875_v57, %v2830_v47  ;;  %v4085_v15 = vpop.eup %4084 }
 0xf0d   :  { %v2917_v47 = vmul.f32 %v4085_v15, %v2915_v9  ;;  %vm2922_vm4 = vweird.f32 %v4085_v15 }
 0xf0e   :  { %v2882_v60 = vmul.f32 %v2879_v32, %v2878_v59 }
 0xf0f   :  { %v2918_v33 = vsub.f32 1.0, %v2917_v47 }
 0xf10   :  { %v2886_v0 = vadd.f32 %v3979_v61, %v2882_v60 }
 0xf12   :  { %2904 = vmatpush.msra.mxu1 %v2886_v0 }
 0xf14   :  { %2905 = vmatpush.msra.mxu1 %v2885_v2 }
 0xf16   :  { %2906 = vmatpush.msra.mxu1 %v2884_v4 }
 0xf17   :  { %3771 = vmatmul.msk.f32.vlgmr.msra.gmra.mxu1 %vm709_vm12, %v4623_v20  ;;  %v2919_v20 = vmul.f32 %v4085_v15, %v2918_v33  ;;  %vm2921_vm12 = vweird.f32 %v2915_v9 }
 0xf18   :  { %vm2923_vm5 = vmor %vm2921_vm12, %vm2922_vm4 }
 0xf19   :  { %v2920_v11 = vadd.f32 %v4085_v15, %v2919_v20 }
 0xf1b   :  { %v2924_v28 = vsel %vm2923_vm5, %v4085_v15, %v2920_v11 }
 0xf1c   :  { %v2929_v27 = vsel %vm2926_vm6, %v2928_v25, %v2924_v28 }
 0xf94   :  { %v2908_v19 = vpop.f32.mrf.mxu1 }
 0xf95   :  { %v2930_v29 = vmul.f32 %v2929_v27, %v2908_v19 }
 0xf97   :  { %2964 = vmatmul.f32.vlgmr.msra.gmra.mxu2 %v2930_v29 }
0x101a   :  { %v2965_v17 = vpop.f32.mrf.mxu2 }
0x101b   :  { %v2966_v23 = vadd.f32 %v2965_v17, %v2947_v31 }
0x101d   :  { %2968 = vst [vmem:[%s4705_s14] sm:$0x3] %v2966_v23 }
0x101e   :  { %2973 = vsyncpa [#allocation3], 1 }
0x101f   :  { %2974 = vsyncpa [#allocation5], 1 }
0x1020   :  { %2975 = vsyncpa [#allocation8], 1 }

</bundles_post_ra>
